<compile_context>
chip_gen: v5e
topology: v5e:2x2
jax: 0.10.0
libtpu: 0.0.40
codegen_flags: <defaults>
</compile_context>

<pallas_src>
import jax
import jax.numpy as jnp
from jax.experimental import pallas as pl
from jax.experimental.pallas import tpu as pltpu

XDIM = 784   # flattened MNIST image (28*28); used unpadded end-to-end
HID = 512    # hidden width (multiple of 128)
LP = 128     # latent dim padded up to one full lane group


def _round_up(v, m):
    return ((v + m - 1) // m) * m


def _vae_dense_kernel(x_ref, eps_ref,
                      w1_ref, b1_ref,
                      w23_ref, b23_ref,
                      wd1_ref, bd1_ref,
                      wd2_ref, bd2_ref,
                      xhat_ref, mu_ref, sigma_ref):
    bf16 = jnp.bfloat16

    # Input tile arrives as f32 straight from HBM; cast to bf16 for the MXU.
    x = x_ref[...].astype(bf16)                                     # (tb, 784)

    # Encoder linear1 + ReLU (f32 accumulation on the MXU).
    h = jnp.dot(x, w1_ref[...], preferred_element_type=jnp.float32) + b1_ref[...]
    h = jnp.maximum(h, 0.0)                                         # (tb, 512) f32

    # Fused mu / log-sigma heads: one (512, 2*128) matmul, slice afterwards.
    head = jnp.dot(h.astype(bf16), w23_ref[...],
                   preferred_element_type=jnp.float32) + b23_ref[...]
    mu = head[:, :LP]                                               # (tb, 128) f32
    sigma = jnp.exp(head[:, LP:])                                   # (tb, 128) f32

    # Reparameterization (padded lanes: mu=0, sigma=1, eps=0 -> z=0).
    z = mu + sigma * eps_ref[...]                                   # (tb, 128) f32

    # Decoder linear1 + ReLU.
    hd = jnp.dot(z.astype(bf16), wd1_ref[...],
                 preferred_element_type=jnp.float32) + bd1_ref[...]
    hd = jnp.maximum(hd, 0.0)                                       # (tb, 512) f32

    # Decoder linear2 + sigmoid.  sigmoid(x) == 0.5*(tanh(x/2)+1): a single EUP
    # op per element instead of exp + divide.
    logits = jnp.dot(hd.astype(bf16), wd2_ref[...],
                     preferred_element_type=jnp.float32) + bd2_ref[...]
    xhat_ref[...] = 0.5 * (jnp.tanh(0.5 * logits) + 1.0)            # (tb, 784) f32
    mu_ref[...] = mu
    sigma_ref[...] = sigma


def pack_params(params, latent):
    """Fuse / pad / cast the torch-layout params into the kernel layout."""
    (w1, b1, w2, b2, w3, b3, wd1, bd1, wd2, bd2) = params
    bf16 = jnp.bfloat16

    # W1: (784, 512) bf16, unpadded.
    w1p = w1.astype(bf16)
    b1p = b1.astype(jnp.float32)                                    # (1, 512)

    # Fused heads: (512, 2*128); [:, :latent]=W2, [:, 128:128+latent]=W3.
    w23 = jnp.zeros((HID, 2 * LP), bf16)
    w23 = w23.at[:, :latent].set(w2.astype(bf16))
    w23 = w23.at[:, LP:LP + latent].set(w3.astype(bf16))
    b23 = jnp.zeros((1, 2 * LP), jnp.float32)
    b23 = b23.at[:, :latent].set(b2)
    b23 = b23.at[:, LP:LP + latent].set(b3)

    # Decoder W1: (latent, 512) -> (128, 512), zero rows for padded latent.
    wd1p = jnp.zeros((LP, HID), bf16).at[:latent, :].set(wd1.astype(bf16))
    bd1p = bd1.astype(jnp.float32)                                  # (1, 512)

    # Decoder W2: (512, 784) bf16, unpadded.
    wd2p = wd2.astype(bf16)
    bd2p = bd2.astype(jnp.float32)                                  # (1, 784)

    return (w1p, b1p, w23, b23, wd1p, bd1p, wd2p, bd2p)


def vae_dense_forward(x_nchw, eps, params, *, tb_max=512):
    """x_nchw: (B, 1, 28, 28) f32; eps: (B, latent) f32; params: torch-layout."""
    B = x_nchw.shape[0]
    latent = eps.shape[1]
    assert latent <= LP

    # Adaptive batch tile: big tiles for HBM-roofline efficiency, sized so the
    # last tile isn't mostly padding, and >= 2 grid steps when there's enough
    # work to split across v7x's two TensorCores.
    n_tiles = pl.cdiv(B, tb_max)
    if n_tiles < 2 and B >= 16:
        n_tiles = 2
    tb = _round_up(pl.cdiv(B, n_tiles), 8)
    Bp = tb * n_tiles
    grid = (n_tiles,)

    # x goes in unpadded on the feature axis (784 == full last dim is legal);
    # only pad batch rows when B doesn't divide the tile.
    x_flat = x_nchw.reshape(B, XDIM)
    if Bp != B:
        x_in = jnp.zeros((Bp, XDIM), x_flat.dtype).at[:B, :].set(x_flat)
    else:
        x_in = x_flat
    # eps padded to a full lane group (tiny: Bp x 128 x 4 B).
    eps_pad = jnp.zeros((Bp, LP), jnp.float32).at[:B, :latent].set(eps)

    (w1p, b1p, w23, b23, wd1p, bd1p, wd2p, bd2p) = pack_params(params, latent)

    # Batch-tiled arrays follow the grid; weights/biases stay resident in VMEM
    # (constant index_map => Mosaic skips the per-step re-copy).
    tiled = lambda cols: pl.BlockSpec((tb, cols), lambda i: (i, 0))
    resident = lambda shape: pl.BlockSpec(shape, lambda i: (0, 0))

    in_specs = [
        tiled(XDIM),               # x        (tb, 784) f32
        tiled(LP),                 # eps      (tb, 128) f32
        resident((XDIM, HID)),     # W1       (784, 512) bf16
        resident((1, HID)),        # b1
        resident((HID, 2 * LP)),   # W23 (fused mu / log-sigma)
        resident((1, 2 * LP)),     # b23
        resident((LP, HID)),       # Wd1
        resident((1, HID)),        # bd1
        resident((HID, XDIM)),     # Wd2      (512, 784) bf16
        resident((1, XDIM)),       # bd2
    ]
    out_specs = (tiled(XDIM), tiled(LP), tiled(LP))

    flops = 2 * Bp * (XDIM * HID + HID * 2 * LP + LP * HID + HID * XDIM)
    transcendentals = Bp * (XDIM + LP)           # tanh (sigmoid) + exp
    bytes_accessed = (
        Bp * XDIM * 4 + Bp * LP * 4                                   # x, eps
        + (w1p.size + w23.size + wd1p.size + wd2p.size) * 2           # bf16 weights
        + (b1p.size + b23.size + bd1p.size + bd2p.size) * 4           # f32 biases
        + (Bp * XDIM + 2 * Bp * LP) * 4)                              # outputs

    xhat, mu_pad, sigma_pad = pl.pallas_call(
        _vae_dense_kernel,
        out_shape=(
            jax.ShapeDtypeStruct((Bp, XDIM), jnp.float32),
            jax.ShapeDtypeStruct((Bp, LP), jnp.float32),
            jax.ShapeDtypeStruct((Bp, LP), jnp.float32),
        ),
        grid=grid,
        in_specs=in_specs,
        out_specs=out_specs,
        compiler_params=pltpu.CompilerParams(
            dimension_semantics=("parallel",),
            vmem_limit_bytes=48 * 1024 * 1024),
        cost_estimate=pl.CostEstimate(
            flops=flops,
            transcendentals=transcendentals,
            bytes_accessed=bytes_accessed),
    )(x_in, eps_pad,
      w1p, b1p, w23, b23, wd1p, bd1p, wd2p, bd2p)

    # Row slice only when the batch was padded; the NCHW reshape is free.
    if Bp != B:
        xhat = xhat[:B]
    x_hat = xhat.reshape(B, 1, 28, 28)
    mu = mu_pad[:B, :latent]
    sigma = sigma_pad[:B, :latent]
    return x_hat, mu, sigma


def init_params(key, latent_dims):
    """Init mirroring nn.Linear default (uniform +/- 1/sqrt(fan_in)).

    Weights are stored transposed relative to torch (in_features, out_features)
    so the math is x @ W. Biases are kept 2-D (1, out) for TPU layout.
    """
    def linear(k, fan_in, fan_out):
        kw, kb = jax.random.split(k)
        bound = 1.0 / jnp.sqrt(fan_in)
        w = jax.random.uniform(kw, (fan_in, fan_out), jnp.float32, -bound, bound)
        b = jax.random.uniform(kb, (1, fan_out), jnp.float32, -bound, bound)
        return w, b

    k1, k2, k3, k4, k5 = jax.random.split(key, 5)
    w1, b1 = linear(k1, 784, 512)            # encoder.linear1
    w2, b2 = linear(k2, 512, latent_dims)    # encoder.linear2 (mu)
    w3, b3 = linear(k3, 512, latent_dims)    # encoder.linear3 (log sigma)
    wd1, bd1 = linear(k4, latent_dims, 512)  # decoder.linear1
    wd2, bd2 = linear(k5, 512, 784)          # decoder.linear2
    return (w1, b1, w2, b2, w3, b3, wd1, bd1, wd2, bd2)


def reference_forward(x_nchw, eps, params):
    """Plain-JAX reference mirroring the kernel's bf16-matmul / f32-acc scheme."""
    (w1, b1, w2, b2, w3, b3, wd1, bd1, wd2, bd2) = params
    bf16 = jnp.bfloat16
    x = x_nchw.reshape(x_nchw.shape[0], 784).astype(bf16)
    h = jnp.maximum(
        jnp.dot(x, w1.astype(bf16), preferred_element_type=jnp.float32) + b1, 0.0)
    hb = h.astype(bf16)
    mu = jnp.dot(hb, w2.astype(bf16), preferred_element_type=jnp.float32) + b2
    sigma = jnp.exp(
        jnp.dot(hb, w3.astype(bf16), preferred_element_type=jnp.float32) + b3)
    z = mu + sigma * eps
    hd = jnp.maximum(
        jnp.dot(z.astype(bf16), wd1.astype(bf16),
                preferred_element_type=jnp.float32) + bd1, 0.0)
    xhat = jax.nn.sigmoid(
        jnp.dot(hd.astype(bf16), wd2.astype(bf16),
                preferred_element_type=jnp.float32) + bd2)
    return xhat.reshape(-1, 1, 28, 28), mu, sigma


if __name__ == "__main__":
    B = 8
    LATENT = 4

    key = jax.random.PRNGKey(0)
    kx, keps, kp = jax.random.split(key, 3)

    # MNIST-like input in [0, 1], NCHW as in the torch module.
    x = jax.random.uniform(kx, (B, 1, 28, 28), jnp.float32)
    eps = jax.random.normal(keps, (B, LATENT), jnp.float32)
    params = init_params(kp, LATENT)

    x_hat, mu, sigma = jax.block_until_ready(
        jax.jit(vae_dense_forward)(x, eps, params))

    # Sanity check against a plain-JAX reference using the same bf16 matmuls.
    x_hat_ref, mu_ref, sigma_ref = reference_forward(x, eps, params)
    assert x_hat.shape == (B, 1, 28, 28)
    assert mu.shape == (B, LATENT) and sigma.shape == (B, LATENT)
    assert jnp.allclose(x_hat, x_hat_ref, atol=1e-3, rtol=1e-3)
    assert jnp.allclose(mu, mu_ref, atol=1e-3, rtol=1e-3)
    assert jnp.allclose(sigma, sigma_ref, atol=1e-3, rtol=1e-3)

    print("KERNEL_OK")
</pallas_src>

<mosaic_0001>
module attributes {stable_mosaic.version = 11 : i64} {
  func.func @_vae_dense_kernel(%arg0: i32, %arg1: memref<8x784xf32, #tpu.memory_space<vmem>>, %arg2: memref<8x128xf32, #tpu.memory_space<vmem>>, %arg3: memref<784x512xbf16, #tpu.memory_space<vmem>>, %arg4: memref<1x512xf32, #tpu.memory_space<vmem>>, %arg5: memref<512x256xbf16, #tpu.memory_space<vmem>>, %arg6: memref<1x256xf32, #tpu.memory_space<vmem>>, %arg7: memref<128x512xbf16, #tpu.memory_space<vmem>>, %arg8: memref<1x512xf32, #tpu.memory_space<vmem>>, %arg9: memref<512x784xbf16, #tpu.memory_space<vmem>>, %arg10: memref<1x784xf32, #tpu.memory_space<vmem>>, %arg11: memref<8x784xf32, #tpu.memory_space<vmem>>, %arg12: memref<8x128xf32, #tpu.memory_space<vmem>>, %arg13: memref<8x128xf32, #tpu.memory_space<vmem>>) attributes {dimension_semantics = [#tpu.dimension_semantics<parallel>], iteration_bounds = array<i64: 1>, scalar_prefetch = 0 : i64, scratch_operands = 0 : i64, tpu.core_type = #tpu.core_type<tc>, window_params = [{transform_indices = @transform_0, window_bounds = array<i64: 8, 784>}, {transform_indices = @transform_1, window_bounds = array<i64: 8, 128>}, {pipeline_mode = #tpu.pipeline_mode<synchronous>, transform_indices = @transform_2, window_bounds = array<i64: 784, 512>}, {pipeline_mode = #tpu.pipeline_mode<synchronous>, transform_indices = @transform_3, window_bounds = array<i64: 1, 512>}, {pipeline_mode = #tpu.pipeline_mode<synchronous>, transform_indices = @transform_4, window_bounds = array<i64: 512, 256>}, {pipeline_mode = #tpu.pipeline_mode<synchronous>, transform_indices = @transform_5, window_bounds = array<i64: 1, 256>}, {pipeline_mode = #tpu.pipeline_mode<synchronous>, transform_indices = @transform_6, window_bounds = array<i64: 128, 512>}, {pipeline_mode = #tpu.pipeline_mode<synchronous>, transform_indices = @transform_7, window_bounds = array<i64: 1, 512>}, {pipeline_mode = #tpu.pipeline_mode<synchronous>, transform_indices = @transform_8, window_bounds = array<i64: 512, 784>}, {pipeline_mode = #tpu.pipeline_mode<synchronous>, transform_indices = @transform_9, window_bounds = array<i64: 1, 784>}, {transform_indices = @transform_10, window_bounds = array<i64: 8, 784>}, {transform_indices = @transform_11, window_bounds = array<i64: 8, 128>}, {transform_indices = @transform_12, window_bounds = array<i64: 8, 128>}]} {
    %c0 = arith.constant 0 : index
    %c0_0 = arith.constant 0 : index
    %0 = vector.load %arg1[%c0, %c0_0] : memref<8x784xf32, #tpu.memory_space<vmem>>, vector<8x784xf32>
    %1 = arith.truncf %0 : vector<8x784xf32> to vector<8x784xbf16>
    %c0_1 = arith.constant 0 : index
    %c0_2 = arith.constant 0 : index
    %2 = vector.load %arg3[%c0_1, %c0_2] : memref<784x512xbf16, #tpu.memory_space<vmem>>, vector<784x512xbf16>
    %cst = arith.constant dense<0.000000e+00> : vector<8x512xf32>
    %3 = tpu.matmul %1, %2, %cst {dimension_numbers = #tpu.dot_dimension_numbers<[1], [0], [0], [1], [0, 0, 1, 1], [], []>} : vector<8x784xbf16>, vector<784x512xbf16>, vector<8x512xf32> -> vector<8x512xf32>
    %c0_3 = arith.constant 0 : index
    %c0_4 = arith.constant 0 : index
    %4 = vector.load %arg4[%c0_3, %c0_4] : memref<1x512xf32, #tpu.memory_space<vmem>>, vector<1x512xf32>
    %5 = vector.broadcast %4 : vector<1x512xf32> to vector<8x512xf32>
    %6 = arith.addf %3, %5 : vector<8x512xf32>
    %cst_5 = arith.constant 0.000000e+00 : f32
    %7 = vector.broadcast %cst_5 : f32 to vector<8x512xf32>
    %8 = arith.maximumf %6, %7 : vector<8x512xf32>
    %9 = arith.truncf %8 : vector<8x512xf32> to vector<8x512xbf16>
    %c0_6 = arith.constant 0 : index
    %c0_7 = arith.constant 0 : index
    %10 = vector.load %arg5[%c0_6, %c0_7] : memref<512x256xbf16, #tpu.memory_space<vmem>>, vector<512x256xbf16>
    %cst_8 = arith.constant dense<0.000000e+00> : vector<8x256xf32>
    %11 = tpu.matmul %9, %10, %cst_8 {dimension_numbers = #tpu.dot_dimension_numbers<[1], [0], [0], [1], [0, 0, 1, 1], [], []>} : vector<8x512xbf16>, vector<512x256xbf16>, vector<8x256xf32> -> vector<8x256xf32>
    %c0_9 = arith.constant 0 : index
    %c0_10 = arith.constant 0 : index
    %12 = vector.load %arg6[%c0_9, %c0_10] : memref<1x256xf32, #tpu.memory_space<vmem>>, vector<1x256xf32>
    %13 = vector.broadcast %12 : vector<1x256xf32> to vector<8x256xf32>
    %14 = arith.addf %11, %13 : vector<8x256xf32>
    %15 = vector.extract_strided_slice %14 {offsets = [0, 0], sizes = [8, 128], strides = [1, 1]} : vector<8x256xf32> to vector<8x128xf32>
    %16 = vector.extract_strided_slice %14 {offsets = [0, 128], sizes = [8, 128], strides = [1, 1]} : vector<8x256xf32> to vector<8x128xf32>
    %17 = math.exp %16 : vector<8x128xf32>
    %c0_11 = arith.constant 0 : index
    %c0_12 = arith.constant 0 : index
    %18 = vector.load %arg2[%c0_11, %c0_12] : memref<8x128xf32, #tpu.memory_space<vmem>>, vector<8x128xf32>
    %19 = arith.mulf %17, %18 : vector<8x128xf32>
    %20 = arith.addf %15, %19 : vector<8x128xf32>
    %21 = arith.truncf %20 : vector<8x128xf32> to vector<8x128xbf16>
    %c0_13 = arith.constant 0 : index
    %c0_14 = arith.constant 0 : index
    %22 = vector.load %arg7[%c0_13, %c0_14] : memref<128x512xbf16, #tpu.memory_space<vmem>>, vector<128x512xbf16>
    %cst_15 = arith.constant dense<0.000000e+00> : vector<8x512xf32>
    %23 = tpu.matmul %21, %22, %cst_15 {dimension_numbers = #tpu.dot_dimension_numbers<[1], [0], [0], [1], [0, 0, 1, 1], [], []>} : vector<8x128xbf16>, vector<128x512xbf16>, vector<8x512xf32> -> vector<8x512xf32>
    %c0_16 = arith.constant 0 : index
    %c0_17 = arith.constant 0 : index
    %24 = vector.load %arg8[%c0_16, %c0_17] : memref<1x512xf32, #tpu.memory_space<vmem>>, vector<1x512xf32>
    %25 = vector.broadcast %24 : vector<1x512xf32> to vector<8x512xf32>
    %26 = arith.addf %23, %25 : vector<8x512xf32>
    %cst_18 = arith.constant 0.000000e+00 : f32
    %27 = vector.broadcast %cst_18 : f32 to vector<8x512xf32>
    %28 = arith.maximumf %26, %27 : vector<8x512xf32>
    %29 = arith.truncf %28 : vector<8x512xf32> to vector<8x512xbf16>
    %c0_19 = arith.constant 0 : index
    %c0_20 = arith.constant 0 : index
    %30 = vector.load %arg9[%c0_19, %c0_20] : memref<512x784xbf16, #tpu.memory_space<vmem>>, vector<512x784xbf16>
    %cst_21 = arith.constant dense<0.000000e+00> : vector<8x784xf32>
    %31 = tpu.matmul %29, %30, %cst_21 {dimension_numbers = #tpu.dot_dimension_numbers<[1], [0], [0], [1], [0, 0, 1, 1], [], []>} : vector<8x512xbf16>, vector<512x784xbf16>, vector<8x784xf32> -> vector<8x784xf32>
    %c0_22 = arith.constant 0 : index
    %c0_23 = arith.constant 0 : index
    %32 = vector.load %arg10[%c0_22, %c0_23] : memref<1x784xf32, #tpu.memory_space<vmem>>, vector<1x784xf32>
    %33 = vector.broadcast %32 : vector<1x784xf32> to vector<8x784xf32>
    %34 = arith.addf %31, %33 : vector<8x784xf32>
    %cst_24 = arith.constant 5.000000e-01 : f32
    %35 = vector.broadcast %cst_24 : f32 to vector<8x784xf32>
    %36 = arith.mulf %35, %34 : vector<8x784xf32>
    %37 = math.tanh %36 : vector<8x784xf32>
    %cst_25 = arith.constant 1.000000e+00 : f32
    %38 = vector.broadcast %cst_25 : f32 to vector<8x784xf32>
    %39 = arith.addf %37, %38 : vector<8x784xf32>
    %cst_26 = arith.constant 5.000000e-01 : f32
    %40 = vector.broadcast %cst_26 : f32 to vector<8x784xf32>
    %41 = arith.mulf %40, %39 : vector<8x784xf32>
    %c0_27 = arith.constant 0 : index
    %c0_28 = arith.constant 0 : index
    %42 = vector.load %arg11[%c0_27, %c0_28] : memref<8x784xf32, #tpu.memory_space<vmem>>, vector<8x784xf32>
    tpu.vector_store %arg11[%c0_27, %c0_28], %41 {strides = array<i32>} : memref<8x784xf32, #tpu.memory_space<vmem>>, vector<8x784xf32>,
    %c0_29 = arith.constant 0 : index
    %c0_30 = arith.constant 0 : index
    %43 = vector.load %arg12[%c0_29, %c0_30] : memref<8x128xf32, #tpu.memory_space<vmem>>, vector<8x128xf32>
    tpu.vector_store %arg12[%c0_29, %c0_30], %15 {strides = array<i32>} : memref<8x128xf32, #tpu.memory_space<vmem>>, vector<8x128xf32>,
    %c0_31 = arith.constant 0 : index
    %c0_32 = arith.constant 0 : index
    %44 = vector.load %arg13[%c0_31, %c0_32] : memref<8x128xf32, #tpu.memory_space<vmem>>, vector<8x128xf32>
    tpu.vector_store %arg13[%c0_31, %c0_32], %17 {strides = array<i32>} : memref<8x128xf32, #tpu.memory_space<vmem>>, vector<8x128xf32>,
    return
  }
  func.func @transform_0(%arg0: i32) -> (i32, i32) {
    %c0_i32 = arith.constant 0 : i32
    %c0_i32_0 = arith.constant 0 : i32
    return %arg0, %c0_i32 : i32, i32
  }
  func.func @transform_1(%arg0: i32) -> (i32, i32) {
    %c0_i32 = arith.constant 0 : i32
    %c0_i32_0 = arith.constant 0 : i32
    return %arg0, %c0_i32 : i32, i32
  }
  func.func @transform_2(%arg0: i32) -> (i32, i32) {
    %c0_i32 = arith.constant 0 : i32
    %c0_i32_0 = arith.constant 0 : i32
    %c0_i32_1 = arith.constant 0 : i32
    return %c0_i32, %c0_i32_0 : i32, i32
  }
  func.func @transform_3(%arg0: i32) -> (i32, i32) {
    %c0_i32 = arith.constant 0 : i32
    %c0_i32_0 = arith.constant 0 : i32
    %c0_i32_1 = arith.constant 0 : i32
    return %c0_i32, %c0_i32_0 : i32, i32
  }
  func.func @transform_4(%arg0: i32) -> (i32, i32) {
    %c0_i32 = arith.constant 0 : i32
    %c0_i32_0 = arith.constant 0 : i32
    %c0_i32_1 = arith.constant 0 : i32
    return %c0_i32, %c0_i32_0 : i32, i32
  }
  func.func @transform_5(%arg0: i32) -> (i32, i32) {
    %c0_i32 = arith.constant 0 : i32
    %c0_i32_0 = arith.constant 0 : i32
    %c0_i32_1 = arith.constant 0 : i32
    return %c0_i32, %c0_i32_0 : i32, i32
  }
  func.func @transform_6(%arg0: i32) -> (i32, i32) {
    %c0_i32 = arith.constant 0 : i32
    %c0_i32_0 = arith.constant 0 : i32
    %c0_i32_1 = arith.constant 0 : i32
    return %c0_i32, %c0_i32_0 : i32, i32
  }
  func.func @transform_7(%arg0: i32) -> (i32, i32) {
    %c0_i32 = arith.constant 0 : i32
    %c0_i32_0 = arith.constant 0 : i32
    %c0_i32_1 = arith.constant 0 : i32
    return %c0_i32, %c0_i32_0 : i32, i32
  }
  func.func @transform_8(%arg0: i32) -> (i32, i32) {
    %c0_i32 = arith.constant 0 : i32
    %c0_i32_0 = arith.constant 0 : i32
    %c0_i32_1 = arith.constant 0 : i32
    return %c0_i32, %c0_i32_0 : i32, i32
  }
  func.func @transform_9(%arg0: i32) -> (i32, i32) {
    %c0_i32 = arith.constant 0 : i32
    %c0_i32_0 = arith.constant 0 : i32
    %c0_i32_1 = arith.constant 0 : i32
    return %c0_i32, %c0_i32_0 : i32, i32
  }
  func.func @transform_10(%arg0: i32) -> (i32, i32) {
    %c0_i32 = arith.constant 0 : i32
    %c0_i32_0 = arith.constant 0 : i32
    return %arg0, %c0_i32 : i32, i32
  }
  func.func @transform_11(%arg0: i32) -> (i32, i32) {
    %c0_i32 = arith.constant 0 : i32
    %c0_i32_0 = arith.constant 0 : i32
    return %arg0, %c0_i32 : i32, i32
  }
  func.func @transform_12(%arg0: i32) -> (i32, i32) {
    %c0_i32 = arith.constant 0 : i32
    %c0_i32_0 = arith.constant 0 : i32
    return %arg0, %c0_i32 : i32, i32
  }
}

</mosaic_0001>

<bundles_post_ra>
// kernel: vae_dense_forward.1
= control target key start
LH: loop header
LB: loop body
LE: loop exit
PB: predicated region body
PF: predicated region fallthrough
CT: control target
= control target key end

     0   :  { %vm1239_vm0 = vcmask 130048   ;;  %s10183_s2 = inlined_call_operand.vmem [shape: bf16[784,512], index: 2, kind: input, shape index: {}]   ;;  %s10184_s0 = inlined_call_operand.vmem [shape: f32[8,784], index: 0, kind: input, shape index: {}]   ;;  %s10185_s3 = inlined_call_operand.vmem [shape: f32[1,512], index: 3, kind: input, shape index: {}]   ;;  %s10186_s4 = inlined_call_operand.vmem [shape: bf16[512,256], index: 4, kind: input, shape index: {}]   ;;  %s10187_s5 = inlined_call_operand.vmem [shape: f32[1,256], index: 5, kind: input, shape index: {}]   ;;  %s10188_s6 = inlined_call_operand.vmem [shape: bf16[128,512], index: 6, kind: input, shape index: {}]   ;;  %s10189_s11 = inlined_call_operand.vmem [shape: f32[8,128], index: 11, kind: output, shape index: {1}]   ;;  %s10190_s8 = inlined_call_operand.vmem [shape: bf16[512,784], index: 8, kind: input, shape index: {}]   ;;  %s10191_s1 = inlined_call_operand.vmem [shape: f32[8,128], index: 1, kind: input, shape index: {}]   ;;  %s10192_s12 = inlined_call_operand.vmem [shape: f32[8,128], index: 12, kind: output, shape index: {2}]   ;;  %s10193_s7 = inlined_call_operand.vmem [shape: f32[1,512], index: 7, kind: input, shape index: {}]   ;;  %s10194_s9 = inlined_call_operand.vmem [shape: f32[1,784], index: 9, kind: input, shape index: {}]   ;;  %s10195_s10 = inlined_call_operand.vmem [shape: f32[8,784], index: 10, kind: output, shape index: {0}]  }
   0x1   :  { %v4328_v0 = vld [vmem:[%s10183_s2 + $0xe0] sm:$0xf]  ;;  %v6312_v1 = vld [vmem:[%s10183_s2 + $0xec] sm:$0xf0] }
   0x2   :  { %v4456_v2 = vld [vmem:[%s10183_s2 + $0x1e0] sm:$0xf]  ;;  %v4329_v3 = vor.u32 %v6312_v1, %v4328_v0  ;;  %v6344_v4 = vld [vmem:[%s10183_s2 + $0x1ec] sm:$0xf0] }
   0x3   :  { %v4584_v5 = vld [vmem:[%s10183_s2 + $0x2e0] sm:$0xf]  ;;  %v6376_v6 = vld [vmem:[%s10183_s2 + $0x2ec] sm:$0xf0]  ;;  %v4457_v7 = vor.u32 %v6344_v4, %v4456_v2 }
   0x4   :  { %v4585_v8 = vor.u32 %v6376_v6, %v4584_v5  ;;  %v4712_v9 = vld [vmem:[%s10183_s2 + $0x3e0] sm:$0xf]  ;;  %v6408_v10 = vld [vmem:[%s10183_s2 + $0x3ec] sm:$0xf0]  ;;  %1243 = vmatpush.bf16.msra.mxu0 %v4329_v3 }
   0x5   :  { %v4312_v11 = vld [vmem:[%s10183_s2 + $0xc0] sm:$0xf]  ;;  %v4713_v12 = vor.u32 %v6408_v10, %v4712_v9  ;;  %v6308_v13 = vld [vmem:[%s10183_s2 + $0xcc] sm:$0xf0]  ;;  %1256 = vmatpush.bf16.msra.mxu1 %v4457_v7 }
   0x6   :  { %v4440_v14 = vld [vmem:[%s10183_s2 + $0x1c0] sm:$0xf]  ;;  %v6340_v15 = vld [vmem:[%s10183_s2 + $0x1cc] sm:$0xf0]  ;;  %1269 = vmatpush.bf16.msra.mxu2 %v4585_v8  ;;  %v4313_v16 = vor.u32 %v6308_v13, %v4312_v11 }
   0x7   :  { %v4441_v17 = vor.u32 %v6340_v15, %v4440_v14  ;;  %v4568_v18 = vld [vmem:[%s10183_s2 + $0x2c0] sm:$0xf]  ;;  %v6372_v19 = vld [vmem:[%s10183_s2 + $0x2cc] sm:$0xf0]  ;;  %1282 = vmatpush.bf16.msra.mxu3 %v4713_v12 }
   0x8   :  { %v4696_v20 = vld [vmem:[%s10183_s2 + $0x3c0] sm:$0xf]  ;;  %v4569_v21 = vor.u32 %v6372_v19, %v4568_v18  ;;  %v6404_v22 = vld [vmem:[%s10183_s2 + $0x3cc] sm:$0xf0]  ;;  %1244 = vmatpush.bf16.msra.mxu0 %v4313_v16 }
   0x9   :  { %v4296_v23 = vld [vmem:[%s10183_s2 + $0xa0] sm:$0xf]  ;;  %v6304_v24 = vld [vmem:[%s10183_s2 + $0xac] sm:$0xf0]  ;;  %v4697_v25 = vor.u32 %v6404_v22, %v4696_v20  ;;  %1257 = vmatpush.bf16.msra.mxu1 %v4441_v17 }
   0xa   :  { %v4424_v26 = vld [vmem:[%s10183_s2 + $0x1a0] sm:$0xf]  ;;  %v6336_v27 = vld [vmem:[%s10183_s2 + $0x1ac] sm:$0xf0]  ;;  %v4297_v29 = vor.u32 %v6304_v24, %v4296_v23  ;;  %1270 = vmatpush.bf16.msra.mxu2 %v4569_v21 }
   0xb   :  { %v4552_v28 = vld [vmem:[%s10183_s2 + $0x2a0] sm:$0xf]  ;;  %v6368_v30 = vld [vmem:[%s10183_s2 + $0x2ac] sm:$0xf0]  ;;  %v4425_v33 = vor.u32 %v6336_v27, %v4424_v26  ;;  %1283 = vmatpush.bf16.msra.mxu3 %v4697_v25 }
   0xc   :  { %v4680_v31 = vld [vmem:[%s10183_s2 + $0x3a0] sm:$0xf]  ;;  %v6400_v32 = vld [vmem:[%s10183_s2 + $0x3ac] sm:$0xf0]  ;;  %v4553_v34 = vor.u32 %v6368_v30, %v4552_v28  ;;  %1245 = vmatpush.bf16.msra.mxu0 %v4297_v29 }
   0xd   :  { %v4280_v35 = vld [vmem:[%s10183_s2 + $0x80] sm:$0xf]  ;;  %v6300_v36 = vld [vmem:[%s10183_s2 + $0x8c] sm:$0xf0]  ;;  %v4681_v38 = vor.u32 %v6400_v32, %v4680_v31  ;;  %1258 = vmatpush.bf16.msra.mxu1 %v4425_v33  ;;  %v6310_v33 = vld [vmem:[%s10183_s2 + $0xe4] sm:$0xf] }
   0xe   :  { %v4408_v37 = vld [vmem:[%s10183_s2 + $0x180] sm:$0xf]  ;;  %v6332_v39 = vld [vmem:[%s10183_s2 + $0x18c] sm:$0xf0]  ;;  %v4281_v44 = vor.u32 %v6300_v36, %v4280_v35  ;;  %1271 = vmatpush.bf16.msra.mxu2 %v4553_v34  ;;  %v4330_v34 = vld [vmem:[%s10183_s2 + $0xf0] sm:$0xf0] }
   0xf   :  { %v4536_v40 = vld [vmem:[%s10183_s2 + $0x280] sm:$0xf]  ;;  %v6364_v41 = vld [vmem:[%s10183_s2 + $0x28c] sm:$0xf0]  ;;  %v4409_v45 = vor.u32 %v6332_v39, %v4408_v37  ;;  %1284 = vmatpush.bf16.msra.mxu3 %v4681_v38 }
  0x10   :  { %v4664_v42 = vld [vmem:[%s10183_s2 + $0x380] sm:$0xf]  ;;  %v6396_v43 = vld [vmem:[%s10183_s2 + $0x38c] sm:$0xf0]  ;;  %v4537_v46 = vor.u32 %v6364_v41, %v4536_v40  ;;  %1246 = vmatpush.bf16.msra.mxu0 %v4281_v44  ;;  %v4458_v44 = vld [vmem:[%s10183_s2 + $0x1f0] sm:$0xf0] }
  0x11   :  { %v4264_v47 = vld [vmem:[%s10183_s2 + $0x60] sm:$0xf]  ;;  %v6296_v48 = vld [vmem:[%s10183_s2 + $0x6c] sm:$0xf0]  ;;  %v4665_v50 = vor.u32 %v6396_v43, %v4664_v42  ;;  %1259 = vmatpush.bf16.msra.mxu1 %v4409_v45  ;;  %v6342_v43 = vld [vmem:[%s10183_s2 + $0x1e4] sm:$0xf] }
  0x12   :  { %v4392_v49 = vld [vmem:[%s10183_s2 + $0x160] sm:$0xf]  ;;  %v6328_v51 = vld [vmem:[%s10183_s2 + $0x16c] sm:$0xf0]  ;;  %v4265_v56 = vor.u32 %v6296_v48, %v4264_v47  ;;  %1272 = vmatpush.bf16.msra.mxu2 %v4537_v46  ;;  %v42_v45 = vld [vmem:[%s10184_s0 + $0x18] sm:$0xff]  ;;  %v4333_v47 = vor.u32 %v6310_v33, %v4330_v34 }
  0x13   :  { %v4520_v52 = vld [vmem:[%s10183_s2 + $0x260] sm:$0xf]  ;;  %v6360_v53 = vld [vmem:[%s10183_s2 + $0x26c] sm:$0xf0]  ;;  %v4393_v57 = vor.u32 %v6328_v51, %v4392_v49  ;;  %1285 = vmatpush.bf16.msra.mxu3 %v4665_v50 }
  0x14   :  { %v4648_v54 = vld [vmem:[%s10183_s2 + $0x360] sm:$0xf]  ;;  %v6392_v55 = vld [vmem:[%s10183_s2 + $0x36c] sm:$0xf0]  ;;  %v4521_v58 = vor.u32 %v6360_v53, %v4520_v52  ;;  %1247 = vmatpush.bf16.msra.mxu0 %v4265_v56  ;;  %v6306_v53 = vld [vmem:[%s10183_s2 + $0xc4] sm:$0xf] }
  0x15   :  { %v4248_v59 = vld [vmem:[%s10183_s2 + $0x40] sm:$0xf]  ;;  %v6292_v60 = vld [vmem:[%s10183_s2 + $0x4c] sm:$0xf0]  ;;  %v4649_v62 = vor.u32 %v6392_v55, %v4648_v54  ;;  %1260 = vmatpush.bf16.msra.mxu1 %v4393_v57  ;;  %v4314_v54 = vld [vmem:[%s10183_s2 + $0xd0] sm:$0xf0]  ;;  %v7132_v57 = vpack.c.bf16 %v42_v45, %v42_v45 }
  0x16   :  { %v4376_v61 = vld [vmem:[%s10183_s2 + $0x140] sm:$0xf]  ;;  %v6324_v63 = vld [vmem:[%s10183_s2 + $0x14c] sm:$0xf0]  ;;  %v4249_v4 = vor.u32 %v6292_v60, %v4248_v59  ;;  %1273 = vmatpush.bf16.msra.mxu2 %v4521_v58  ;;  %v40_v58 = vld [vmem:[%s10184_s0 + $0x8] sm:$0xff]  ;;  %v4461_v59 = vor.u32 %v6342_v43, %v4458_v44 }
  0x17   :  { %v4504_v0 = vld [vmem:[%s10183_s2 + $0x240] sm:$0xf]  ;;  %v6356_v1 = vld [vmem:[%s10183_s2 + $0x24c] sm:$0xf0]  ;;  %v4377_v5 = vor.u32 %v6324_v63, %v4376_v61  ;;  %1286 = vmatpush.bf16.msra.mxu3 %v4649_v62  ;;  %v6338_v61 = vld [vmem:[%s10183_s2 + $0x1c4] sm:$0xf] }
  0x18   :  { %v4632_v2 = vld [vmem:[%s10183_s2 + $0x340] sm:$0xf]  ;;  %v6388_v3 = vld [vmem:[%s10183_s2 + $0x34c] sm:$0xf0]  ;;  %v4505_v6 = vor.u32 %v6356_v1, %v4504_v0  ;;  %1248 = vmatpush.bf16.msra.mxu0 %v4249_v4  ;;  %v4442_v62 = vld [vmem:[%s10183_s2 + $0x1d0] sm:$0xf0]  ;;  %v4317_v0 = vor.u32 %v6306_v53, %v4314_v54 }
  0x19   :  { %v4232_v7 = vld [vmem:[%s10183_s2 + $0x20] sm:$0xf]  ;;  %v6288_v8 = vld [vmem:[%s10183_s2 + $0x2c] sm:$0xf0]  ;;  %v4633_v10 = vor.u32 %v6388_v3, %v4632_v2  ;;  %1261 = vmatpush.bf16.msra.mxu1 %v4377_v5  ;;  %v6302_v5 = vld [vmem:[%s10183_s2 + $0xa4] sm:$0xf] }
  0x1a   :  { %v4360_v9 = vld [vmem:[%s10183_s2 + $0x120] sm:$0xf]  ;;  %v6320_v11 = vld [vmem:[%s10183_s2 + $0x12c] sm:$0xf0]  ;;  %v4233_v16 = vor.u32 %v6288_v8, %v4232_v7  ;;  %1274 = vmatpush.bf16.msra.mxu2 %v4505_v6  ;;  %v4298_v6 = vld [vmem:[%s10183_s2 + $0xb0] sm:$0xf0]  ;;  %v7163_v7 = vpack.c.bf16 %v40_v58, %v40_v58  ;;  %v4445_v8 = vor.u32 %v6338_v61, %v4442_v62 }
  0x1b   :  { %v4488_v12 = vld [vmem:[%s10183_s2 + $0x220] sm:$0xf]  ;;  %v6352_v13 = vld [vmem:[%s10183_s2 + $0x22c] sm:$0xf0]  ;;  %v4361_v20 = vor.u32 %v6320_v11, %v4360_v9  ;;  %1287 = vmatpush.bf16.msra.mxu3 %v4633_v10  ;;  %v6334_v10 = vld [vmem:[%s10183_s2 + $0x1a4] sm:$0xf] }
  0x1c   :  { %v4616_v14 = vld [vmem:[%s10183_s2 + $0x320] sm:$0xf]  ;;  %v6384_v15 = vld [vmem:[%s10183_s2 + $0x32c] sm:$0xf0]  ;;  %v4489_v21 = vor.u32 %v6352_v13, %v4488_v12  ;;  %1249 = vmatpush.bf16.msra.mxu0 %v4233_v16  ;;  %v4426_v11 = vld [vmem:[%s10183_s2 + $0x1b0] sm:$0xf0]  ;;  %v4301_v13 = vor.u32 %v6302_v5, %v4298_v6 }
  0x1d   :  { %v4216_v17 = vld [vmem:[%s10183_s2] sm:$0xf]  ;;  %v6284_v18 = vld [vmem:[%s10183_s2 + $0xc] sm:$0xf0]  ;;  %v4617_v25 = vor.u32 %v6384_v15, %v4616_v14  ;;  %1262 = vmatpush.bf16.msra.mxu1 %v4361_v20  ;;  %v4429_v20 = vor.u32 %v6334_v10, %v4426_v11  ;;  %v6290_v43 = vld [vmem:[%s10183_s2 + $0x44] sm:$0xf] }
  0x1e   :  { %v4344_v19 = vld [vmem:[%s10183_s2 + $0x100] sm:$0xf]  ;;  %v6316_v22 = vld [vmem:[%s10183_s2 + $0x10c] sm:$0xf0]  ;;  %v4217_v32 = vor.u32 %v6284_v18, %v4216_v17  ;;  %1275 = vmatpush.bf16.msra.mxu2 %v4489_v21  ;;  %v6298_v18 = vld [vmem:[%s10183_s2 + $0x84] sm:$0xf] }
  0x1f   :  { %v4472_v23 = vld [vmem:[%s10183_s2 + $0x200] sm:$0xf]  ;;  %v6348_v24 = vld [vmem:[%s10183_s2 + $0x20c] sm:$0xf0]  ;;  %v4345_v36 = vor.u32 %v6316_v22, %v4344_v19  ;;  %1288 = vmatpush.bf16.msra.mxu3 %v4617_v25  ;;  %v4282_v19 = vld [vmem:[%s10183_s2 + $0x90] sm:$0xf0] }
  0x20   :  { %v4600_v26 = vld [vmem:[%s10183_s2 + $0x300] sm:$0xf]  ;;  %v6380_v27 = vld [vmem:[%s10183_s2 + $0x30c] sm:$0xf0]  ;;  %v4473_v37 = vor.u32 %v6348_v24, %v4472_v23  ;;  %1250 = vmatpush.bf16.msra.mxu0 %v4217_v32  ;;  %v6330_v22 = vld [vmem:[%s10183_s2 + $0x184] sm:$0xf]  ;;  %v4285_v25 = vor.u32 %v6298_v18, %v4282_v19 }
  0x21   :  { %v4840_v28 = vld [vmem:[%s10183_s2 + $0x4e0] sm:$0xf]  ;;  %v6440_v29 = vld [vmem:[%s10183_s2 + $0x4ec] sm:$0xf0]  ;;  %v4601_v41 = vor.u32 %v6380_v27, %v4600_v26  ;;  %1263 = vmatpush.bf16.msra.mxu1 %v4345_v36  ;;  %v4410_v23 = vld [vmem:[%s10183_s2 + $0x190] sm:$0xf0] }
  0x22   :  { %v4968_v30 = vld [vmem:[%s10183_s2 + $0x5e0] sm:$0xf]  ;;  %v6472_v31 = vld [vmem:[%s10183_s2 + $0x5ec] sm:$0xf0]  ;;  %v4841_v42 = vor.u32 %v6440_v29, %v4840_v28  ;;  %1276 = vmatpush.bf16.msra.mxu2 %v4473_v37  ;;  %v4413_v33 = vor.u32 %v6330_v22, %v4410_v23  ;;  %v4394_v36 = vld [vmem:[%s10183_s2 + $0x170] sm:$0xf0] }
  0x23   :  { %v41_v35 = vld [vmem:[%s10184_s0 + $0x10] sm:$0xff]  ;;  %v4984_v38 = vld [vmem:[%s10183_s2 + $0x600] sm:$0xf]  ;;  %v4969_v46 = vor.u32 %v6472_v31, %v4968_v30  ;;  %1289 = vmatpush.bf16.msra.mxu3 %v4601_v41  ;;  %v6294_v30 = vld [vmem:[%s10183_s2 + $0x64] sm:$0xf] }
  0x24   :  { %v6476_v39 = vld [vmem:[%s10183_s2 + $0x60c] sm:$0xf0]  ;;  %v39_v40 = vld [vmem:[%s10184_s0] sm:$0xff]  ;;  %v7119_v51 = vpack.c.bf16 %v41_v35, %v41_v35  ;;  %1295 = vmatpush.bf16.msrb.mxu0 %v4841_v42  ;;  %1264 = vmatmul.bf16.vlgmr.msra.gmra.mxu1 %v7163_v7  ;;  %v4266_v31 = vld [vmem:[%s10183_s2 + $0x70] sm:$0xf0] }
  0x25   :  { %v4824_v48 = vld [vmem:[%s10183_s2 + $0x4c0] sm:$0xf]  ;;  %v6436_v49 = vld [vmem:[%s10183_s2 + $0x4cc] sm:$0xf0]  ;;  %v7130_v55 = vpack.c.bf16 %v39_v40, %v39_v40  ;;  %v4985_v56 = vor.u32 %v6476_v39, %v4984_v38  ;;  %1308 = vmatpush.bf16.msrb.mxu1 %v4969_v46  ;;  %v6326_v35 = vld [vmem:[%s10183_s2 + $0x164] sm:$0xf]  ;;  %v4269_v38 = vor.u32 %v6294_v30, %v4266_v31 }
  0x26   :  { %v4952_v50 = vld [vmem:[%s10183_s2 + $0x5c0] sm:$0xf]  ;;  %v6468_v52 = vld [vmem:[%s10183_s2 + $0x5cc] sm:$0xf0]  ;;  %v4825_v60 = vor.u32 %v6436_v49, %v4824_v48  ;;  %1277 = vmatmul.bf16.vlgmr.msra.gmra.mxu2 %v7119_v51  ;;  %1290 = vmatmul.bf16.vlgmr.msra.gmra.mxu3 %v7132_v57  ;;  %v4250_v44 = vld [vmem:[%s10183_s2 + $0x50] sm:$0xf0]  ;;  %v4397_v46 = vor.u32 %v6326_v35, %v4394_v36 }
  0x27   :  { %1334 = vmatpush.bf16.msrb.mxu3 %v4333_v47  ;;  %v4953_v63 = vor.u32 %v6468_v52, %v4952_v50  ;;  %v4808_v1 = vld [vmem:[%s10183_s2 + $0x4a0] sm:$0xf]  ;;  %v6432_v2 = vld [vmem:[%s10183_s2 + $0x4ac] sm:$0xf0]  ;;  %1251 = vmatmul.bf16.vlgmr.msra.gmra.mxu0 %v7130_v55  ;;  %v6322_v48 = vld [vmem:[%s10183_s2 + $0x144] sm:$0xf]  ;;  %v4253_v52 = vor.u32 %v6290_v43, %v4250_v44 }
  0x28   :  { %v4936_v3 = vld [vmem:[%s10183_s2 + $0x5a0] sm:$0xf]  ;;  %v6464_v4 = vld [vmem:[%s10183_s2 + $0x5ac] sm:$0xf0]  ;;  %1328 = vmatpush.bf16.msrb.mxu2 %v4985_v56  ;;  %1296 = vmatpush.bf16.msrb.mxu0 %v4825_v60  ;;  %v4809_v9 = vor.u32 %v6432_v2, %v4808_v1  ;;  %v4378_v49 = vld [vmem:[%s10183_s2 + $0x150] sm:$0xf0] }
  0x29   :  { %1309 = vmatpush.bf16.msrb.mxu1 %v4953_v63  ;;  %v4937_v12 = vor.u32 %v6464_v4, %v4936_v3  ;;  %v4792_v14 = vld [vmem:[%s10183_s2 + $0x480] sm:$0xf]  ;;  %v6428_v15 = vld [vmem:[%s10183_s2 + $0x48c] sm:$0xf0]  ;;  %v4234_v60 = vld [vmem:[%s10183_s2 + $0x30] sm:$0xf0]  ;;  %v4381_v61 = vor.u32 %v6322_v48, %v4378_v49 }
  0x2a   :  { %v4920_v16 = vld [vmem:[%s10183_s2 + $0x580] sm:$0xf]  ;;  %v6460_v17 = vld [vmem:[%s10183_s2 + $0x58c] sm:$0xf0]  ;;  %v4793_v21 = vor.u32 %v6428_v15, %v4792_v14  ;;  %v6318_v63 = vld [vmem:[%s10183_s2 + $0x124] sm:$0xf] }
  0x2b   :  { %1335 = vmatpush.bf16.msrb.mxu3 %v4317_v0  ;;  %v4921_v24 = vor.u32 %v6460_v17, %v4920_v16  ;;  %v4776_v26 = vld [vmem:[%s10183_s2 + $0x460] sm:$0xf]  ;;  %v6424_v27 = vld [vmem:[%s10183_s2 + $0x46c] sm:$0xf0]  ;;  %v4362_v0 = vld [vmem:[%s10183_s2 + $0x130] sm:$0xf0] }
  0x2c   :  { %1347 = vmatpush.bf16.msra.mxu2 %v4461_v59  ;;  %1297 = vmatpush.bf16.msrb.mxu0 %v4809_v9  ;;  %v4904_v28 = vld [vmem:[%s10183_s2 + $0x560] sm:$0xf]  ;;  %v6456_v29 = vld [vmem:[%s10183_s2 + $0x56c] sm:$0xf0]  ;;  %v4777_v34 = vor.u32 %v6424_v27, %v4776_v26  ;;  %v6286_v59 = vld [vmem:[%s10183_s2 + $0x24] sm:$0xf]  ;;  %v4365_v14 = vor.u32 %v6318_v63, %v4362_v0 }
  0x2d   :  { %1310 = vmatpush.bf16.msrb.mxu1 %v4937_v12  ;;  %v45_v32 = vld [vmem:[%s10184_s0 + $0x30] sm:$0xff]  ;;  %v4905_v37 = vor.u32 %v6456_v29, %v4904_v28  ;;  %v4760_v39 = vld [vmem:[%s10183_s2 + $0x440] sm:$0xf]  ;;  %v4237_v3 = vor.u32 %v6286_v59, %v4234_v60  ;;  %v6374_v10 = vld [vmem:[%s10183_s2 + $0x2e4] sm:$0xf] }
  0x2e   :  { %v6420_v40 = vld [vmem:[%s10183_s2 + $0x44c] sm:$0xf0]  ;;  %v4888_v41 = vld [vmem:[%s10183_s2 + $0x540] sm:$0xf]  ;;  %v7242_v45 = vpack.c.bf16 %v45_v32, %v45_v32  ;;  %v4218_v9 = vld [vmem:[%s10183_s2 + $0x10] sm:$0xf0] }
  0x2f   :  { %1336 = vmatpush.bf16.msrb.mxu3 %v4301_v13  ;;  %v6452_v42 = vld [vmem:[%s10183_s2 + $0x54c] sm:$0xf0]  ;;  %v4761_v47 = vor.u32 %v6420_v40, %v4760_v39  ;;  %v4744_v53 = vld [vmem:[%s10183_s2 + $0x420] sm:$0xf]  ;;  %v4586_v11 = vld [vmem:[%s10183_s2 + $0x2f0] sm:$0xf0] }
  0x30   :  { %1348 = vmatpush.bf16.msra.mxu2 %v4445_v8  ;;  %1298 = vmatpush.bf16.msrb.mxu0 %v4793_v21  ;;  %v4889_v50 = vor.u32 %v6452_v42, %v4888_v41  ;;  %v6416_v54 = vld [vmem:[%s10183_s2 + $0x42c] sm:$0xf0]  ;;  %v4872_v56 = vld [vmem:[%s10183_s2 + $0x520] sm:$0xf]  ;;  %v6282_v8 = vld [vmem:[%s10183_s2 + $0x4] sm:$0xf] }
  0x31   :  { %1311 = vmatpush.bf16.msrb.mxu1 %v4921_v24  ;;  %v6448_v58 = vld [vmem:[%s10183_s2 + $0x52c] sm:$0xf0]  ;;  %v4745_v62 = vor.u32 %v6416_v54, %v4744_v53  ;;  %v4728_v1 = vld [vmem:[%s10183_s2 + $0x400] sm:$0xf]  ;;  %v6406_v12 = vld [vmem:[%s10183_s2 + $0x3e4] sm:$0xf]  ;;  %v4589_v24 = vor.u32 %v6374_v10, %v4586_v11 }
  0x32   :  { %v4873_v2 = vor.u32 %v6448_v58, %v4872_v56  ;;  %v6412_v4 = vld [vmem:[%s10183_s2 + $0x40c] sm:$0xf0]  ;;  %v4856_v5 = vld [vmem:[%s10183_s2 + $0x500] sm:$0xf]  ;;  %v4714_v13 = vld [vmem:[%s10183_s2 + $0x3f0] sm:$0xf0] }
  0x33   :  { %1337 = vmatpush.bf16.msrb.mxu3 %v4285_v25  ;;  %v6444_v6 = vld [vmem:[%s10183_s2 + $0x50c] sm:$0xf0]  ;;  %v4729_v15 = vor.u32 %v6412_v4, %v4728_v1  ;;  %v6438_v16 = vld [vmem:[%s10183_s2 + $0x4e4] sm:$0xf]  ;;  %v4842_v17 = vld [vmem:[%s10183_s2 + $0x4f0] sm:$0xf0]  ;;  %v4717_v25 = vor.u32 %v6406_v12, %v4714_v13 }
  0x34   :  { %1349 = vmatpush.bf16.msra.mxu2 %v4429_v20  ;;  %1299 = vmatpush.bf16.msrb.mxu0 %v4777_v34  ;;  %v43_v18 = vld [vmem:[%s10184_s0 + $0x20] sm:$0xff]  ;;  %v4857_v19 = vor.u32 %v6444_v6, %v4856_v5  ;;  %v4221_v20 = vor.u32 %v6282_v8, %v4218_v9  ;;  %v4346_v22 = vld [vmem:[%s10183_s2 + $0x110] sm:$0xf0]  ;;  %v44_v23 = vld [vmem:[%s10184_s0 + $0x28] sm:$0xff]  ;;  %v4845_v29 = vor.u32 %v6438_v16, %v4842_v17 }
  0x35   :  { %1312 = vmatpush.bf16.msrb.mxu1 %v4905_v37  ;;  %v6314_v21 = vld [vmem:[%s10183_s2 + $0x104] sm:$0xf]  ;;  %v4970_v27 = vld [vmem:[%s10183_s2 + $0x5f0] sm:$0xf0]  ;;  %v7333_v30 = vpack.c.bf16 %v43_v18, %v43_v18  ;;  %v7344_v35 = vpack.c.bf16 %v44_v23, %v44_v23 }
  0x36   :  { %4998 = vmatmul.msk.bf16.vlgmr.msrb.gmra.mxu2 %vm1239_vm0, %v7242_v45  ;;  %v6470_v26 = vld [vmem:[%s10183_s2 + $0x5e4] sm:$0xf]  ;;  %v4570_v31 = vld [vmem:[%s10183_s2 + $0x2d0] sm:$0xf0]  ;;  %v4349_v34 = vor.u32 %v6314_v21, %v4346_v22 }
  0x37   :  { %1338 = vmatpush.bf16.msrb.mxu3 %v4269_v38  ;;  %v6370_v28 = vld [vmem:[%s10183_s2 + $0x2c4] sm:$0xf]  ;;  %v4826_v37 = vld [vmem:[%s10183_s2 + $0x4d0] sm:$0xf0]  ;;  %v4973_v38 = vor.u32 %v6470_v26, %v4970_v27 }
  0x38   :  { %1350 = vmatpush.bf16.msra.mxu2 %v4413_v33  ;;  %1300 = vmatpush.bf16.msrb.mxu0 %v4761_v47  ;;  %v6402_v32 = vld [vmem:[%s10183_s2 + $0x3c4] sm:$0xf]  ;;  %v4698_v33 = vld [vmem:[%s10183_s2 + $0x3d0] sm:$0xf0]  ;;  %v4573_v39 = vor.u32 %v6370_v28, %v4570_v31 }
  0x39   :  { %1313 = vmatpush.bf16.msrb.mxu1 %v4889_v50  ;;  %v6434_v36 = vld [vmem:[%s10183_s2 + $0x4c4] sm:$0xf]  ;;  %v4701_v40 = vor.u32 %v6402_v32, %v4698_v33  ;;  %v4954_v42 = vld [vmem:[%s10183_s2 + $0x5d0] sm:$0xf0] }
  0x3a   :  { %v6466_v41 = vld [vmem:[%s10183_s2 + $0x5c4] sm:$0xf]  ;;  %v4829_v44 = vor.u32 %v6434_v36, %v4826_v37  ;;  %v4682_v48 = vld [vmem:[%s10183_s2 + $0x3b0] sm:$0xf0] }
  0x3b   :  { %1339 = vmatpush.bf16.msrb.mxu3 %v4253_v52  ;;  %v6366_v43 = vld [vmem:[%s10183_s2 + $0x2a4] sm:$0xf]  ;;  %v4810_v50 = vld [vmem:[%s10183_s2 + $0x4b0] sm:$0xf0]  ;;  %v4957_v52 = vor.u32 %v6466_v41, %v4954_v42 }
  0x3c   :  { %1351 = vmatpush.bf16.msra.mxu2 %v4397_v46  ;;  %1301 = vmatpush.bf16.msrb.mxu0 %v4745_v62  ;;  %v4554_v46 = vld [vmem:[%s10183_s2 + $0x2b0] sm:$0xf0]  ;;  %v6398_v47 = vld [vmem:[%s10183_s2 + $0x3a4] sm:$0xf] }
  0x3d   :  { %1314 = vmatpush.bf16.msrb.mxu1 %v4873_v2  ;;  %v6430_v49 = vld [vmem:[%s10183_s2 + $0x4a4] sm:$0xf]  ;;  %v4557_v53 = vor.u32 %v6366_v43, %v4554_v46  ;;  %v4685_v54 = vor.u32 %v6398_v47, %v4682_v48  ;;  %v4938_v58 = vld [vmem:[%s10183_s2 + $0x5b0] sm:$0xf0] }
  0x3e   :  { %v6462_v56 = vld [vmem:[%s10183_s2 + $0x5a4] sm:$0xf]  ;;  %v4813_v60 = vor.u32 %v6430_v49, %v4810_v50  ;;  %v4666_v63 = vld [vmem:[%s10183_s2 + $0x390] sm:$0xf0] }
  0x3f   :  { %1340 = vmatpush.bf16.msrb.mxu3 %v4237_v3  ;;  %v6362_v59 = vld [vmem:[%s10183_s2 + $0x284] sm:$0xf]  ;;  %v4794_v1 = vld [vmem:[%s10183_s2 + $0x490] sm:$0xf0]  ;;  %v4941_v2 = vor.u32 %v6462_v56, %v4938_v58  ;;  %v4336_v56 = vld [vmem:[%s10183_s2 + $0xe8] sm:$0xf] }
  0x40   :  { %1352 = vmatpush.bf16.msra.mxu2 %v4381_v61  ;;  %1302 = vmatpush.bf16.msrb.mxu0 %v4729_v15  ;;  %v4538_v61 = vld [vmem:[%s10183_s2 + $0x290] sm:$0xf0]  ;;  %v6394_v62 = vld [vmem:[%s10183_s2 + $0x384] sm:$0xf]  ;;  %v6313_v58 = vld [vmem:[%s10183_s2 + $0xf4] sm:$0xf0] }
  0x41   :  { %1315 = vmatpush.bf16.msrb.mxu1 %v4857_v19  ;;  %v6426_v0 = vld [vmem:[%s10183_s2 + $0x484] sm:$0xf]  ;;  %v4541_v3 = vor.u32 %v6362_v59, %v4538_v61  ;;  %v4669_v4 = vor.u32 %v6394_v62, %v4666_v63  ;;  %v4922_v6 = vld [vmem:[%s10183_s2 + $0x590] sm:$0xf0]  ;;  %v4592_v62 = vld [vmem:[%s10183_s2 + $0x2e8] sm:$0xf] }
  0x42   :  { %v6458_v5 = vld [vmem:[%s10183_s2 + $0x584] sm:$0xf]  ;;  %v4797_v9 = vor.u32 %v6426_v0, %v4794_v1  ;;  %v4522_v10 = vld [vmem:[%s10183_s2 + $0x270] sm:$0xf0]  ;;  %v6377_v63 = vld [vmem:[%s10183_s2 + $0x2f4] sm:$0xf0] }
  0x43   :  { %1341 = vmatpush.bf16.msrb.mxu3 %v4221_v20  ;;  %1303 = vmatmul.bf16.vlgmr.msrb.gmra.mxu0 %v7333_v30  ;;  %v6358_v8 = vld [vmem:[%s10183_s2 + $0x264] sm:$0xf]  ;;  %v4650_v12 = vld [vmem:[%s10183_s2 + $0x370] sm:$0xf0]  ;;  %v4925_v15 = vor.u32 %v6458_v5, %v4922_v6  ;;  %v4337_v5 = vor.u32 %v6313_v58, %v4336_v56  ;;  %v4720_v6 = vld [vmem:[%s10183_s2 + $0x3e8] sm:$0xf] }
  0x44   :  { %1353 = vmatpush.bf16.msra.mxu2 %v4365_v14  ;;  %1360 = vmatpush.bf16.msra.mxu0 %v4589_v24  ;;  %v6390_v11 = vld [vmem:[%s10183_s2 + $0x364] sm:$0xf]  ;;  %v4778_v14 = vld [vmem:[%s10183_s2 + $0x470] sm:$0xf0]  ;;  %v4525_v16 = vor.u32 %v6358_v8, %v4522_v10  ;;  %v6409_v8 = vld [vmem:[%s10183_s2 + $0x3f4] sm:$0xf0] }
  0x45   :  { %1373 = vmatpush.bf16.msra.mxu1 %v4717_v25  ;;  %v6422_v13 = vld [vmem:[%s10183_s2 + $0x464] sm:$0xf]  ;;  %v4653_v17 = vor.u32 %v6390_v11, %v4650_v12  ;;  %v4906_v19 = vld [vmem:[%s10183_s2 + $0x570] sm:$0xf0]  ;;  %v4464_v10 = vld [vmem:[%s10183_s2 + $0x1e8] sm:$0xf]  ;;  %v4593_v12 = vor.u32 %v6377_v63, %v4592_v62 }
  0x46   :  { %1316 = vmatmul.bf16.vlgmr.msrb.gmra.mxu1 %v7344_v35  ;;  %1342 = vmatmul.bf16.vlgmr.msrb.gmra.mxu3 %v7130_v55  ;;  %v6454_v18 = vld [vmem:[%s10183_s2 + $0x564] sm:$0xf]  ;;  %v4781_v21 = vor.u32 %v6422_v13, %v4778_v14  ;;  %v4506_v22 = vld [vmem:[%s10183_s2 + $0x250] sm:$0xf0]  ;;  %v6345_v11 = vld [vmem:[%s10183_s2 + $0x1f4] sm:$0xf0] }
  0x47   :  { %1386 = vmatpush.bf16.msra.mxu3 %v4845_v29  ;;  %v6354_v20 = vld [vmem:[%s10183_s2 + $0x244] sm:$0xf]  ;;  %v4634_v24 = vld [vmem:[%s10183_s2 + $0x350] sm:$0xf0]  ;;  %v4909_v27 = vor.u32 %v6454_v18, %v4906_v19  ;;  %v4320_v14 = vld [vmem:[%s10183_s2 + $0xc8] sm:$0xf]  ;;  %v4465_v19 = vor.u32 %v6345_v11, %v4464_v10 }
  0x48   :  { %1354 = vmatpush.bf16.msra.mxu2 %v4349_v34  ;;  %1361 = vmatpush.bf16.msra.mxu0 %v4573_v39  ;;  %v6386_v23 = vld [vmem:[%s10183_s2 + $0x344] sm:$0xf]  ;;  %v4762_v26 = vld [vmem:[%s10183_s2 + $0x450] sm:$0xf0]  ;;  %v4509_v28 = vor.u32 %v6354_v20, %v4506_v22  ;;  %v6373_v18 = vld [vmem:[%s10183_s2 + $0x2d4] sm:$0xf0] }
  0x49   :  { %1374 = vmatpush.bf16.msra.mxu1 %v4701_v40  ;;  %v6418_v25 = vld [vmem:[%s10183_s2 + $0x444] sm:$0xf]  ;;  %v4637_v29 = vor.u32 %v6386_v23, %v4634_v24  ;;  %v4890_v32 = vld [vmem:[%s10183_s2 + $0x550] sm:$0xf0]  ;;  %v4704_v20 = vld [vmem:[%s10183_s2 + $0x3c8] sm:$0xf] }
  0x4a   :  { %v6450_v31 = vld [vmem:[%s10183_s2 + $0x544] sm:$0xf]  ;;  %v4765_v34 = vor.u32 %v6418_v25, %v4762_v26  ;;  %v4490_v36 = vld [vmem:[%s10183_s2 + $0x230] sm:$0xf0]  ;;  %v4448_v23 = vld [vmem:[%s10183_s2 + $0x1c8] sm:$0xf] }
  0x4b   :  { %1387 = vmatpush.bf16.msra.mxu3 %v4829_v44  ;;  %1355 = vmatmul.bf16.vlgmr.msra.gmra.mxu2 %v7163_v7  ;;  %v6350_v33 = vld [vmem:[%s10183_s2 + $0x224] sm:$0xf]  ;;  %v4746_v40 = vld [vmem:[%s10183_s2 + $0x430] sm:$0xf0]  ;;  %v4893_v41 = vor.u32 %v6450_v31, %v4890_v32  ;;  %v6341_v24 = vld [vmem:[%s10183_s2 + $0x1d4] sm:$0xf0] }
  0x4c   :  { %1399 = vmatpush.bf16.msrb.mxu2 %v4973_v38  ;;  %1362 = vmatpush.bf16.msra.mxu0 %v4557_v53  ;;  %v6382_v37 = vld [vmem:[%s10183_s2 + $0x324] sm:$0xf]  ;;  %v4618_v38 = vld [vmem:[%s10183_s2 + $0x330] sm:$0xf0]  ;;  %v4493_v44 = vor.u32 %v6350_v33, %v4490_v36  ;;  %v4304_v26 = vld [vmem:[%s10183_s2 + $0xa8] sm:$0xf]  ;;  %v4449_v32 = vor.u32 %v6341_v24, %v4448_v23 }
  0x4d   :  { %1375 = vmatpush.bf16.msra.mxu1 %v4685_v54  ;;  %v6414_v39 = vld [vmem:[%s10183_s2 + $0x424] sm:$0xf]  ;;  %v4874_v43 = vld [vmem:[%s10183_s2 + $0x530] sm:$0xf0]  ;;  %v4621_v46 = vor.u32 %v6382_v37, %v4618_v38  ;;  %v6369_v31 = vld [vmem:[%s10183_s2 + $0x2b4] sm:$0xf0] }
  0x4e   :  { %v6446_v42 = vld [vmem:[%s10183_s2 + $0x524] sm:$0xf]  ;;  %v4474_v48 = vld [vmem:[%s10183_s2 + $0x210] sm:$0xf0]  ;;  %v4749_v50 = vor.u32 %v6414_v39, %v4746_v40  ;;  %v4688_v33 = vld [vmem:[%s10183_s2 + $0x3a8] sm:$0xf] }
  0x4f   :  { %1388 = vmatpush.bf16.msra.mxu3 %v4813_v60  ;;  %v6346_v47 = vld [vmem:[%s10183_s2 + $0x204] sm:$0xf]  ;;  %v4730_v54 = vld [vmem:[%s10183_s2 + $0x410] sm:$0xf0]  ;;  %v4877_v60 = vor.u32 %v6446_v42, %v4874_v43  ;;  %v4432_v37 = vld [vmem:[%s10183_s2 + $0x1a8] sm:$0xf] }
  0x50   :  { %1400 = vmatpush.bf16.msrb.mxu2 %v4957_v52  ;;  %1363 = vmatpush.bf16.msra.mxu0 %v4541_v3  ;;  %v6378_v49 = vld [vmem:[%s10183_s2 + $0x304] sm:$0xf]  ;;  %v4602_v52 = vld [vmem:[%s10183_s2 + $0x310] sm:$0xf0]  ;;  %v4477_v0 = vor.u32 %v6346_v47, %v4474_v48  ;;  %v6337_v38 = vld [vmem:[%s10183_s2 + $0x1b4] sm:$0xf0] }
  0x51   :  { %1376 = vmatpush.bf16.msra.mxu1 %v4669_v4  ;;  %v6410_v53 = vld [vmem:[%s10183_s2 + $0x404] sm:$0xf]  ;;  %v4986_v61 = vld [vmem:[%s10183_s2 + $0x610] sm:$0xf0]  ;;  %v4605_v1 = vor.u32 %v6378_v49, %v4602_v52  ;;  %v4288_v40 = vld [vmem:[%s10183_s2 + $0x88] sm:$0xf] }
  0x52   :  { %v6474_v59 = vld [vmem:[%s10183_s2 + $0x604] sm:$0xf]  ;;  %v4858_v3 = vld [vmem:[%s10183_s2 + $0x510] sm:$0xf0]  ;;  %v4733_v4 = vor.u32 %v6410_v53, %v4730_v54  ;;  %v4544_v43 = vld [vmem:[%s10183_s2 + $0x288] sm:$0xf] }
  0x53   :  { %1389 = vmatpush.bf16.msra.mxu3 %v4797_v9  ;;  %v4989_v9 = vor.u32 %v6474_v59, %v4986_v61  ;;  %v4672_v47 = vld [vmem:[%s10183_s2 + $0x388] sm:$0xf]  ;;  %v6397_v48 = vld [vmem:[%s10183_s2 + $0x394] sm:$0xf0] }
  0x54   :  { %1401 = vmatpush.bf16.msrb.mxu2 %v4941_v2  ;;  %1364 = vmatpush.bf16.msra.mxu0 %v4525_v16  ;;  %v6442_v2 = vld [vmem:[%s10183_s2 + $0x504] sm:$0xf]  ;;  %v4721_v16 = vor.u32 %v6409_v8, %v4720_v6  ;;  %v6333_v52 = vld [vmem:[%s10183_s2 + $0x194] sm:$0xf0]  ;;  %v4272_v54 = vld [vmem:[%s10183_s2 + $0x68] sm:$0xf]  ;;  %v4673_v58 = vor.u32 %v6397_v48, %v4672_v47 }
  0x55   :  { %1377 = vmatpush.bf16.msra.mxu1 %v4653_v17  ;;  %v4861_v13 = vor.u32 %v6442_v2, %v4858_v3  ;;  %v4576_v17 = vld [vmem:[%s10183_s2 + $0x2c8] sm:$0xf]  ;;  %v6297_v56 = vld [vmem:[%s10183_s2 + $0x74] sm:$0xf0]  ;;  %v6311_v47 = vld [vmem:[%s10183_s2 + $0xec] sm:$0xf] }
  0x56   :  { %v4577_v25 = vor.u32 %v6373_v18, %v4576_v17  ;;  %v4528_v59 = vld [vmem:[%s10183_s2 + $0x268] sm:$0xf]  ;;  %v6393_v63 = vld [vmem:[%s10183_s2 + $0x374] sm:$0xf0]  ;;  %v4338_v48 = vld [vmem:[%s10183_s2 + $0xf8] sm:$0xf0] }
  0x57   :  { %1390 = vmatpush.bf16.msra.mxu3 %v4781_v21  ;;  %v6405_v21 = vld [vmem:[%s10183_s2 + $0x3d4] sm:$0xf0]  ;;  %v4656_v62 = vld [vmem:[%s10183_s2 + $0x368] sm:$0xf] }
  0x58   :  { %1402 = vmatpush.bf16.msrb.mxu2 %v4925_v15  ;;  %1365 = vmatpush.bf16.msra.mxu0 %v4509_v28  ;;  %v6309_v15 = vld [vmem:[%s10183_s2 + $0xd4] sm:$0xf0]  ;;  %v4705_v28 = vor.u32 %v6405_v21, %v4704_v20  ;;  %v4657_v6 = vor.u32 %v6393_v63, %v4656_v62  ;;  %v4512_v8 = vld [vmem:[%s10183_s2 + $0x248] sm:$0xf]  ;;  %v4341_v63 = vor.u32 %v6311_v47, %v4338_v48 }
  0x59   :  { %1378 = vmatpush.bf16.msra.mxu1 %v4637_v29  ;;  %v4321_v22 = vor.u32 %v6309_v15, %v4320_v14  ;;  %v4560_v29 = vld [vmem:[%s10183_s2 + $0x2a8] sm:$0xf]  ;;  %v6329_v2 = vld [vmem:[%s10183_s2 + $0x174] sm:$0xf0] }
  0x5a   :  { %v4561_v39 = vor.u32 %v6369_v31, %v4560_v29  ;;  %v4640_v11 = vld [vmem:[%s10183_s2 + $0x348] sm:$0xf]  ;;  %v6325_v15 = vld [vmem:[%s10183_s2 + $0x154] sm:$0xf0] }
  0x5b   :  { %1391 = vmatpush.bf16.msra.mxu3 %v4765_v34  ;;  %v6401_v34 = vld [vmem:[%s10183_s2 + $0x3b4] sm:$0xf0]  ;;  %v4384_v14 = vld [vmem:[%s10183_s2 + $0x148] sm:$0xf] }
  0x5c   :  { %1403 = vmatpush.bf16.msrb.mxu2 %v4909_v27  ;;  %1366 = vmatpush.bf16.msra.mxu0 %v4493_v44  ;;  %v6305_v27 = vld [vmem:[%s10183_s2 + $0xb4] sm:$0xf0]  ;;  %v4689_v42 = vor.u32 %v6401_v34, %v4688_v33  ;;  %v4240_v17 = vld [vmem:[%s10183_s2 + $0x28] sm:$0xf] }
  0x5d   :  { %1379 = vmatpush.bf16.msra.mxu1 %v4621_v46  ;;  %v4305_v36 = vor.u32 %v6305_v27, %v4304_v26  ;;  %v6365_v44 = vld [vmem:[%s10183_s2 + $0x294] sm:$0xf0]  ;;  %v4433_v46 = vor.u32 %v6337_v38, %v4432_v37  ;;  %v4496_v20 = vld [vmem:[%s10183_s2 + $0x228] sm:$0xf] }
  0x5e   :  { %v4545_v53 = vor.u32 %v6365_v44, %v4544_v43  ;;  %v6289_v18 = vld [vmem:[%s10183_s2 + $0x34] sm:$0xf0]  ;;  %v4624_v23 = vld [vmem:[%s10183_s2 + $0x328] sm:$0xf] }
  0x5f   :  { %1392 = vmatpush.bf16.msra.mxu3 %v4749_v50  ;;  %v4416_v50 = vld [vmem:[%s10183_s2 + $0x188] sm:$0xf]  ;;  %v6353_v21 = vld [vmem:[%s10183_s2 + $0x234] sm:$0xf0] }
  0x60   :  { %1404 = vmatpush.bf16.msrb.mxu2 %v4893_v41  ;;  %1367 = vmatpush.bf16.msra.mxu0 %v4477_v0  ;;  %v6301_v41 = vld [vmem:[%s10183_s2 + $0x94] sm:$0xf0]  ;;  %v4417_v61 = vor.u32 %v6333_v52, %v4416_v50  ;;  %v4273_v0 = vor.u32 %v6297_v56, %v4272_v54  ;;  %v4368_v26 = vld [vmem:[%s10183_s2 + $0x128] sm:$0xf]  ;;  %v4497_v29 = vor.u32 %v6353_v21, %v4496_v20 }
  0x61   :  { %1380 = vmatpush.bf16.msra.mxu1 %v4605_v1  ;;  %v4289_v49 = vor.u32 %v6301_v41, %v4288_v40  ;;  %v4400_v1 = vld [vmem:[%s10183_s2 + $0x168] sm:$0xf]  ;;  %v6385_v24 = vld [vmem:[%s10183_s2 + $0x334] sm:$0xf0] }
  0x62   :  { %v4401_v10 = vor.u32 %v6329_v2, %v4400_v1  ;;  %v6321_v27 = vld [vmem:[%s10183_s2 + $0x134] sm:$0xf0]  ;;  %v4625_v34 = vor.u32 %v6385_v24, %v4624_v23  ;;  %v4480_v37 = vld [vmem:[%s10183_s2 + $0x208] sm:$0xf]  ;;  %v6307_v1 = vld [vmem:[%s10183_s2 + $0xcc] sm:$0xf] }
  0x63   :  { %1393 = vmatpush.bf16.msra.mxu3 %v4733_v4  ;;  %1368 = vmatmul.bf16.vlgmr.msra.gmra.mxu0 %v7119_v51  ;;  %v4256_v4 = vld [vmem:[%s10183_s2 + $0x48] sm:$0xf]  ;;  %v6285_v31 = vld [vmem:[%s10183_s2 + $0x14] sm:$0xf0]  ;;  %v4369_v40 = vor.u32 %v6321_v27, %v4368_v26  ;;  %v4322_v2 = vld [vmem:[%s10183_s2 + $0xd8] sm:$0xf0] }
  0x64   :  { %1405 = vmatpush.bf16.msrb.mxu2 %v4877_v60  ;;  %1451 = vmatpush.bf16.msrb.mxu0 %v4593_v12  ;;  %v6361_v60 = vld [vmem:[%s10183_s2 + $0x274] sm:$0xf0]  ;;  %v4976_v52 = vld [vmem:[%s10183_s2 + $0x5e8] sm:$0xf]  ;;  %v4434_v23 = vld [vmem:[%s10183_s2 + $0x1b8] sm:$0xf0] }
  0x65   :  { %1425 = vmatpush.bf16.msrb.mxu1 %v4337_v5  ;;  %v4529_v3 = vor.u32 %v6361_v60, %v4528_v59  ;;  %v6293_v5 = vld [vmem:[%s10183_s2 + $0x54] sm:$0xf0]  ;;  %v4832_v54 = vld [vmem:[%s10183_s2 + $0x4c8] sm:$0xf]  ;;  %v6343_v60 = vld [vmem:[%s10183_s2 + $0x1ec] sm:$0xf] }
  0x66   :  { %1394 = vmatmul.bf16.vlgmr.msra.gmra.mxu3 %v7333_v30  ;;  %1381 = vmatmul.bf16.vlgmr.msra.gmra.mxu1 %v7132_v57  ;;  %v6389_v12 = vld [vmem:[%s10183_s2 + $0x354] sm:$0xf0]  ;;  %v4800_v20 = vld [vmem:[%s10183_s2 + $0x488] sm:$0xf]  ;;  %v6299_v26 = vld [vmem:[%s10183_s2 + $0x8c] sm:$0xf] }
  0x67   :  { %1419 = vmatpush.bf16.msrb.mxu3 %v4989_v9  ;;  %v6357_v9 = vld [vmem:[%s10183_s2 + $0x254] sm:$0xf0]  ;;  %v4290_v27 = vld [vmem:[%s10183_s2 + $0x98] sm:$0xf0]  ;;  %v4768_v47 = vld [vmem:[%s10183_s2 + $0x448] sm:$0xf] }
  0x68   :  { %1406 = vmatpush.bf16.msrb.mxu2 %v4861_v13  ;;  %1452 = vmatpush.bf16.msrb.mxu0 %v4577_v25  ;;  %v4257_v13 = vor.u32 %v6293_v5, %v4256_v4  ;;  %v4241_v25 = vor.u32 %v6289_v18, %v4240_v17  ;;  %v6441_v33 = vld [vmem:[%s10183_s2 + $0x4f4] sm:$0xf0]  ;;  %v4960_v5 = vld [vmem:[%s10183_s2 + $0x5c8] sm:$0xf] }
  0x69   :  { %1426 = vmatpush.bf16.msrb.mxu1 %v4321_v22  ;;  %v4385_v22 = vor.u32 %v6325_v15, %v4384_v14  ;;  %v6349_v38 = vld [vmem:[%s10183_s2 + $0x214] sm:$0xf0]  ;;  %v6303_v14 = vld [vmem:[%s10183_s2 + $0xac] sm:$0xf]  ;;  %v4306_v15 = vld [vmem:[%s10183_s2 + $0xb8] sm:$0xf0] }
  0x6a   :  { %v6381_v41 = vld [vmem:[%s10183_s2 + $0x314] sm:$0xf0]  ;;  %v4481_v50 = vor.u32 %v6349_v38, %v4480_v37  ;;  %v4944_v18 = vld [vmem:[%s10183_s2 + $0x5a8] sm:$0xf]  ;;  %v4309_v24 = vor.u32 %v6303_v14, %v4306_v15  ;;  %v4418_v37 = vld [vmem:[%s10183_s2 + $0x198] sm:$0xf0]  ;;  %v4293_v38 = vor.u32 %v6299_v26, %v4290_v27 }
  0x6b   :  { %1438 = vmatpush.bf16.msra.mxu3 %v4465_v19  ;;  %1407 = vmatmul.bf16.vlgmr.msrb.gmra.mxu2 %v7344_v35  ;;  %v4641_v19 = vor.u32 %v6389_v12, %v4640_v11  ;;  %v6477_v43 = vld [vmem:[%s10183_s2 + $0x614] sm:$0xf0]  ;;  %v4450_v11 = vld [vmem:[%s10183_s2 + $0x1d8] sm:$0xf0]  ;;  %v4325_v12 = vor.u32 %v6307_v1, %v4322_v2 }
  0x6c   :  { %1464 = vmatpush.bf16.msra.mxu2 %v4721_v16  ;;  %1453 = vmatpush.bf16.msrb.mxu0 %v4561_v39  ;;  %v4513_v16 = vor.u32 %v6357_v9, %v4512_v8  ;;  %v4608_v39 = vld [vmem:[%s10183_s2 + $0x308] sm:$0xf]  ;;  %v6433_v9 = vld [vmem:[%s10183_s2 + $0x4b4] sm:$0xf0]  ;;  %v4386_v1 = vld [vmem:[%s10183_s2 + $0x158] sm:$0xf0] }
  0x6d   :  { %1427 = vmatpush.bf16.msrb.mxu1 %v4305_v36  ;;  %v4352_v36 = vld [vmem:[%s10183_s2 + $0x108] sm:$0xf]  ;;  %v4609_v56 = vor.u32 %v6381_v41, %v4608_v39  ;;  %v6429_v21 = vld [vmem:[%s10183_s2 + $0x494] sm:$0xf0]  ;;  %v4274_v41 = vld [vmem:[%s10183_s2 + $0x78] sm:$0xf0] }
  0x6e   :  { %v4816_v8 = vld [vmem:[%s10183_s2 + $0x4a8] sm:$0xf]  ;;  %v6421_v48 = vld [vmem:[%s10183_s2 + $0x454] sm:$0xf0]  ;;  %v4370_v14 = vld [vmem:[%s10183_s2 + $0x138] sm:$0xf0] }
  0x6f   :  { %1439 = vmatpush.bf16.msra.mxu3 %v4449_v32  ;;  %v4848_v32 = vld [vmem:[%s10183_s2 + $0x4e8] sm:$0xf]  ;;  %v4722_v26 = vld [vmem:[%s10183_s2 + $0x3f8] sm:$0xf0] }
  0x70   :  { %1465 = vmatpush.bf16.msra.mxu2 %v4705_v28  ;;  %1454 = vmatpush.bf16.msrb.mxu0 %v4545_v53  ;;  %v4224_v28 = vld [vmem:[%s10183_s2 + $0x8] sm:$0xf]  ;;  %v6473_v53 = vld [vmem:[%s10183_s2 + $0x5f4] sm:$0xf0] }
  0x71   :  { %1428 = vmatpush.bf16.msrb.mxu1 %v4289_v49  ;;  %v4225_v44 = vor.u32 %v6285_v31, %v4224_v28  ;;  %v4849_v49 = vor.u32 %v6441_v33, %v4848_v32  ;;  %v4801_v28 = vor.u32 %v6429_v21, %v4800_v20  ;;  %v4928_v31 = vld [vmem:[%s10183_s2 + $0x588] sm:$0xf]  ;;  %v6461_v32 = vld [vmem:[%s10183_s2 + $0x594] sm:$0xf0]  ;;  %v6283_v20 = vld [vmem:[%s10183_s2 + $0xc] sm:$0xf] }
  0x72   :  { %v4784_v33 = vld [vmem:[%s10183_s2 + $0x468] sm:$0xf]  ;;  %v4929_v39 = vor.u32 %v6461_v32, %v4928_v31  ;;  %v4226_v21 = vld [vmem:[%s10183_s2 + $0x18] sm:$0xf0]  ;;  %v6371_v31 = vld [vmem:[%s10183_s2 + $0x2cc] sm:$0xf] }
  0x73   :  { %1440 = vmatpush.bf16.msra.mxu3 %v4433_v46  ;;  %v6317_v46 = vld [vmem:[%s10183_s2 + $0x114] sm:$0xf0]  ;;  %v4229_v32 = vor.u32 %v6283_v20, %v4226_v21  ;;  %v4658_v21 = vld [vmem:[%s10183_s2 + $0x378] sm:$0xf0] }
  0x74   :  { %1466 = vmatpush.bf16.msra.mxu2 %v4689_v42  ;;  %1455 = vmatpush.bf16.msrb.mxu0 %v4529_v3  ;;  %v4992_v42 = vld [vmem:[%s10183_s2 + $0x608] sm:$0xf]  ;;  %v4353_v62 = vor.u32 %v6317_v46, %v4352_v36  ;;  %v6331_v36 = vld [vmem:[%s10183_s2 + $0x18c] sm:$0xf]  ;;  %v6457_v46 = vld [vmem:[%s10183_s2 + $0x574] sm:$0xf0] }
  0x75   :  { %1429 = vmatpush.bf16.msrb.mxu1 %v4273_v0  ;;  %v4993_v59 = vor.u32 %v6477_v43, %v4992_v42  ;;  %v4977_v0 = vor.u32 %v6473_v53, %v4976_v52  ;;  %v4421_v43 = vor.u32 %v6331_v36, %v4418_v37  ;;  %v4354_v36 = vld [vmem:[%s10183_s2 + $0x118] sm:$0xf0] }
  0x76   :  { %4999 = vmatmul.msk.bf16.vlgmr.msrb.gmra.mxu3 %vm1239_vm0, %v7242_v45 }
  0x77   :  { %1441 = vmatpush.bf16.msra.mxu3 %v4417_v61  ;;  %v4466_v61 = vld [vmem:[%s10183_s2 + $0x1f8] sm:$0xf0] }
  0x78   :  { %1467 = vmatpush.bf16.msra.mxu2 %v4673_v58  ;;  %1456 = vmatpush.bf16.msrb.mxu0 %v4513_v16  ;;  %v6437_v58 = vld [vmem:[%s10183_s2 + $0x4d4] sm:$0xf0]  ;;  %v4469_v4 = vor.u32 %v6343_v60, %v4466_v61  ;;  %v4817_v16 = vor.u32 %v6433_v9, %v4816_v8  ;;  %v4896_v60 = vld [vmem:[%s10183_s2 + $0x548] sm:$0xf] }
  0x79   :  { %1430 = vmatpush.bf16.msrb.mxu1 %v4257_v13  ;;  %v4833_v3 = vor.u32 %v6437_v58, %v4832_v54  ;;  %v6291_v54 = vld [vmem:[%s10183_s2 + $0x4c] sm:$0xf]  ;;  %v4769_v58 = vor.u32 %v6421_v48, %v4768_v47  ;;  %v6453_v61 = vld [vmem:[%s10183_s2 + $0x554] sm:$0xf0]  ;;  %v4880_v9 = vld [vmem:[%s10183_s2 + $0x528] sm:$0xf] }
  0x7a   :  { %v6435_v47 = vld [vmem:[%s10183_s2 + $0x4cc] sm:$0xf]  ;;  %v4834_v48 = vld [vmem:[%s10183_s2 + $0x4d8] sm:$0xf0] }
  0x7b   :  { %1442 = vmatpush.bf16.msra.mxu3 %v4401_v10  ;;  %v6339_v10 = vld [vmem:[%s10183_s2 + $0x1cc] sm:$0xf] }
  0x7c   :  { %1468 = vmatpush.bf16.msra.mxu2 %v4657_v6  ;;  %1457 = vmatpush.bf16.msrb.mxu0 %v4497_v29  ;;  %v6469_v6 = vld [vmem:[%s10183_s2 + $0x5d4] sm:$0xf0]  ;;  %v4453_v17 = vor.u32 %v6339_v10, %v4450_v11  ;;  %v4736_v11 = vld [vmem:[%s10183_s2 + $0x408] sm:$0xf] }
  0x7d   :  { %1431 = vmatpush.bf16.msrb.mxu1 %v4241_v25  ;;  %v4961_v13 = vor.u32 %v6469_v6, %v4960_v5  ;;  %v4242_v5 = vld [vmem:[%s10183_s2 + $0x38] sm:$0xf0]  ;;  %v6449_v10 = vld [vmem:[%s10183_s2 + $0x534] sm:$0xf0] }
  0x7f   :  { %1443 = vmatpush.bf16.msra.mxu3 %v4385_v22  ;;  %v6335_v22 = vld [vmem:[%s10183_s2 + $0x1ac] sm:$0xf] }
  0x80   :  { %1469 = vmatpush.bf16.msra.mxu2 %v4641_v19  ;;  %1458 = vmatpush.bf16.msrb.mxu0 %v4481_v50  ;;  %v6465_v19 = vld [vmem:[%s10183_s2 + $0x5b4] sm:$0xf0]  ;;  %v4437_v29 = vor.u32 %v6335_v22, %v4434_v23  ;;  %v4402_v50 = vld [vmem:[%s10183_s2 + $0x178] sm:$0xf0] }
  0x81   :  { %1432 = vmatpush.bf16.msrb.mxu1 %v4225_v44  ;;  %v4945_v25 = vor.u32 %v6465_v19, %v4944_v18  ;;  %v4912_v44 = vld [vmem:[%s10183_s2 + $0x568] sm:$0xf]  ;;  %v4881_v18 = vor.u32 %v6449_v10, %v4880_v9  ;;  %v6427_v10 = vld [vmem:[%s10183_s2 + $0x48c] sm:$0xf] }
  0x82   :  { %v4913_v53 = vor.u32 %v6457_v46, %v4912_v44  ;;  %v4864_v19 = vld [vmem:[%s10183_s2 + $0x508] sm:$0xf]  ;;  %v4706_v46 = vld [vmem:[%s10183_s2 + $0x3d8] sm:$0xf0] }
  0x83   :  { %1444 = vmatpush.bf16.msra.mxu3 %v4369_v40  ;;  %1459 = vmatmul.bf16.vlgmr.msrb.gmra.mxu0 %v7119_v51  ;;  %v6295_v40 = vld [vmem:[%s10183_s2 + $0x6c] sm:$0xf] }
  0x84   :  { %1470 = vmatpush.bf16.msra.mxu2 %v4625_v34  ;;  %1510 = vmatpush.bf16.msra.mxu0 %v4993_v59  ;;  %v6425_v34 = vld [vmem:[%s10183_s2 + $0x474] sm:$0xf0]  ;;  %v4277_v52 = vor.u32 %v6295_v40, %v4274_v41 }
  0x85   :  { %1477 = vmatpush.bf16.msra.mxu1 %v4849_v49  ;;  %v4785_v42 = vor.u32 %v6425_v34, %v4784_v33  ;;  %v6327_v49 = vld [vmem:[%s10183_s2 + $0x16c] sm:$0xf]  ;;  %v4578_v33 = vld [vmem:[%s10183_s2 + $0x2d8] sm:$0xf0] }
  0x86   :  { %1433 = vmatmul.bf16.vlgmr.msrb.gmra.mxu1 %v7130_v55  ;;  %v4405_v59 = vor.u32 %v6327_v49, %v4402_v50  ;;  %v6315_v34 = vld [vmem:[%s10183_s2 + $0x10c] sm:$0xf] }
  0x87   :  { %1445 = vmatpush.bf16.msra.mxu3 %v4353_v62  ;;  %v4752_v62 = vld [vmem:[%s10183_s2 + $0x428] sm:$0xf]  ;;  %v4357_v44 = vor.u32 %v6315_v34, %v4354_v36  ;;  %v6367_v50 = vld [vmem:[%s10183_s2 + $0x2ac] sm:$0xf] }
  0x88   :  { %1471 = vmatpush.bf16.msra.mxu2 %v4609_v56  ;;  %1529 = vmatpush.bf16.msrb.mxu0 %v4469_v4  ;;  %v4258_v56 = vld [vmem:[%s10183_s2 + $0x58] sm:$0xf0]  ;;  %v6287_v4 = vld [vmem:[%s10183_s2 + $0x2c] sm:$0xf] }
  0x89   :  { %1478 = vmatpush.bf16.msra.mxu1 %v4833_v3  ;;  %v4261_v2 = vor.u32 %v6291_v54, %v4258_v56  ;;  %v4897_v3 = vor.u32 %v6453_v61, %v4896_v60  ;;  %v4245_v15 = vor.u32 %v6287_v4, %v4242_v5  ;;  %v4962_v54 = vld [vmem:[%s10183_s2 + $0x5d8] sm:$0xf0]  ;;  %v6387_v34 = vld [vmem:[%s10183_s2 + $0x34c] sm:$0xf] }
  0x8a   :  { %1446 = vmatmul.bf16.vlgmr.msra.gmra.mxu3 %v7163_v7  ;;  %v4690_v61 = vld [vmem:[%s10183_s2 + $0x3b8] sm:$0xf0] }
  0x8b   :  { %1490 = vmatpush.bf16.msrb.mxu3 %v4977_v0  ;;  %1472 = vmatmul.bf16.vlgmr.msra.gmra.mxu2 %v7132_v57  ;;  %v6323_v0 = vld [vmem:[%s10183_s2 + $0x14c] sm:$0xf]  ;;  %v4946_v4 = vld [vmem:[%s10183_s2 + $0x5b8] sm:$0xf0] }
  0x8c   :  { %1516 = vmatpush.bf16.msrb.mxu2 %v4341_v63  ;;  %1530 = vmatpush.bf16.msrb.mxu0 %v4453_v17  ;;  %v6417_v63 = vld [vmem:[%s10183_s2 + $0x434] sm:$0xf0]  ;;  %v4389_v8 = vor.u32 %v6323_v0, %v4386_v1  ;;  %v4594_v17 = vld [vmem:[%s10183_s2 + $0x2f8] sm:$0xf0]  ;;  %v6363_v1 = vld [vmem:[%s10183_s2 + $0x28c] sm:$0xf] }
  0x8d   :  { %1479 = vmatpush.bf16.msra.mxu1 %v4817_v16  ;;  %v4753_v6 = vor.u32 %v6417_v63, %v4752_v62  ;;  %v6375_v16 = vld [vmem:[%s10183_s2 + $0x2ec] sm:$0xf]  ;;  %v4818_v63 = vld [vmem:[%s10183_s2 + $0x4b8] sm:$0xf0] }
  0x8e   :  { %v4597_v27 = vor.u32 %v6375_v16, %v4594_v17  ;;  %v6431_v62 = vld [vmem:[%s10183_s2 + $0x4ac] sm:$0xf] }
  0x8f   :  { %1491 = vmatpush.bf16.msrb.mxu3 %v4961_v13  ;;  %v6319_v13 = vld [vmem:[%s10183_s2 + $0x12c] sm:$0xf] }
  0x90   :  { %1517 = vmatpush.bf16.msrb.mxu2 %v4325_v12  ;;  %1531 = vmatpush.bf16.msrb.mxu0 %v4437_v29  ;;  %v6413_v12 = vld [vmem:[%s10183_s2 + $0x414] sm:$0xf0]  ;;  %v4373_v23 = vor.u32 %v6319_v13, %v4370_v14  ;;  %v4850_v29 = vld [vmem:[%s10183_s2 + $0x4f8] sm:$0xf0]  ;;  %v6359_v13 = vld [vmem:[%s10183_s2 + $0x26c] sm:$0xf] }
  0x91   :  { %1480 = vmatpush.bf16.msra.mxu1 %v4801_v28  ;;  %v4737_v22 = vor.u32 %v6413_v12, %v4736_v11  ;;  %v6439_v28 = vld [vmem:[%s10183_s2 + $0x4ec] sm:$0xf]  ;;  %v4802_v11 = vld [vmem:[%s10183_s2 + $0x498] sm:$0xf0] }
  0x92   :  { %v4853_v41 = vor.u32 %v6439_v28, %v4850_v29  ;;  %v4530_v14 = vld [vmem:[%s10183_s2 + $0x278] sm:$0xf0]  ;;  %v6459_v16 = vld [vmem:[%s10183_s2 + $0x58c] sm:$0xf] }
  0x93   :  { %1492 = vmatpush.bf16.msrb.mxu3 %v4945_v25  ;;  %5000 = vmatmul.msk.bf16.vlgmr.msra.gmra.mxu0 %vm1239_vm0, %v7242_v45  ;;  %v6407_v25 = vld [vmem:[%s10183_s2 + $0x3ec] sm:$0xf]  ;;  %v4533_v20 = vor.u32 %v6359_v13, %v4530_v14  ;;  %v4914_v29 = vld [vmem:[%s10183_s2 + $0x578] sm:$0xf0]  ;;  %v5060_v13 = vld [vmem:[%s10186_s4 + $0x70] sm:$0xf] }
  0x94   :  { %1518 = vmatpush.bf16.msrb.mxu2 %v4309_v24  ;;  %1532 = vmatpush.bf16.msrb.mxu0 %v4421_v43  ;;  %v6445_v24 = vld [vmem:[%s10183_s2 + $0x514] sm:$0xf0]  ;;  %v4725_v40 = vor.u32 %v6407_v25, %v4722_v26  ;;  %v4581_v43 = vor.u32 %v6371_v31, %v4578_v33  ;;  %v6355_v26 = vld [vmem:[%s10183_s2 + $0x24c] sm:$0xf] }
  0x95   :  { %1481 = vmatpush.bf16.msra.mxu1 %v4785_v42  ;;  %v4865_v37 = vor.u32 %v6445_v24, %v4864_v19  ;;  %v6403_v42 = vld [vmem:[%s10183_s2 + $0x3cc] sm:$0xf]  ;;  %v6493_v14 = vld [vmem:[%s10186_s4 + $0x74] sm:$0xf0] }
  0x96   :  { %v4709_v56 = vor.u32 %v6403_v42, %v4706_v46  ;;  %v6391_v19 = vld [vmem:[%s10183_s2 + $0x36c] sm:$0xf] }
  0x97   :  { %1493 = vmatpush.bf16.msrb.mxu3 %v4929_v39  ;;  %v4978_v39 = vld [vmem:[%s10183_s2 + $0x5f8] sm:$0xf0]  ;;  %v6455_v28 = vld [vmem:[%s10183_s2 + $0x56c] sm:$0xf] }
  0x98   :  { %1519 = vmatpush.bf16.msrb.mxu2 %v4293_v38  ;;  %1533 = vmatpush.bf16.msrb.mxu0 %v4405_v59  ;;  %v6471_v38 = vld [vmem:[%s10183_s2 + $0x5ec] sm:$0xf] }
  0x99   :  { %1482 = vmatpush.bf16.msra.mxu1 %v4769_v58  ;;  %v4981_v49 = vor.u32 %v6471_v38, %v4978_v39  ;;  %v4837_v58 = vor.u32 %v6435_v47, %v4834_v48  ;;  %v6399_v59 = vld [vmem:[%s10183_s2 + $0x3ac] sm:$0xf]  ;;  %v4642_v38 = vld [vmem:[%s10183_s2 + $0x358] sm:$0xf0] }
  0x9a   :  { %v4693_v5 = vor.u32 %v6399_v59, %v4690_v61  ;;  %v6419_v39 = vld [vmem:[%s10183_s2 + $0x44c] sm:$0xf]  ;;  %v4898_v47 = vld [vmem:[%s10183_s2 + $0x558] sm:$0xf0]  ;;  %v4645_v48 = vor.u32 %v6387_v34, %v4642_v38  ;;  %v5044_v38 = vld [vmem:[%s10186_s4 + $0x50] sm:$0xf] }
  0x9b   :  { %1494 = vmatpush.bf16.msrb.mxu3 %v4913_v53  ;;  %v6467_v53 = vld [vmem:[%s10183_s2 + $0x5cc] sm:$0xf] }
  0x9c   :  { %1520 = vmatpush.bf16.msrb.mxu2 %v4277_v52  ;;  %1534 = vmatpush.bf16.msrb.mxu0 %v4389_v8  ;;  %v4562_v52 = vld [vmem:[%s10183_s2 + $0x2b8] sm:$0xf0]  ;;  %v4965_v0 = vor.u32 %v6467_v53, %v4962_v54  ;;  %v6395_v8 = vld [vmem:[%s10183_s2 + $0x38c] sm:$0xf] }
  0x9d   :  { %1483 = vmatpush.bf16.msra.mxu1 %v4753_v6  ;;  %v4565_v60 = vor.u32 %v6367_v50, %v4562_v52  ;;  %v4821_v6 = vor.u32 %v6431_v62, %v4818_v63  ;;  %v6351_v42 = vld [vmem:[%s10183_s2 + $0x22c] sm:$0xf]  ;;  %v4626_v53 = vld [vmem:[%s10183_s2 + $0x338] sm:$0xf0] }
  0x9e   :  { %v6451_v46 = vld [vmem:[%s10183_s2 + $0x54c] sm:$0xf]  ;;  %v4882_v63 = vld [vmem:[%s10183_s2 + $0x538] sm:$0xf0] }
  0x9f   :  { %1495 = vmatpush.bf16.msrb.mxu3 %v4897_v3  ;;  %v6463_v3 = vld [vmem:[%s10183_s2 + $0x5ac] sm:$0xf] }
  0xa0   :  { %1521 = vmatpush.bf16.msrb.mxu2 %v4261_v2  ;;  %1535 = vmatpush.bf16.msrb.mxu0 %v4373_v23  ;;  %v4546_v2 = vld [vmem:[%s10183_s2 + $0x298] sm:$0xf0]  ;;  %v4949_v12 = vor.u32 %v6463_v3, %v4946_v4  ;;  %v6383_v50 = vld [vmem:[%s10183_s2 + $0x32c] sm:$0xf] }
  0xa1   :  { %1484 = vmatpush.bf16.msra.mxu1 %v4737_v22  ;;  %v4549_v9 = vor.u32 %v6363_v1, %v4546_v2  ;;  %v6423_v22 = vld [vmem:[%s10183_s2 + $0x46c] sm:$0xf]  ;;  %v4786_v23 = vld [vmem:[%s10183_s2 + $0x478] sm:$0xf0]  ;;  %v8034_v25 = vpop.f32.mrf.mxu1  ;;  %v8109_v2 = vld [vmem:[%s10185_s3] sm:$0xf]  ;;  %v4629_v4 = vor.u32 %v6383_v50, %v4626_v53 }
  0xa2   :  { %v4789_v33 = vor.u32 %v6423_v22, %v4786_v23  ;;  %v6415_v54 = vld [vmem:[%s10183_s2 + $0x42c] sm:$0xf]  ;;  %v4994_v1 = vld [vmem:[%s10183_s2 + $0x618] sm:$0xf0]  ;;  %v5061_v23 = vor.u32 %v6493_v14, %v5060_v13  ;;  %v5028_v50 = vld [vmem:[%s10186_s4 + $0x30] sm:$0xf] }
  0xa3   :  { %1496 = vmatpush.bf16.msrb.mxu3 %v4881_v18  ;;  %v4805_v18 = vor.u32 %v6427_v10, %v4802_v11  ;;  %v6347_v59 = vld [vmem:[%s10183_s2 + $0x20c] sm:$0xf]  ;;  %v4738_v10 = vld [vmem:[%s10183_s2 + $0x418] sm:$0xf0]  ;;  %v5004_v13 = vld [vmem:[%s10186_s4] sm:$0xf] }
  0xa4   :  { %1522 = vmatpush.bf16.msrb.mxu2 %v4245_v15  ;;  %1485 = vmatmul.bf16.vlgmr.msra.gmra.mxu1 %v7333_v30  ;;  %v8014_v15 = vpop.f32.mrf.mxu0  ;;  %v6447_v61 = vld [vmem:[%s10183_s2 + $0x52c] sm:$0xf]  ;;  %v6479_v14 = vld [vmem:[%s10186_s4 + $0x4] sm:$0xf0] }
  0xa5   :  { %1542 = vmatpush.bf16.msrb.mxu1 %v4597_v27  ;;  %1536 = vmatpush.bf16.msrb.mxu0 %v4357_v44  ;;  %v4514_v27 = vld [vmem:[%s10183_s2 + $0x258] sm:$0xf0] }
  0xa6   :  { %v4517_v36 = vor.u32 %v6355_v26, %v4514_v27  ;;  %v5052_v26 = vld [vmem:[%s10186_s4 + $0x60] sm:$0xf]  ;;  %v6491_v27 = vld [vmem:[%s10186_s4 + $0x64] sm:$0xf0] }
  0xa7   :  { %1497 = vmatpush.bf16.msrb.mxu3 %v4865_v37 }
  0xa8   :  { %1523 = vmatpush.bf16.msrb.mxu2 %v4229_v32  ;;  %1537 = vmatmul.bf16.vlgmr.msrb.gmra.mxu0 %v7163_v7  ;;  %v4930_v7 = vld [vmem:[%s10183_s2 + $0x598] sm:$0xf0]  ;;  %v4661_v32 = vor.u32 %v6391_v19, %v4658_v21  ;;  %v6509_v19 = vld [vmem:[%s10186_s4 + $0xf4] sm:$0xf0] }
  0xa9   :  { %1543 = vmatpush.bf16.msrb.mxu1 %v4581_v43  ;;  %1581 = vmatpush.bf16.msra.mxu0 %v4981_v49  ;;  %v4933_v24 = vor.u32 %v6459_v16, %v4930_v7  ;;  %v8048_v31 = vpop.f32.mrf.mxu2  ;;  %v8053_v37 = vpop.f32.mrf.mxu3  ;;  %v4498_v43 = vld [vmem:[%s10183_s2 + $0x238] sm:$0xf0]  ;;  %v6443_v16 = vld [vmem:[%s10183_s2 + $0x50c] sm:$0xf] }
  0xaa   :  { %1498 = vmatmul.bf16.vlgmr.msrb.gmra.mxu3 %v7344_v35  ;;  %v4501_v52 = vor.u32 %v6351_v42, %v4498_v43  ;;  %v1267_v62 = vpop.f32.mrf.mxu1  ;;  %v6487_v43 = vld [vmem:[%s10186_s4 + $0x44] sm:$0xf0] }
  0xab   :  { %1555 = vmatpush.bf16.msra.mxu3 %v4725_v40  ;;  %1524 = vmatmul.bf16.vlgmr.msrb.gmra.mxu2 %v7130_v55  ;;  %v4674_v55 = vld [vmem:[%s10183_s2 + $0x398] sm:$0xf0] }
  0xac   :  { %1568 = vmatpush.bf16.msra.mxu2 %v4853_v41  ;;  %v4677_v17 = vor.u32 %v6395_v8, %v4674_v55  ;;  %v4770_v40 = vld [vmem:[%s10183_s2 + $0x458] sm:$0xf0]  ;;  %v4917_v41 = vor.u32 %v6455_v28, %v4914_v29  ;;  %v1254_v44 = vpop.f32.mrf.mxu0  ;;  %v6411_v55 = vld [vmem:[%s10183_s2 + $0x40c] sm:$0xf]  ;;  %v5116_v29 = vld [vmem:[%s10186_s4 + $0xe0] sm:$0xf] }
  0xad   :  { %1544 = vmatpush.bf16.msrb.mxu1 %v4565_v60  ;;  %1582 = vmatpush.bf16.msra.mxu0 %v4965_v0  ;;  %v4773_v49 = vor.u32 %v6419_v39, %v4770_v40  ;;  %v4482_v60 = vld [vmem:[%s10183_s2 + $0x218] sm:$0xf0]  ;;  %v6475_v0 = vld [vmem:[%s10183_s2 + $0x60c] sm:$0xf]  ;;  %v4741_v22 = vor.u32 %v6411_v55, %v4738_v10  ;;  %v6489_v39 = vld [vmem:[%s10186_s4 + $0x54] sm:$0xf0] }
  0xae   :  { %v4485_v8 = vor.u32 %v6347_v59, %v4482_v60  ;;  %v4997_v7 = vor.u32 %v6475_v0, %v4994_v1  ;;  %v5045_v42 = vor.u32 %v6489_v39, %v5044_v38  ;;  %v5020_v60 = vld [vmem:[%s10186_s4 + $0x20] sm:$0xf]  ;;  %v6499_v1 = vld [vmem:[%s10186_s4 + $0xa4] sm:$0xf0]  ;;  %v6497_v10 = vld [vmem:[%s10186_s4 + $0x94] sm:$0xf0] }
  0xaf   :  { %1556 = vmatpush.bf16.msra.mxu3 %v4709_v56  ;;  %v4754_v56 = vld [vmem:[%s10183_s2 + $0x438] sm:$0xf0] }
  0xb0   :  { %1569 = vmatpush.bf16.msra.mxu2 %v4837_v58  ;;  %v4901_v58 = vor.u32 %v6451_v46, %v4898_v47 }
  0xb1   :  { %1545 = vmatpush.bf16.msrb.mxu1 %v4549_v9  ;;  %1583 = vmatpush.bf16.msra.mxu0 %v4949_v12  ;;  %v1280_v3 = vpop.f32.mrf.mxu2  ;;  %v4610_v9 = vld [vmem:[%s10183_s2 + $0x318] sm:$0xf0]  ;;  %v1293_v11 = vpop.f32.mrf.mxu3  ;;  %v4885_v12 = vor.u32 %v6447_v61, %v4882_v63  ;;  %v6483_v61 = vld [vmem:[%s10186_s4 + $0x24] sm:$0xf0] }
  0xb3   :  { %1557 = vmatpush.bf16.msra.mxu3 %v4693_v5  ;;  %v4757_v5 = vor.u32 %v6415_v54, %v4754_v56  ;;  %v5092_v54 = vld [vmem:[%s10186_s4 + $0xb0] sm:$0xf] }
  0xb4   :  { %1570 = vmatpush.bf16.msra.mxu2 %v4821_v6  ;;  %v6379_v6 = vld [vmem:[%s10183_s2 + $0x30c] sm:$0xf] }
  0xb5   :  { %1546 = vmatpush.bf16.msrb.mxu1 %v4533_v20  ;;  %1584 = vmatpush.bf16.msra.mxu0 %v4933_v24  ;;  %v251_v20 = vperm.slane %v8109_v2, 0  ;;  %v4613_v21 = vor.u32 %v6379_v6, %v4610_v9  ;;  %v6481_v9 = vld [vmem:[%s10186_s4 + $0x14] sm:$0xf0] }
  0xb7   :  { %1558 = vmatpush.bf16.msra.mxu3 %v4677_v17  ;;  %v4866_v17 = vld [vmem:[%s10183_s2 + $0x518] sm:$0xf0] }
  0xb8   :  { %1571 = vmatpush.bf16.msra.mxu2 %v4805_v18  ;;  %v5124_v18 = vld [vmem:[%s10186_s4 + $0xf0] sm:$0xf]  ;;  %v4869_v24 = vor.u32 %v6443_v16, %v4866_v17  ;;  %v6492_v16 = vld [vmem:[%s10186_s4 + $0x74] sm:$0xf] }
  0xb9   :  { %1547 = vmatpush.bf16.msrb.mxu1 %v4517_v36  ;;  %1585 = vmatpush.bf16.msra.mxu0 %v4917_v41  ;;  %v5125_v28 = vor.u32 %v6509_v19, %v5124_v18  ;;  %v1330_v34 = vpop.f32.mrf.mxu2  ;;  %v5053_v36 = vor.u32 %v6491_v27, %v5052_v26  ;;  %v5062_v18 = vld [vmem:[%s10186_s4 + $0x78] sm:$0xf0]  ;;  %v5068_v19 = vld [vmem:[%s10186_s4 + $0x80] sm:$0xf] }
  0xba   :  { %v5065_v27 = vor.u32 %v6492_v16, %v5062_v18  ;;  %v5014_v16 = vld [vmem:[%s10186_s4 + $0x18] sm:$0xf0]  ;;  %v6496_v18 = vld [vmem:[%s10186_s4 + $0x94] sm:$0xf] }
  0xbb   :  { %1559 = vmatpush.bf16.msra.mxu3 %v4661_v32  ;;  %v6507_v32 = vld [vmem:[%s10186_s4 + $0xe4] sm:$0xf0] }
  0xbc   :  { %1572 = vmatpush.bf16.msra.mxu2 %v4789_v33  ;;  %v1253_v33 = vadd.f32 %v8014_v15, %v251_v20  ;;  %v5117_v40 = vor.u32 %v6507_v32, %v5116_v29  ;;  %v6505_v15 = vld [vmem:[%s10186_s4 + $0xd4] sm:$0xf0]  ;;  %v6495_v20 = vld [vmem:[%s10186_s4 + $0x84] sm:$0xf0]  ;;  %v6490_v29 = vld [vmem:[%s10186_s4 + $0x64] sm:$0xf] }
  0xbd   :  { %1548 = vmatpush.bf16.msrb.mxu1 %v4501_v52  ;;  %1586 = vmatpush.bf16.msra.mxu0 %v4901_v58  ;;  %v6485_v52 = vld [vmem:[%s10186_s4 + $0x34] sm:$0xf0]  ;;  %v5054_v32 = vld [vmem:[%s10186_s4 + $0x68] sm:$0xf0] }
  0xbe   :  { %v1266_v41 = vadd.f32 %v8034_v25, %v1253_v33  ;;  %v5100_v25 = vld [vmem:[%s10186_s4 + $0xc0] sm:$0xf]  ;;  %v5029_v58 = vor.u32 %v6485_v52, %v5028_v50  ;;  %v5057_v39 = vor.u32 %v6490_v29, %v5054_v32  ;;  %v6523_v52 = vld [vmem:[%s10186_s4 + $0x164] sm:$0xf0]  ;;  %v5156_v29 = vld [vmem:[%s10186_s4 + $0x130] sm:$0xf] }
  0xbf   :  { %1560 = vmatpush.bf16.msra.mxu3 %v4645_v48  ;;  %v5180_v50 = vld [vmem:[%s10186_s4 + $0x160] sm:$0xf]  ;;  %v6517_v32 = vld [vmem:[%s10186_s4 + $0x134] sm:$0xf0] }
  0xc0   :  { %1573 = vmatpush.bf16.msra.mxu2 %v4773_v49  ;;  %v1304_v46 = vpop.f32.mrf.mxu0 }
  0xc1   :  { %1549 = vmatpush.bf16.msrb.mxu1 %v4485_v8  ;;  %1587 = vmatpush.bf16.msra.mxu0 %v4885_v12  ;;  %v1332_v48 = vpop.f32.mrf.mxu2  ;;  %v5012_v8 = vld [vmem:[%s10186_s4 + $0x10] sm:$0xf] }
  0xc2   :  { %v5013_v11 = vor.u32 %v6481_v9, %v5012_v8  ;;  %v5172_v9 = vld [vmem:[%s10186_s4 + $0x150] sm:$0xf] }
  0xc3   :  { %1561 = vmatpush.bf16.msra.mxu3 %v4629_v4  ;;  %v1317_v47 = vpop.f32.mrf.mxu1  ;;  %v5021_v4 = vor.u32 %v6483_v61, %v5020_v60  ;;  %v5181_v60 = vor.u32 %v6523_v52, %v5180_v50  ;;  %v6500_v61 = vld [vmem:[%s10186_s4 + $0xb4] sm:$0xf]  ;;  %v6511_v50 = vld [vmem:[%s10186_s4 + $0x104] sm:$0xf0] }
  0xc4   :  { %1574 = vmatpush.bf16.msra.mxu2 %v4757_v5  ;;  %1550 = vmatmul.bf16.vlgmr.msrb.gmra.mxu1 %v7119_v51  ;;  %v5108_v51 = vld [vmem:[%s10186_s4 + $0xd0] sm:$0xf] }
  0xc5   :  { %1601 = vmatpush.bf16.msra.mxu1 %v4997_v7  ;;  %1588 = vmatpush.bf16.msra.mxu0 %v4869_v24  ;;  %v5109_v44 = vor.u32 %v6505_v15, %v5108_v51  ;;  %v5046_v51 = vld [vmem:[%s10186_s4 + $0x58] sm:$0xf0] }
  0xc7   :  { %1562 = vmatpush.bf16.msra.mxu3 %v4613_v21  ;;  %v6508_v21 = vld [vmem:[%s10186_s4 + $0xf4] sm:$0xf] }
  0xc8   :  { %1575 = vmatpush.bf16.msra.mxu2 %v4741_v22  ;;  %1589 = vmatmul.bf16.vlgmr.msra.gmra.mxu0 %v7344_v35  ;;  %v1279_v35 = vadd.f32 %v8048_v31, %v1266_v41  ;;  %v6501_v31 = vld [vmem:[%s10186_s4 + $0xb4] sm:$0xf0]  ;;  %v1306_v0 = vpop.f32.mrf.mxu0  ;;  %v5126_v22 = vld [vmem:[%s10186_s4 + $0xf8] sm:$0xf0]  ;;  %v6504_v41 = vld [vmem:[%s10186_s4 + $0xd4] sm:$0xf] }
  0xc9   :  { %2018 = vmatpush.bf16.msrb.mxu1 %v5125_v28  ;;  %v5093_v62 = vor.u32 %v6501_v31, %v5092_v54  ;;  %v8204_v63 = vpop.f32.mrf.mxu3  ;;  %v5069_v28 = vor.u32 %v6495_v20, %v5068_v19  ;;  %v5129_v33 = vor.u32 %v6508_v21, %v5126_v22  ;;  %v252_v54 = vperm.slane %v8109_v2, 1  ;;  %v5164_v19 = vld [vmem:[%s10186_s4 + $0x140] sm:$0xf]  ;;  %v6519_v20 = vld [vmem:[%s10186_s4 + $0x144] sm:$0xf0] }
  0xca   :  { %1563 = vmatmul.bf16.vlgmr.msra.gmra.mxu3 %v7132_v57  ;;  %v5036_v57 = vld [vmem:[%s10186_s4 + $0x40] sm:$0xf]  ;;  %v1292_v56 = vadd.f32 %v8053_v37, %v1279_v35  ;;  %v5188_v35 = vld [vmem:[%s10186_s4 + $0x170] sm:$0xf]  ;;  %v5165_v22 = vor.u32 %v6519_v20, %v5164_v19 }
  0xcb   :  { %2005 = vmatpush.bf16.msrb.mxu3 %v5061_v23  ;;  %1576 = vmatmul.bf16.vlgmr.msra.gmra.mxu2 %v7333_v30  ;;  %v6503_v30 = vld [vmem:[%s10186_s4 + $0xc4] sm:$0xf0]  ;;  %v5037_v49 = vor.u32 %v6487_v43, %v5036_v57  ;;  %v5084_v37 = vld [vmem:[%s10186_s4 + $0xa0] sm:$0xf]  ;;  %v1319_v3 = vpop.f32.mrf.mxu1  ;;  %v5005_v23 = vor.u32 %v6479_v14, %v5004_v13  ;;  %v6486_v43 = vld [vmem:[%s10186_s4 + $0x44] sm:$0xf] }
  0xcc   :  { %v5101_v53 = vor.u32 %v6503_v30, %v5100_v25  ;;  %v1305_v59 = vadd.f32 %v1304_v46, %v1292_v56  ;;  %v5085_v55 = vor.u32 %v6499_v1, %v5084_v37  ;;  %v6502_v25 = vld [vmem:[%s10186_s4 + $0xc4] sm:$0xf]  ;;  %v5102_v30 = vld [vmem:[%s10186_s4 + $0xc8] sm:$0xf0]  ;;  %v6484_v56 = vld [vmem:[%s10186_s4 + $0x34] sm:$0xf]  ;;  %v1344_v37 = vadd.f32 %v8204_v63, %v252_v54 }
  0xcd   :  { %2019 = vmatpush.bf16.msrb.mxu1 %v5117_v40  ;;  %v6488_v40 = vld [vmem:[%s10186_s4 + $0x54] sm:$0xf]  ;;  %v6482_v1 = vld [vmem:[%s10186_s4 + $0x24] sm:$0xf]  ;;  %v5022_v3 = vld [vmem:[%s10186_s4 + $0x28] sm:$0xf0] }
  0xce   :  { %v8214_v5 = vpop.f32.mrf.mxu2  ;;  %v1318_v6 = vadd.f32 %v1317_v47, %v1305_v59  ;;  %v5049_v57 = vor.u32 %v6488_v40, %v5046_v51  ;;  %v6525_v47 = vld [vmem:[%s10186_s4 + $0x174] sm:$0xf0]  ;;  %v5105_v59 = vor.u32 %v6502_v25, %v5102_v30  ;;  %v5086_v63 = vld [vmem:[%s10186_s4 + $0xa8] sm:$0xf0]  ;;  %v6480_v14 = vld [vmem:[%s10186_s4 + $0x14] sm:$0xf] }
  0xcf   :  { %2006 = vmatpush.bf16.msrb.mxu3 %v5053_v36  ;;  %v5118_v36 = vld [vmem:[%s10186_s4 + $0xe8] sm:$0xf0]  ;;  %v1357_v13 = vadd.f32 %v8214_v5, %v1344_v37  ;;  %v5078_v5 = vld [vmem:[%s10186_s4 + $0x98] sm:$0xf0]  ;;  %v6515_v40 = vld [vmem:[%s10186_s4 + $0x124] sm:$0xf0] }
  0xd0   :  { %v1331_v12 = vadd.f32 %v1330_v34, %v1318_v6  ;;  %v6506_v34 = vld [vmem:[%s10186_s4 + $0xe4] sm:$0xf]  ;;  %v6524_v54 = vld [vmem:[%s10186_s4 + $0x174] sm:$0xf]  ;;  %v5228_v20 = vld [vmem:[%s10186_s4 + $0x1c0] sm:$0xf] }
  0xd1   :  { %2020 = vmatpush.bf16.msrb.mxu1 %v5109_v44  ;;  %v1345_v17 = vpop.f32.mrf.mxu3  ;;  %v5121_v15 = vor.u32 %v6506_v34, %v5118_v36  ;;  %v5038_v44 = vld [vmem:[%s10186_s4 + $0x48] sm:$0xf0]  ;;  %v6498_v6 = vld [vmem:[%s10186_s4 + $0xa4] sm:$0xf]  ;;  %v5157_v36 = vor.u32 %v6517_v32, %v5156_v29 }
  0xd2   :  { %v1607_v26 = vmax.f32 %v1331_v12, 0.0  ;;  %v5025_v12 = vor.u32 %v6482_v1, %v5022_v3  ;;  %v5089_v17 = vor.u32 %v6498_v6, %v5086_v63  ;;  %v5070_v34 = vld [vmem:[%s10186_s4 + $0x88] sm:$0xf0]  ;;  %v6520_v3 = vld [vmem:[%s10186_s4 + $0x154] sm:$0xf] }
  0xd3   :  { %2007 = vmatpush.bf16.msrb.mxu3 %v5045_v42  ;;  %v5110_v42 = vld [vmem:[%s10186_s4 + $0xd8] sm:$0xf0]  ;;  %v6539_v63 = vld [vmem:[%s10186_s4 + $0x1e4] sm:$0xf0] }
  0xd4   :  { %5001 = vmatmul.msk.bf16.vlgmr.msra.gmra.mxu1 %vm1239_vm0, %v7242_v45  ;;  %v5076_v45 = vld [vmem:[%s10186_s4 + $0x90] sm:$0xf]  ;;  %v8264_v38 = vpack.c.bf16 %v1607_v26, %v1607_v26  ;;  %v5113_v46 = vor.u32 %v6504_v41, %v5110_v42  ;;  %v5006_v26 = vld [vmem:[%s10186_s4 + $0x8] sm:$0xf0] }
  0xd5   :  { %2021 = vmatpush.bf16.msrb.mxu1 %v5101_v53  ;;  %v5077_v7 = vor.u32 %v6497_v10, %v5076_v45  ;;  %v5041_v53 = vor.u32 %v6486_v43, %v5038_v44  ;;  %v5140_v44 = vld [vmem:[%s10186_s4 + $0x110] sm:$0xf] }
  0xd6   :  { %v1358_v24 = vpop.f32.mrf.mxu2 }
  0xd7   :  { %2008 = vmatpush.bf16.msrb.mxu3 %v5037_v49  ;;  %v5189_v49 = vor.u32 %v6525_v47, %v5188_v35  ;;  %v6478_v24 = vld [vmem:[%s10186_s4 + $0x4] sm:$0xf] }
  0xd9   :  { %2022 = vmatpush.bf16.msrb.mxu1 %v5093_v62  ;;  %2031 = vmatpush.bf16.msrb.mxu2 %v5189_v49  ;;  %v5094_v62 = vld [vmem:[%s10186_s4 + $0xb8] sm:$0xf0]  ;;  %v5132_v49 = vld [vmem:[%s10186_s4 + $0x100] sm:$0xf] }
  0xdb   :  { %2009 = vmatpush.bf16.msrb.mxu3 %v5029_v58  ;;  %v5030_v58 = vld [vmem:[%s10186_s4 + $0x38] sm:$0xf0] }
  0xdc   :  { %v5033_v0 = vor.u32 %v6484_v56, %v5030_v58  ;;  %v5182_v58 = vld [vmem:[%s10186_s4 + $0x168] sm:$0xf0] }
  0xdd   :  { %2023 = vmatpush.bf16.msrb.mxu1 %v5085_v55  ;;  %2032 = vmatpush.bf16.msrb.mxu2 %v5181_v60  ;;  %v6521_v55 = vld [vmem:[%s10186_s4 + $0x154] sm:$0xf0] }
  0xde   :  { %v5173_v10 = vor.u32 %v6521_v55, %v5172_v9  ;;  %v6541_v60 = vld [vmem:[%s10186_s4 + $0x1f4] sm:$0xf0] }
  0xdf   :  { %2010 = vmatpush.bf16.msrb.mxu3 %v5021_v4  ;;  %v5097_v4 = vor.u32 %v6500_v61, %v5094_v62 }
  0xe0   :  { %v1369_v48 = vpop.f32.mrf.mxu0 }
  0xe1   :  { %2024 = vmatpush.bf16.msrb.mxu1 %v5077_v7  ;;  %2033 = vmatpush.bf16.msrb.mxu2 %v5173_v10  ;;  %v1370_v21 = vadd.f32 %v1369_v48, %v1357_v13  ;;  %v6518_v10 = vld [vmem:[%s10186_s4 + $0x144] sm:$0xf] }
  0xe3   :  { %2011 = vmatpush.bf16.msrb.mxu3 %v5013_v11  ;;  %v1382_v31 = vpop.f32.mrf.mxu1 }
  0xe4   :  { %v1383_v51 = vadd.f32 %v1382_v31, %v1370_v21  ;;  %v6522_v31 = vld [vmem:[%s10186_s4 + $0x164] sm:$0xf]  ;;  %v6535_v21 = vld [vmem:[%s10186_s4 + $0x1c4] sm:$0xf0] }
  0xe5   :  { %2025 = vmatpush.bf16.msrb.mxu1 %v5069_v28  ;;  %v6494_v28 = vld [vmem:[%s10186_s4 + $0x84] sm:$0xf]  ;;  %2034 = vmatpush.bf16.msrb.mxu2 %v5165_v22  ;;  %v5185_v37 = vor.u32 %v6522_v31, %v5182_v58  ;;  %v5254_v31 = vld [vmem:[%s10186_s4 + $0x1f8] sm:$0xf0] }
  0xe6   :  { %v6514_v22 = vld [vmem:[%s10186_s4 + $0x124] sm:$0xf] }
  0xe7   :  { %2012 = vmatpush.bf16.msrb.mxu3 %v5005_v23  ;;  %v5017_v23 = vor.u32 %v6480_v14, %v5014_v16  ;;  %v5236_v16 = vld [vmem:[%s10186_s4 + $0x1d0] sm:$0xf] }
  0xe8   :  { %v1371_v45 = vpop.f32.mrf.mxu0 }
  0xe9   :  { %2070 = vmatpush.bf16.msra.mxu1 %v5129_v33  ;;  %v1395_v8 = vpop.f32.mrf.mxu3  ;;  %2035 = vmatpush.bf16.msrb.mxu2 %v5157_v36  ;;  %v5142_v36 = vld [vmem:[%s10186_s4 + $0x118] sm:$0xf0] }
  0xea   :  { %2013 = vmatmul.bf16.vlgmr.msrb.gmra.mxu3 %v8264_v38  ;;  %v1396_v42 = vadd.f32 %v1395_v8, %v1383_v51  ;;  %v5244_v8 = vld [vmem:[%s10186_s4 + $0x1e0] sm:$0xf] }
  0xeb   :  { %2057 = vmatpush.bf16.msra.mxu3 %v5065_v27  ;;  %v1384_v7 = vpop.f32.mrf.mxu1  ;;  %v5081_v27 = vor.u32 %v6496_v18, %v5078_v5  ;;  %v5245_v9 = vor.u32 %v6539_v63, %v5244_v8  ;;  %v6516_v18 = vld [vmem:[%s10186_s4 + $0x134] sm:$0xf]  ;;  %v5158_v5 = vld [vmem:[%s10186_s4 + $0x138] sm:$0xf0]  ;;  %v5212_v51 = vld [vmem:[%s10186_s4 + $0x1a0] sm:$0xf] }
  0xec   :  { %v6537_v7 = vld [vmem:[%s10186_s4 + $0x1d4] sm:$0xf0]  ;;  %v5161_v19 = vor.u32 %v6516_v18, %v5158_v5  ;;  %v5238_v8 = vld [vmem:[%s10186_s4 + $0x1d8] sm:$0xf0]  ;;  %v6530_v5 = vld [vmem:[%s10186_s4 + $0x1a4] sm:$0xf] }
  0xed   :  { %2071 = vmatpush.bf16.msra.mxu1 %v5121_v15  ;;  %v5009_v15 = vor.u32 %v6478_v24, %v5006_v26  ;;  %v5150_v24 = vld [vmem:[%s10186_s4 + $0x128] sm:$0xf0]  ;;  %v5220_v26 = vld [vmem:[%s10186_s4 + $0x1b0] sm:$0xf] }
  0xee   :  { %v1408_v11 = vpop.f32.mrf.mxu2  ;;  %v5153_v32 = vor.u32 %v6514_v22, %v5150_v24  ;;  %v5206_v22 = vld [vmem:[%s10186_s4 + $0x198] sm:$0xf0] }
  0xef   :  { %2058 = vmatpush.bf16.msra.mxu3 %v5057_v39  ;;  %v5148_v39 = vld [vmem:[%s10186_s4 + $0x120] sm:$0xf]  ;;  %v1409_v25 = vadd.f32 %v1408_v11, %v1396_v42  ;;  %v5166_v11 = vld [vmem:[%s10186_s4 + $0x148] sm:$0xf0] }
  0xf0   :  { %v5149_v43 = vor.u32 %v6515_v40, %v5148_v39  ;;  %v5169_v14 = vor.u32 %v6518_v10, %v5166_v11  ;;  %v253_v39 = vperm.slane %v8109_v2, 2  ;;  %v6534_v10 = vld [vmem:[%s10186_s4 + $0x1c4] sm:$0xf]  ;;  %v5230_v11 = vld [vmem:[%s10186_s4 + $0x1c8] sm:$0xf0] }
  0xf1   :  { %2072 = vmatpush.bf16.msra.mxu1 %v5113_v46  ;;  %v1397_v33 = vpop.f32.mrf.mxu3  ;;  %v6513_v46 = vld [vmem:[%s10186_s4 + $0x114] sm:$0xf0] }
  0xf2   :  { %2036 = vmatpush.bf16.msrb.mxu2 %v5149_v43  ;;  %v5141_v30 = vor.u32 %v6513_v46, %v5140_v44  ;;  %v6510_v44 = vld [vmem:[%s10186_s4 + $0x104] sm:$0xf]  ;;  %v5134_v46 = vld [vmem:[%s10186_s4 + $0x108] sm:$0xf0] }
  0xf3   :  { %2059 = vmatpush.bf16.msra.mxu3 %v5049_v57  ;;  %v5073_v57 = vor.u32 %v6494_v28, %v5070_v34  ;;  %v6512_v34 = vld [vmem:[%s10186_s4 + $0x114] sm:$0xf] }
  0xf5   :  { %2073 = vmatpush.bf16.msra.mxu1 %v5105_v59  ;;  %v5252_v59 = vld [vmem:[%s10186_s4 + $0x1f0] sm:$0xf] }
  0xf6   :  { %v1410_v41 = vpop.f32.mrf.mxu2  ;;  %2037 = vmatpush.bf16.msrb.mxu2 %v5141_v30  ;;  %v5253_v61 = vor.u32 %v6541_v60, %v5252_v59  ;;  %v5137_v30 = vor.u32 %v6510_v44, %v5134_v46  ;;  %v6538_v60 = vld [vmem:[%s10186_s4 + $0x1e4] sm:$0xf] }
  0xf7   :  { %2060 = vmatpush.bf16.msra.mxu3 %v5041_v53  ;;  %v5133_v53 = vor.u32 %v6511_v50, %v5132_v49  ;;  %v5145_v41 = vor.u32 %v6512_v34, %v5142_v36 }
  0xf8   :  { %2044 = vmatpush.bf16.msrb.mxu0 %v5253_v61  ;;  %v5246_v61 = vld [vmem:[%s10186_s4 + $0x1e8] sm:$0xf0] }
  0xf9   :  { %2074 = vmatpush.bf16.msra.mxu1 %v5097_v4  ;;  %v1421_v35 = vpop.f32.mrf.mxu3  ;;  %v5174_v4 = vld [vmem:[%s10186_s4 + $0x158] sm:$0xf0] }
  0xfa   :  { %v1422_v47 = vadd.f32 %v1421_v35, %v1409_v25  ;;  %2038 = vmatpush.bf16.msrb.mxu2 %v5133_v53  ;;  %v5177_v6 = vor.u32 %v6520_v3, %v5174_v4  ;;  %v5204_v35 = vld [vmem:[%s10186_s4 + $0x190] sm:$0xf]  ;;  %v6527_v53 = vld [vmem:[%s10186_s4 + $0x184] sm:$0xf0] }
  0xfb   :  { %2061 = vmatpush.bf16.msra.mxu3 %v5033_v0 }
  0xfc   :  { %v1608_v48 = vmax.f32 %v1422_v47, 0.0  ;;  %2045 = vmatpush.bf16.msrb.mxu0 %v5245_v9  ;;  %v6529_v47 = vld [vmem:[%s10186_s4 + $0x194] sm:$0xf0] }
  0xfd   :  { %2075 = vmatpush.bf16.msra.mxu1 %v5089_v17  ;;  %v5237_v17 = vor.u32 %v6537_v7, %v5236_v16  ;;  %v6532_v7 = vld [vmem:[%s10186_s4 + $0x1b4] sm:$0xf] }
  0xfe   :  { %v1612_v52 = vpack.c.bf16 %v1608_v48, %v1608_v48  ;;  %v5205_v48 = vor.u32 %v6529_v47, %v5204_v35 }
  0xff   :  { %2062 = vmatpush.bf16.msra.mxu3 %v5025_v12 }
 0x100   :  { %2026 = vmatmul.bf16.vlgmr.msrb.gmra.mxu1 %v1612_v52  ;;  %v8409_v0 = vpop.f32.mrf.mxu0  ;;  %2046 = vmatpush.bf16.msrb.mxu0 %v5237_v17  ;;  %v5222_v17 = vld [vmem:[%s10186_s4 + $0x1b8] sm:$0xf0] }
 0x101   :  { %2076 = vmatpush.bf16.msra.mxu1 %v5081_v27  ;;  %v1423_v62 = vpop.f32.mrf.mxu3  ;;  %v6533_v27 = vld [vmem:[%s10186_s4 + $0x1b4] sm:$0xf0]  ;;  %v5225_v18 = vor.u32 %v6532_v7, %v5222_v17 }
 0x102   :  { %v5221_v33 = vor.u32 %v6533_v27, %v5220_v26  ;;  %v6526_v26 = vld [vmem:[%s10186_s4 + $0x184] sm:$0xf]  ;;  %v5198_v27 = vld [vmem:[%s10186_s4 + $0x188] sm:$0xf0] }
 0x103   :  { %2063 = vmatpush.bf16.msra.mxu3 %v5017_v23  ;;  %v1434_v1 = vpop.f32.mrf.mxu1  ;;  %v5229_v23 = vor.u32 %v6535_v21, %v5228_v20  ;;  %v6528_v21 = vld [vmem:[%s10186_s4 + $0x194] sm:$0xf] }
 0x104   :  { %v5209_v24 = vor.u32 %v6528_v21, %v5206_v22  ;;  %v5366_v21 = vld [vmem:[%s10188_s6 + $0xd8] sm:$0xf0] }
 0x105   :  { %2077 = vmatpush.bf16.msra.mxu1 %v5073_v57  ;;  %2047 = vmatpush.bf16.msrb.mxu0 %v5229_v23  ;;  %v1435_v57 = vadd.f32 %v1434_v1, %v253_v39  ;;  %v254_v23 = vperm.slane %v8109_v2, 3 }
 0x107   :  { %2064 = vmatpush.bf16.msra.mxu3 %v5009_v15  ;;  %v6531_v15 = vld [vmem:[%s10186_s4 + $0x1a4] sm:$0xf0] }
 0x108   :  { %v1462_v45 = vpop.f32.mrf.mxu0  ;;  %v5213_v42 = vor.u32 %v6531_v15, %v5212_v51 }
 0x109   :  { %2048 = vmatpush.bf16.msrb.mxu0 %v5221_v33 }
 0x10a   :  { %2065 = vmatmul.bf16.vlgmr.msra.gmra.mxu3 %v8264_v38  ;;  %v5190_v38 = vld [vmem:[%s10186_s4 + $0x178] sm:$0xf0] }
 0x10b   :  { %v5193_v56 = vor.u32 %v6524_v54, %v5190_v38  ;;  %v1436_v13 = vpop.f32.mrf.mxu1  ;;  %v6540_v38 = vld [vmem:[%s10186_s4 + $0x1f4] sm:$0xf] }
 0x10c   :  { %v5233_v13 = vor.u32 %v6534_v10, %v5230_v11  ;;  %v5356_v10 = vld [vmem:[%s10188_s6 + $0xc0] sm:$0xf] }
 0x10d   :  { %2083 = vmatpush.bf16.msra.mxu2 %v5193_v56  ;;  %v1447_v55 = vpop.f32.mrf.mxu3  ;;  %2049 = vmatpush.bf16.msrb.mxu0 %v5213_v42  ;;  %v5257_v56 = vor.u32 %v6540_v38, %v5254_v31 }
 0x10e   :  { %v1473_v12 = vpop.f32.mrf.mxu2  ;;  %v1448_v25 = vadd.f32 %v1447_v55, %v1435_v57 }
 0x110   :  { %2078 = vmatmul.bf16.vlgmr.msra.gmra.mxu1 %v1612_v52  ;;  %v1512_v29 = vpop.f32.mrf.mxu0  ;;  %v1461_v50 = vadd.f32 %v8409_v0, %v1448_v25  ;;  %v5196_v52 = vld [vmem:[%s10186_s4 + $0x180] sm:$0xf] }
 0x111   :  { %2084 = vmatpush.bf16.msra.mxu2 %v5185_v37  ;;  %2050 = vmatpush.bf16.msrb.mxu0 %v5205_v48  ;;  %v5197_v54 = vor.u32 %v6527_v53, %v5196_v52  ;;  %v5249_v37 = vor.u32 %v6538_v60, %v5246_v61 }
 0x112   :  { %v1474_v58 = vadd.f32 %v1473_v12, %v1461_v50 }
 0x115   :  { %2085 = vmatpush.bf16.msra.mxu2 %v5177_v6  ;;  %v1449_v28 = vpop.f32.mrf.mxu3  ;;  %2051 = vmatpush.bf16.msrb.mxu0 %v5197_v54  ;;  %v6536_v6 = vld [vmem:[%s10186_s4 + $0x1d4] sm:$0xf] }
 0x116   :  { %v1475_v40 = vpop.f32.mrf.mxu2  ;;  %v5241_v9 = vor.u32 %v6536_v6, %v5238_v8  ;;  %v5380_v6 = vld [vmem:[%s10188_s6 + $0xe8] sm:$0xf]  ;;  %v6573_v8 = vld [vmem:[%s10188_s6 + $0xf4] sm:$0xf0] }
 0x118   :  { %v1514_v43 = vpop.f32.mrf.mxu0 }
 0x119   :  { %2086 = vmatpush.bf16.msra.mxu2 %v5169_v14  ;;  %2096 = vmatpush.bf16.msra.mxu0 %v5257_v56 }
 0x11d   :  { %2087 = vmatpush.bf16.msra.mxu2 %v5161_v19  ;;  %2097 = vmatpush.bf16.msra.mxu0 %v5249_v37  ;;  %v5214_v19 = vld [vmem:[%s10186_s4 + $0x1a8] sm:$0xf0]  ;;  %v6572_v37 = vld [vmem:[%s10188_s6 + $0xec] sm:$0xf0] }
 0x11e   :  { %v5217_v20 = vor.u32 %v6530_v5, %v5214_v19  ;;  %v6569_v5 = vld [vmem:[%s10188_s6 + $0xd4] sm:$0xf0]  ;;  %v6567_v19 = vld [vmem:[%s10188_s6 + $0xcc] sm:$0xf] }
 0x11f   :  { %v5369_v22 = vor.u32 %v6567_v19, %v5366_v21  ;;  %v6547_v21 = vld [vmem:[%s10188_s6 + $0x2c] sm:$0xf] }
 0x121   :  { %2088 = vmatpush.bf16.msra.mxu2 %v5153_v32  ;;  %v1486_v49 = vpop.f32.mrf.mxu1  ;;  %2098 = vmatpush.bf16.msra.mxu0 %v5241_v9  ;;  %v5201_v32 = vor.u32 %v6526_v26, %v5198_v27  ;;  %v5381_v9 = vor.u32 %v6573_v8, %v5380_v6  ;;  %v6562_v26 = vld [vmem:[%s10188_s6 + $0xa4] sm:$0xf]  ;;  %v5294_v6 = vld [vmem:[%s10188_s6 + $0x50] sm:$0xf0]  ;;  %v5300_v8 = vld [vmem:[%s10188_s6 + $0x48] sm:$0xf] }
 0x122   :  { %v1487_v62 = vadd.f32 %v1486_v49, %v1474_v58  ;;  %v1679_v49 = vld [vmem:[%s10187_s5] sm:$0x3] }
 0x123   :  { %v1681_v50 = vperm.slane %v1679_v49, 0  ;;  %v1682_v58 = vperm.slane %v1679_v49, 1  ;;  %v6556_v49 = vld [vmem:[%s10188_s6 + $0x6c] sm:$0xf0] }
 0x125   :  { %2089 = vmatpush.bf16.msra.mxu2 %v5145_v41  ;;  %v1538_v59 = vpop.f32.mrf.mxu0  ;;  %2099 = vmatpush.bf16.msra.mxu0 %v5233_v13  ;;  %v6568_v13 = vld [vmem:[%s10188_s6 + $0xcc] sm:$0xf0] }
 0x126   :  { %v5357_v7 = vor.u32 %v6568_v13, %v5356_v10  ;;  %v5276_v13 = vld [vmem:[%s10188_s6 + $0x20] sm:$0xf] }
 0x129   :  { %2090 = vmatpush.bf16.msra.mxu2 %v5137_v30  ;;  %v1488_v0 = vpop.f32.mrf.mxu1  ;;  %2100 = vmatpush.bf16.msra.mxu0 %v5225_v18  ;;  %v5364_v18 = vld [vmem:[%s10188_s6 + $0xc8] sm:$0xf] }
 0x12a   :  { %v5372_v0 = vld [vmem:[%s10188_s6 + $0xe0] sm:$0xf] }
 0x12d   :  { %v1499_v1 = vpop.f32.mrf.mxu3  ;;  %v1540_v45 = vpop.f32.mrf.mxu0  ;;  %2101 = vmatpush.bf16.msra.mxu0 %v5217_v20  ;;  %v5365_v20 = vor.u32 %v6569_v5, %v5364_v18  ;;  %v5284_v18 = vld [vmem:[%s10188_s6 + $0x28] sm:$0xf]  ;;  %v6549_v5 = vld [vmem:[%s10188_s6 + $0x34] sm:$0xf0] }
 0x12e   :  { %v1500_v3 = vadd.f32 %v1499_v1, %v1487_v62  ;;  %v1525_v4 = vpop.f32.mrf.mxu2  ;;  %v6570_v1 = vld [vmem:[%s10188_s6 + $0xe4] sm:$0xf]  ;;  %v5382_v45 = vld [vmem:[%s10188_s6 + $0xf8] sm:$0xf0] }
 0x12f   :  { %v1526_v28 = vadd.f32 %v1525_v4, %v254_v23  ;;  %v5374_v4 = vld [vmem:[%s10188_s6 + $0xf0] sm:$0xf0]  ;;  %v5340_v23 = vld [vmem:[%s10188_s6 + $0xa0] sm:$0xf] }
 0x130   :  { %v1513_v63 = vadd.f32 %v1512_v29, %v1500_v3  ;;  %v5373_v3 = vor.u32 %v6572_v37, %v5372_v0  ;;  %v5292_v37 = vld [vmem:[%s10188_s6 + $0x40] sm:$0xf] }
 0x131   :  { %2102 = vmatpush.bf16.msra.mxu0 %v5209_v24  ;;  %v1539_v33 = vadd.f32 %v1538_v59, %v1526_v28  ;;  %v6564_v24 = vld [vmem:[%s10188_s6 + $0xac] sm:$0xf0]  ;;  %v5342_v28 = vld [vmem:[%s10188_s6 + $0xb0] sm:$0xf0] }
 0x132   :  { %v1609_v55 = vmax.f32 %v1513_v63, 0.0  ;;  %v5377_v63 = vor.u32 %v6570_v1, %v5374_v4  ;;  %2317 = vmatpush.bf16.msrb.mxu3 %v5373_v3  ;;  %v5341_v27 = vor.u32 %v6564_v24, %v5340_v23  ;;  %v6552_v1 = vld [vmem:[%s10188_s6 + $0x4c] sm:$0xf0]  ;;  %v6550_v4 = vld [vmem:[%s10188_s6 + $0x44] sm:$0xf] }
 0x133   :  { %v5293_v3 = vor.u32 %v6552_v1, %v5292_v37  ;;  %v6780_v37 = vld [vmem:[%s10190_s8 + $0x670] sm:$0xf0]  ;;  %v5556_v1 = vld [vmem:[%s10190_s8 + $0x150] sm:$0xf] }
 0x134   :  { %v1613_v12 = vpack.c.bf16 %v1609_v55, %v1609_v55  ;;  %v6571_v55 = vld [vmem:[%s10188_s6 + $0xec] sm:$0xf]  ;;  %2330 = vmatpush.bf16.msrb.mxu1 %v5377_v63  ;;  %v5297_v63 = vor.u32 %v6550_v4, %v5294_v6  ;;  %v6004_v6 = vld [vmem:[%s10190_s8 + $0x4d0] sm:$0xf] }
 0x135   :  { %v1501_v14 = vpop.f32.mrf.mxu3  ;;  %2103 = vmatpush.bf16.msra.mxu0 %v5201_v32  ;;  %v6565_v32 = vld [vmem:[%s10188_s6 + $0xb4] sm:$0xf0] }
 0x136   :  { %2039 = vmatmul.bf16.vlgmr.msrb.gmra.mxu2 %v1613_v12  ;;  %v1527_v16 = vpop.f32.mrf.mxu2  ;;  %v6566_v14 = vld [vmem:[%s10188_s6 + $0xc4] sm:$0xf]  ;;  %2318 = vmatpush.bf16.msrb.mxu3 %v5357_v7 }
 0x137   :  { %v5358_v16 = vld [vmem:[%s10188_s6 + $0xd0] sm:$0xf0]  ;;  %2343 = vmatpush.bf16.msrb.mxu2 %v5381_v9  ;;  %v6553_v9 = vld [vmem:[%s10188_s6 + $0x54] sm:$0xf0] }
 0x138   :  { %v5361_v17 = vor.u32 %v6566_v14, %v5358_v16  ;;  %v5301_v10 = vor.u32 %v6553_v9, %v5300_v8  ;;  %v6548_v14 = vld [vmem:[%s10188_s6 + $0x2c] sm:$0xf0]  ;;  %v6546_v16 = vld [vmem:[%s10188_s6 + $0x24] sm:$0xf]  ;;  %v6731_v8 = vld [vmem:[%s10190_s8 + $0x4e8] sm:$0xf0] }
 0x139   :  { %v5277_v7 = vor.u32 %v6548_v14, %v5276_v13  ;;  %v6005_v9 = vor.u32 %v6731_v8, %v6004_v6  ;;  %v6612_v13 = vld [vmem:[%s10190_s8 + $0x130] sm:$0xf0]  ;;  %v5976_v14 = vld [vmem:[%s10190_s8 + $0x498] sm:$0xf]  ;;  %v5612_v8 = vld [vmem:[%s10190_s8 + $0x1c0] sm:$0xf] }
 0x13a   :  { %2331 = vmatpush.bf16.msrb.mxu1 %v5361_v17  ;;  %2319 = vmatpush.bf16.msrb.mxu3 %v5341_v27  ;;  %v5278_v17 = vld [vmem:[%s10188_s6 + $0x30] sm:$0xf0]  ;;  %v6544_v27 = vld [vmem:[%s10188_s6 + $0xc] sm:$0xf0] }
 0x13b   :  { %2344 = vmatpush.bf16.msrb.mxu2 %v5365_v20  ;;  %v5281_v19 = vor.u32 %v6546_v16, %v5278_v17  ;;  %v5285_v20 = vor.u32 %v6549_v5, %v5284_v18  ;;  %v6172_v16 = vld [vmem:[%s10190_s8 + $0x620] sm:$0xf]  ;;  %v6724_v17 = vld [vmem:[%s10190_s8 + $0x4b0] sm:$0xf0] }
 0x13c   :  { %v5977_v5 = vor.u32 %v6724_v17, %v5976_v14  ;;  %v6258_v17 = vld [vmem:[%s10190_s8 + $0x6e4] sm:$0xf0] }
 0x141   :  { %v1551_v29 = vpop.f32.mrf.mxu1 }
 0x142   :  { %v1552_v36 = vadd.f32 %v1551_v29, %v1539_v33  ;;  %v5348_v29 = vld [vmem:[%s10188_s6 + $0xa8] sm:$0xf]  ;;  %v5345_v33 = vor.u32 %v6562_v26, %v5342_v28  ;;  %v5260_v26 = vld [vmem:[%s10188_s6] sm:$0xf]  ;;  %v6542_v28 = vld [vmem:[%s10188_s6 + $0x4] sm:$0xf] }
 0x144   :  { %2332 = vmatpush.bf16.msrb.mxu1 %v5345_v33  ;;  %v5268_v33 = vld [vmem:[%s10188_s6 + $0x8] sm:$0xf] }
 0x145   :  { %v1590_v34 = vpop.f32.mrf.mxu0 }
 0x146   :  { %2091 = vmatmul.bf16.vlgmr.msra.gmra.mxu2 %v1613_v12  ;;  %v5385_v12 = vor.u32 %v6571_v55, %v5382_v45  ;;  %v6551_v55 = vld [vmem:[%s10188_s6 + $0x4c] sm:$0xf]  ;;  %v5302_v45 = vld [vmem:[%s10188_s6 + $0x58] sm:$0xf0] }
 0x149   :  { %v1553_v2 = vpop.f32.mrf.mxu1 }
 0x14a   :  { %v5350_v2 = vld [vmem:[%s10188_s6 + $0xb8] sm:$0xf0] }
 0x14d   :  { %v1564_v39 = vpop.f32.mrf.mxu3  ;;  %v1592_v41 = vpop.f32.mrf.mxu0 }
 0x14e   :  { %v1565_v40 = vadd.f32 %v1564_v39, %v1552_v36  ;;  %v1577_v51 = vpop.f32.mrf.mxu2  ;;  %v6563_v36 = vld [vmem:[%s10188_s6 + $0xac] sm:$0xf]  ;;  %v5324_v39 = vld [vmem:[%s10188_s6 + $0x80] sm:$0xf]  ;;  %v5326_v41 = vld [vmem:[%s10188_s6 + $0x90] sm:$0xf0] }
 0x150   :  { %v1578_v15 = vadd.f32 %v1577_v51, %v1565_v40  ;;  %v5353_v40 = vor.u32 %v6563_v36, %v5350_v2  ;;  %v6560_v51 = vld [vmem:[%s10188_s6 + $0x8c] sm:$0xf0] }
 0x151   :  { %v1603_v57 = vpop.f32.mrf.mxu1 }
 0x152   :  { %v1591_v42 = vadd.f32 %v1590_v34, %v1578_v15  ;;  %v5349_v34 = vor.u32 %v6565_v32, %v5348_v29  ;;  %v6558_v15 = vld [vmem:[%s10188_s6 + $0x84] sm:$0xf]  ;;  %v5261_v29 = vor.u32 %v6544_v27, %v5260_v26  ;;  %v5262_v32 = vld [vmem:[%s10188_s6 + $0x10] sm:$0xf0]  ;;  %v5696_v27 = vld [vmem:[%s10190_s8 + $0x268] sm:$0xf] }
 0x153   :  { %v5265_v36 = vor.u32 %v6542_v28, %v5262_v32  ;;  %v6654_v28 = vld [vmem:[%s10190_s8 + $0x280] sm:$0xf0]  ;;  %v6144_v32 = vld [vmem:[%s10190_s8 + $0x5e8] sm:$0xf] }
 0x154   :  { %v1604_v43 = vadd.f32 %v1603_v57, %v1591_v42  ;;  %v5325_v57 = vor.u32 %v6560_v51, %v5324_v39  ;;  %2345 = vmatpush.bf16.msrb.mxu2 %v5349_v34  ;;  %v6545_v34 = vld [vmem:[%s10188_s6 + $0x14] sm:$0xf0]  ;;  %v6543_v39 = vld [vmem:[%s10188_s6 + $0xc] sm:$0xf] }
 0x155   :  { %v1566_v44 = vpop.f32.mrf.mxu3  ;;  %v5269_v2 = vor.u32 %v6545_v34, %v5268_v33  ;;  %v6766_v33 = vld [vmem:[%s10190_s8 + $0x600] sm:$0xf0] }
 0x156   :  { %v1579_v46 = vpop.f32.mrf.mxu2  ;;  %v1610_v25 = vmax.f32 %v1604_v43, 0.0  ;;  %v5332_v43 = vld [vmem:[%s10188_s6 + $0x88] sm:$0xf]  ;;  %v6561_v44 = vld [vmem:[%s10188_s6 + $0x94] sm:$0xf0]  ;;  %2320 = vmatpush.bf16.msrb.mxu3 %v5325_v57 }
 0x157   :  { %v6559_v46 = vld [vmem:[%s10188_s6 + $0x8c] sm:$0xf]  ;;  %v5808_v57 = vld [vmem:[%s10190_s8 + $0x348] sm:$0xf] }
 0x158   :  { %v1614_v30 = vpack.c.bf16 %v1610_v25, %v1610_v25  ;;  %v5329_v25 = vor.u32 %v6558_v15, %v5326_v41 }
 0x159   :  { %v1605_v35 = vpop.f32.mrf.mxu1 }
 0x15a   :  { %2052 = vmatmul.bf16.vlgmr.msrb.gmra.mxu0 %v1614_v30  ;;  %v5334_v35 = vld [vmem:[%s10188_s6 + $0x98] sm:$0xf0]  ;;  %2333 = vmatpush.bf16.msrb.mxu1 %v5329_v25  ;;  %v6675_v25 = vld [vmem:[%s10190_s8 + $0x328] sm:$0xf0] }
 0x15b   :  { %2356 = vmatpush.bf16.msrb.mxu0 %v5385_v12  ;;  %v5305_v12 = vor.u32 %v6551_v55, %v5302_v45  ;;  %v5724_v55 = vld [vmem:[%s10190_s8 + $0x2a0] sm:$0xf]  ;;  %v6661_v45 = vld [vmem:[%s10190_s8 + $0x2b8] sm:$0xf0] }
 0x15f   :  { %2357 = vmatpush.bf16.msrb.mxu0 %v5369_v22  ;;  %v5286_v22 = vld [vmem:[%s10188_s6 + $0x38] sm:$0xf0] }
 0x160   :  { %v5289_v24 = vor.u32 %v6547_v21, %v5286_v22  ;;  %v6605_v21 = vld [vmem:[%s10190_s8 + $0xf8] sm:$0xf0]  ;;  %v5948_v22 = vld [vmem:[%s10190_s8 + $0x460] sm:$0xf] }
 0x163   :  { %2358 = vmatpush.bf16.msrb.mxu0 %v5353_v40  ;;  %v5270_v40 = vld [vmem:[%s10188_s6 + $0x18] sm:$0xf0] }
 0x164   :  { %v5273_v15 = vor.u32 %v6543_v39, %v5270_v40  ;;  %v6598_v39 = vld [vmem:[%s10190_s8 + $0xc0] sm:$0xf0]  ;;  %v5920_v40 = vld [vmem:[%s10190_s8 + $0x428] sm:$0xf] }
 0x16a   :  { %2104 = vmatmul.bf16.vlgmr.msra.gmra.mxu0 %v1614_v30  ;;  %v5333_v30 = vor.u32 %v6561_v44, %v5332_v43  ;;  %v6794_v44 = vld [vmem:[%s10190_s8 + $0x6e0] sm:$0xf0] }
 0x16c   :  { %2346 = vmatpush.bf16.msrb.mxu2 %v5333_v30 }
 0x16d   :  { %v2014_v47 = vpop.f32.mrf.mxu3 }
 0x16e   :  { %v2015_v52 = vadd.f32 %v2014_v47, %v1681_v50  ;;  %v5337_v47 = vor.u32 %v6559_v46, %v5334_v35  ;;  %v6554_v50 = vld [vmem:[%s10188_s6 + $0x64] sm:$0xf]  ;;  %v5780_v46 = vld [vmem:[%s10190_s8 + $0x310] sm:$0xf] }
 0x16f   :  { %v6228_v35 = vld [vmem:[%s10190_s8 + $0x690] sm:$0xf] }
 0x170   :  { %2359 = vmatpush.bf16.msrb.mxu0 %v5337_v47  ;;  %v6787_v47 = vld [vmem:[%s10190_s8 + $0x6a8] sm:$0xf0] }
 0x175   :  { %v2016_v48 = vpop.f32.mrf.mxu3 }
 0x176   :  { %v5308_v48 = vld [vmem:[%s10188_s6 + $0x60] sm:$0xf] }
 0x17d   :  { %v2027_v53 = vpop.f32.mrf.mxu1 }
 0x17e   :  { %v8543_v38 = vadd.f32 %v2027_v53, %v2015_v52  ;;  %v5309_v52 = vor.u32 %v6556_v49, %v5308_v48  ;;  %v5310_v53 = vld [vmem:[%s10188_s6 + $0x70] sm:$0xf0]  ;;  %v5584_v48 = vld [vmem:[%s10190_s8 + $0x188] sm:$0xf]  ;;  %v5781_v49 = vor.u32 %v6675_v25, %v5780_v46  ;;  %v5444_v25 = vld [vmem:[%s10190_s8 + $0x70] sm:$0xf] }
 0x180   :  { %2321 = vmatpush.bf16.msrb.mxu3 %v5309_v52  ;;  %v6032_v52 = vld [vmem:[%s10190_s8 + $0x508] sm:$0xf] }
 0x184   :  { %2322 = vmatpush.bf16.msrb.mxu3 %v5293_v3  ;;  %v6619_v3 = vld [vmem:[%s10190_s8 + $0x168] sm:$0xf0] }
 0x185   :  { %v2029_v31 = vpop.f32.mrf.mxu1  ;;  %v5557_v4 = vor.u32 %v6619_v3, %v5556_v1  ;;  %v5864_v1 = vld [vmem:[%s10190_s8 + $0x3b8] sm:$0xf]  ;;  %v6696_v3 = vld [vmem:[%s10190_s8 + $0x3d0] sm:$0xf0] }
 0x186   :  { %v6557_v31 = vld [vmem:[%s10188_s6 + $0x74] sm:$0xf0] }
 0x188   :  { %2323 = vmatpush.bf16.msrb.mxu3 %v5277_v7  ;;  %v6773_v7 = vld [vmem:[%s10190_s8 + $0x638] sm:$0xf0] }
 0x189   :  { %v6173_v26 = vor.u32 %v6773_v7, %v6172_v16  ;;  %v5865_v16 = vor.u32 %v6696_v3, %v5864_v1  ;;  %v5950_v1 = vld [vmem:[%s10190_s8 + $0x47c] sm:$0xf0] }
 0x18c   :  { %2324 = vmatpush.bf16.msrb.mxu3 %v5261_v29 }
 0x18d   :  { %v2066_v54 = vpop.f32.mrf.mxu3  ;;  %v2079_v60 = vpop.f32.mrf.mxu1 }
 0x18e   :  { %v2067_v59 = vadd.f32 %v2066_v54, %v1682_v58  ;;  %v5316_v54 = vld [vmem:[%s10188_s6 + $0x68] sm:$0xf] }
 0x18f   :  { %v5317_v58 = vor.u32 %v6557_v31, %v5316_v54  ;;  %v6229_v54 = vor.u32 %v6787_v47, %v6228_v35  ;;  %v6591_v35 = vld [vmem:[%s10190_s8 + $0x88] sm:$0xf0]  ;;  %v5892_v47 = vld [vmem:[%s10190_s8 + $0x3f0] sm:$0xf] }
 0x190   :  { %v8545_v61 = vadd.f32 %v2079_v60, %v2067_v59  ;;  %v6555_v59 = vld [vmem:[%s10188_s6 + $0x6c] sm:$0xf]  ;;  %v5318_v60 = vld [vmem:[%s10188_s6 + $0x78] sm:$0xf0] }
 0x191   :  { %v5321_v0 = vor.u32 %v6555_v59, %v5318_v60  ;;  %2347 = vmatpush.bf16.msrb.mxu2 %v5317_v58  ;;  %v5752_v58 = vld [vmem:[%s10190_s8 + $0x2d8] sm:$0xf]  ;;  %v6668_v59 = vld [vmem:[%s10190_s8 + $0x2f0] sm:$0xf0] }
 0x192   :  { %v6200_v60 = vld [vmem:[%s10190_s8 + $0x658] sm:$0xf] }
 0x193   :  { %2360 = vmatpush.bf16.msrb.mxu0 %v5321_v0 }
 0x195   :  { %v2068_v56 = vpop.f32.mrf.mxu3  ;;  %v2081_v62 = vpop.f32.mrf.mxu1  ;;  %2348 = vmatpush.bf16.msrb.mxu2 %v5301_v10  ;;  %v6201_v10 = vor.u32 %v6780_v37, %v6200_v60  ;;  %v5416_v60 = vld [vmem:[%s10190_s8 + $0x38] sm:$0xf]  ;;  %v6584_v37 = vld [vmem:[%s10190_s8 + $0x50] sm:$0xf0] }
 0x196   :  { %v5313_v56 = vor.u32 %v6554_v50, %v5310_v53  ;;  %v6626_v50 = vld [vmem:[%s10190_s8 + $0x1a0] sm:$0xf0]  ;;  %v5417_v14 = vor.u32 %v6584_v37, %v5416_v60 }
 0x197   :  { %2361 = vmatpush.bf16.msrb.mxu0 %v5305_v12  ;;  %v6738_v53 = vld [vmem:[%s10190_s8 + $0x520] sm:$0xf0]  ;;  %v5585_v31 = vor.u32 %v6626_v50, %v5584_v48  ;;  %v5528_v12 = vld [vmem:[%s10190_s8 + $0x118] sm:$0xf]  ;;  %v6703_v48 = vld [vmem:[%s10190_s8 + $0x408] sm:$0xf0] }
 0x198   :  { %2334 = vmatpush.bf16.msrb.mxu1 %v5313_v56  ;;  %v6033_v56 = vor.u32 %v6738_v53, %v6032_v52  ;;  %v5529_v18 = vor.u32 %v6612_v13, %v5528_v12  ;;  %v5640_v50 = vld [vmem:[%s10190_s8 + $0x1f8] sm:$0xf]  ;;  %v6640_v52 = vld [vmem:[%s10190_s8 + $0x210] sm:$0xf0]  ;;  %v5810_v12 = vld [vmem:[%s10190_s8 + $0x364] sm:$0xf0] }
 0x199   :  { %2349 = vmatpush.bf16.msrb.mxu2 %v5285_v20  ;;  %3801 = vmatpush.bf16.msra.mxu3 %v5585_v31  ;;  %v5725_v20 = vor.u32 %v6661_v45, %v5724_v55  ;;  %v6752_v31 = vld [vmem:[%s10190_s8 + $0x590] sm:$0xf0]  ;;  %v6060_v55 = vld [vmem:[%s10190_s8 + $0x540] sm:$0xf]  ;;  %v6745_v45 = vld [vmem:[%s10190_s8 + $0x558] sm:$0xf0] }
 0x19a   :  { %v6791_v13 = vld [vmem:[%s10190_s8 + $0x6cc] sm:$0xf]  ;;  %v6602_v60 = vld [vmem:[%s10190_s8 + $0xe4] sm:$0xf] }
 0x19b   :  { %2362 = vmatpush.bf16.msrb.mxu0 %v5289_v24  ;;  %v6714_v37 = vld [vmem:[%s10190_s8 + $0x464] sm:$0xf] }
 0x19c   :  { %2335 = vmatpush.bf16.msrb.mxu1 %v5297_v63  ;;  %v5753_v63 = vor.u32 %v6668_v59, %v5752_v58  ;;  %v5445_v58 = vor.u32 %v6591_v35, %v5444_v25  ;;  %v5893_v59 = vor.u32 %v6703_v48, %v5892_v47  ;;  %v6609_v35 = vld [vmem:[%s10190_s8 + $0x11c] sm:$0xf]  ;;  %v5530_v47 = vld [vmem:[%s10190_s8 + $0x134] sm:$0xf0] }
 0x19d   :  { %2350 = vmatpush.bf16.msrb.mxu2 %v5269_v2  ;;  %3802 = vmatpush.bf16.msra.mxu3 %v5557_v4  ;;  %v5697_v2 = vor.u32 %v6654_v28, %v5696_v27  ;;  %v6034_v27 = vld [vmem:[%s10190_s8 + $0x524] sm:$0xf0]  ;;  %v6721_v48 = vld [vmem:[%s10190_s8 + $0x49c] sm:$0xf] }
 0x19f   :  { %2363 = vmatpush.bf16.msrb.mxu0 %v5273_v15 }
 0x1a0   :  { %2336 = vmatpush.bf16.msrb.mxu1 %v5281_v19  ;;  %v5500_v19 = vld [vmem:[%s10190_s8 + $0xe0] sm:$0xf] }
 0x1a1   :  { %3827 = vmatpush.bf16.msra.mxu2 %v6033_v56  ;;  %3803 = vmatpush.bf16.msra.mxu3 %v5529_v18  ;;  %v2111_v56 = vld [vmem:[%s10191_s1] sm:$0xff] }
 0x1a2   :  { %v5388_v18 = vld [vmem:[%s10190_s8] sm:$0xf] }
 0x1a4   :  { %2337 = vmatpush.bf16.msrb.mxu1 %v5265_v36  ;;  %v5472_v36 = vld [vmem:[%s10190_s8 + $0xa8] sm:$0xf] }
 0x1a5   :  { %3828 = vmatpush.bf16.msra.mxu2 %v6005_v9  ;;  %v6633_v9 = vld [vmem:[%s10190_s8 + $0x1d8] sm:$0xf0] }
 0x1a9   :  { %3829 = vmatpush.bf16.msra.mxu2 %v5977_v5  ;;  %v6577_v5 = vld [vmem:[%s10190_s8 + $0x18] sm:$0xf0] }
 0x1b9   :  { %v8574_v11 = vpop.f32.mrf.mxu2 }
 0x1ba   :  { %v2041_v51 = vadd.f32 %v8574_v11, %v8543_v38  ;;  %v6682_v38 = vld [vmem:[%s10190_s8 + $0x360] sm:$0xf0]  ;;  %v6256_v11 = vld [vmem:[%s10190_s8 + $0x6c8] sm:$0xf] }
 0x1bb   :  { %v5809_v43 = vor.u32 %v6682_v38, %v5808_v57  ;;  %v6257_v30 = vor.u32 %v6794_v44, %v6256_v11  ;;  %v5668_v57 = vld [vmem:[%s10190_s8 + $0x230] sm:$0xf]  ;;  %v6647_v38 = vld [vmem:[%s10190_s8 + $0x248] sm:$0xf0]  ;;  %v5473_v44 = vor.u32 %v6598_v39, %v5472_v36 }
 0x1bc   :  { %v6116_v11 = vld [vmem:[%s10190_s8 + $0x5b0] sm:$0xf] }
 0x1bd   :  { %3814 = vmatpush.bf16.msra.mxu1 %v5809_v43  ;;  %3840 = vmatpush.bf16.msra.mxu0 %v6257_v30  ;;  %v6759_v43 = vld [vmem:[%s10190_s8 + $0x5c8] sm:$0xf0]  ;;  %v5669_v30 = vor.u32 %v6647_v38, %v5668_v57 }
 0x1c1   :  { %v2042_v42 = vpop.f32.mrf.mxu2  ;;  %3815 = vmatpush.bf16.msra.mxu1 %v5781_v49  ;;  %3841 = vmatpush.bf16.msra.mxu0 %v6229_v54  ;;  %v6117_v49 = vor.u32 %v6759_v43, %v6116_v11  ;;  %v6088_v54 = vld [vmem:[%s10190_s8 + $0x578] sm:$0xf]  ;;  %v6665_v11 = vld [vmem:[%s10190_s8 + $0x2dc] sm:$0xf] }
 0x1c2   :  { %v6089_v6 = vor.u32 %v6752_v31, %v6088_v54  ;;  %v5754_v43 = vld [vmem:[%s10190_s8 + $0x2f4] sm:$0xf0]  ;;  %v5726_v54 = vld [vmem:[%s10190_s8 + $0x2bc] sm:$0xf0]  ;;  %v6770_v31 = vld [vmem:[%s10190_s8 + $0x624] sm:$0xf] }
 0x1c5   :  { %3816 = vmatpush.bf16.msra.mxu1 %v5753_v63  ;;  %3842 = vmatpush.bf16.msra.mxu0 %v6201_v10  ;;  %v6679_v10 = vld [vmem:[%s10190_s8 + $0x34c] sm:$0xf] }
 0x1c6   :  { %v5813_v28 = vor.u32 %v6679_v10, %v5810_v12 }
 0x1c9   :  { %v8669_v62 = vpop.f32.mrf.mxu2  ;;  %3817 = vmatpush.bf16.msra.mxu1 %v5725_v20  ;;  %3843 = vmatpush.bf16.msra.mxu0 %v6173_v26  ;;  %v6623_v20 = vld [vmem:[%s10190_s8 + $0x18c] sm:$0xf] }
 0x1ca   :  { %v2093_v24 = vadd.f32 %v8669_v62, %v8545_v61  ;;  %v5501_v62 = vor.u32 %v6605_v21, %v5500_v19  ;;  %v5836_v19 = vld [vmem:[%s10190_s8 + $0x380] sm:$0xf]  ;;  %v6735_v26 = vld [vmem:[%s10190_s8 + $0x50c] sm:$0xf] }
 0x1cb   :  { %v6037_v39 = vor.u32 %v6735_v26, %v6034_v27  ;;  %v6749_v27 = vld [vmem:[%s10190_s8 + $0x57c] sm:$0xf] }
 0x1cc   :  { %3804 = vmatpush.bf16.msra.mxu3 %v5501_v62  ;;  %v6230_v62 = vld [vmem:[%s10190_s8 + $0x6ac] sm:$0xf0] }
 0x1cd   :  { %3818 = vmatpush.bf16.msra.mxu1 %v5697_v2 }
 0x1d0   :  { %3805 = vmatpush.bf16.msra.mxu3 %v5473_v44  ;;  %v6777_v44 = vld [vmem:[%s10190_s8 + $0x65c] sm:$0xf] }
 0x1d1   :  { %v2094_v23 = vpop.f32.mrf.mxu2  ;;  %3819 = vmatpush.bf16.msra.mxu1 %v5669_v30 }
 0x1d2   :  { %v6717_v23 = vld [vmem:[%s10190_s8 + $0x478] sm:$0xf0] }
 0x1d3   :  { %v5949_v34 = vor.u32 %v6717_v23, %v5948_v22  ;;  %v5613_v22 = vor.u32 %v6633_v9, %v5612_v8  ;;  %v6061_v23 = vor.u32 %v6745_v45, %v6060_v55  ;;  %v5698_v8 = vld [vmem:[%s10190_s8 + $0x284] sm:$0xf0]  ;;  %v5953_v45 = vor.u32 %v6714_v37, %v5950_v1  ;;  %v6795_v37 = vld [vmem:[%s10190_s8 + $0x6e8] sm:$0xf0] }
 0x1d4   :  { %3806 = vmatpush.bf16.msra.mxu3 %v5445_v58  ;;  %v5533_v58 = vor.u32 %v6609_v35, %v5530_v47  ;;  %v6146_v9 = vld [vmem:[%s10190_s8 + $0x604] sm:$0xf0]  ;;  %v6686_v47 = vld [vmem:[%s10190_s8 + $0x384] sm:$0xf] }
 0x1d5   :  { %3830 = vmatpush.bf16.msra.mxu2 %v5949_v34  ;;  %v5389_v34 = vor.u32 %v6577_v5, %v5388_v18  ;;  %v6595_v5 = vld [vmem:[%s10190_s8 + $0xac] sm:$0xf] }
 0x1d7   :  { %v2053_v41 = vpop.f32.mrf.mxu0 }
 0x1d8   :  { %v8745_v42 = vadd.f32 %v2053_v41, %v2041_v51  ;;  %v6710_v51 = vld [vmem:[%s10190_s8 + $0x440] sm:$0xf0]  ;;  %v6145_v41 = vor.u32 %v6766_v33, %v6144_v32  ;;  %3807 = vmatpush.bf16.msra.mxu3 %v5417_v14  ;;  %v6672_v32 = vld [vmem:[%s10190_s8 + $0x314] sm:$0xf]  ;;  %v5782_v33 = vld [vmem:[%s10190_s8 + $0x32c] sm:$0xf0] }
 0x1d9   :  { %v5921_v46 = vor.u32 %v6710_v51, %v5920_v40  ;;  %v6616_v40 = vld [vmem:[%s10190_s8 + $0x154] sm:$0xf]  ;;  %v5558_v51 = vld [vmem:[%s10190_s8 + $0x16c] sm:$0xf0]  ;;  %v5785_v57 = vor.u32 %v6672_v32, %v5782_v33 }
 0x1da   :  { %4200 = vst [vmem:[%s10189_s11] sm:$0xff] %v8745_v42  ;;  %3844 = vmatpush.bf16.msra.mxu0 %v6145_v41  ;;  %v6006_v41 = vld [vmem:[%s10190_s8 + $0x4ec] sm:$0xf0]  ;;  %v5561_v25 = vor.u32 %v6616_v40, %v5558_v51  ;;  %v6588_v32 = vld [vmem:[%s10190_s8 + $0x74] sm:$0xf]  ;;  %v6742_v40 = vld [vmem:[%s10190_s8 + $0x544] sm:$0xf] }
 0x1db   :  { %3831 = vmatpush.bf16.msra.mxu2 %v5921_v46  ;;  %v6202_v46 = vld [vmem:[%s10190_s8 + $0x674] sm:$0xf0]  ;;  %v5670_v14 = vld [vmem:[%s10190_s8 + $0x24c] sm:$0xf0] }
 0x1dc   :  { %3808 = vmatpush.bf16.msra.mxu3 %v5389_v34  ;;  %v5446_v33 = vld [vmem:[%s10190_s8 + $0x8c] sm:$0xf0] }
 0x1dd   :  { %v5894_v34 = vld [vmem:[%s10190_s8 + $0x40c] sm:$0xf0] }
 0x1de   :  { %3845 = vmatpush.bf16.msra.mxu0 %v6117_v49  ;;  %v5978_v49 = vld [vmem:[%s10190_s8 + $0x4b4] sm:$0xf0] }
 0x1df   :  { %v2055_v0 = vpop.f32.mrf.mxu0  ;;  %3832 = vmatpush.bf16.msra.mxu2 %v5893_v59  ;;  %v5981_v59 = vor.u32 %v6721_v48, %v5978_v49  ;;  %v5838_v48 = vld [vmem:[%s10190_s8 + $0x39c] sm:$0xf0] }
 0x1e0   :  { %v5641_v0 = vor.u32 %v6640_v52, %v5640_v50  ;;  %v5757_v50 = vor.u32 %v6665_v11, %v5754_v43  ;;  %v6205_v52 = vor.u32 %v6777_v44, %v6202_v46  ;;  %v6693_v11 = vld [vmem:[%s10190_s8 + $0x3bc] sm:$0xf]  ;;  %v5866_v44 = vld [vmem:[%s10190_s8 + $0x3d4] sm:$0xf0]  ;;  %v5841_v49 = vor.u32 %v6686_v47, %v5838_v48  ;;  %v5984_v48 = vld [vmem:[%s10190_s8 + $0x4a0] sm:$0xf] }
 0x1e1   :  { %v5869_v46 = vor.u32 %v6693_v11, %v5866_v44  ;;  %v6774_v44 = vld [vmem:[%s10190_s8 + $0x640] sm:$0xf0] }
 0x1e2   :  { %3820 = vmatpush.bf16.msra.mxu1 %v5641_v0  ;;  %3846 = vmatpush.bf16.msra.mxu0 %v6089_v6  ;;  %v5502_v0 = vld [vmem:[%s10190_s8 + $0xfc] sm:$0xf0]  ;;  %v6651_v6 = vld [vmem:[%s10190_s8 + $0x26c] sm:$0xf] }
 0x1e3   :  { %3833 = vmatpush.bf16.msra.mxu2 %v5865_v16  ;;  %v5505_v55 = vor.u32 %v6602_v60, %v5502_v0  ;;  %v5701_v10 = vor.u32 %v6651_v6, %v5698_v8  ;;  %v6756_v16 = vld [vmem:[%s10190_s8 + $0x5b4] sm:$0xf]  ;;  %v6264_v0 = vld [vmem:[%s10190_s8 + $0x6d0] sm:$0xf] }
 0x1e6   :  { %3821 = vmatpush.bf16.msra.mxu1 %v5613_v22  ;;  %3847 = vmatpush.bf16.msra.mxu0 %v6061_v23  ;;  %v6637_v23 = vld [vmem:[%s10190_s8 + $0x1fc] sm:$0xf] }
 0x1e7   :  { %v2105_v29 = vpop.f32.mrf.mxu0 }
 0x1e8   :  { %v2106_v61 = vadd.f32 %v2105_v29, %v2093_v24  ;;  %v5586_v24 = vld [vmem:[%s10190_s8 + $0x1a4] sm:$0xf0]  ;;  %v6261_v29 = vor.u32 %v6791_v13, %v6258_v17  ;;  %v6644_v13 = vld [vmem:[%s10190_s8 + $0x234] sm:$0xf] }
 0x1e9   :  { %v5589_v2 = vor.u32 %v6623_v20, %v5586_v24  ;;  %v5673_v17 = vor.u32 %v6644_v13, %v5670_v14  ;;  %v5642_v24 = vld [vmem:[%s10190_s8 + $0x214] sm:$0xf0]  ;;  %v6788_v14 = vld [vmem:[%s10190_s8 + $0x6b0] sm:$0xf0] }
 0x1ea   :  { %v2109_v15 = vmul.f32 1.442695, %v2106_v61  ;;  %v6784_v61 = vld [vmem:[%s10190_s8 + $0x694] sm:$0xf]  ;;  %v5645_v26 = vor.u32 %v6637_v23, %v5642_v24  ;;  %v6236_v13 = vld [vmem:[%s10190_s8 + $0x698] sm:$0xf] }
 0x1eb   :  { %v6233_v38 = vor.u32 %v6784_v61, %v6230_v62  ;;  %v6700_v61 = vld [vmem:[%s10190_s8 + $0x3f4] sm:$0xf]  ;;  %v5449_v62 = vor.u32 %v6588_v32, %v5446_v33  ;;  %v6237_v24 = vor.u32 %v6788_v14, %v6236_v13  ;;  %v6208_v32 = vld [vmem:[%s10190_s8 + $0x660] sm:$0xf]  ;;  %v6781_v33 = vld [vmem:[%s10190_s8 + $0x678] sm:$0xf0] }
 0x1ec   :  { %6798 = vpow2.f32 %v2109_v15  ;;  %v6728_v15 = vld [vmem:[%s10190_s8 + $0x4d4] sm:$0xf]  ;;  %v6599_v13 = vld [vmem:[%s10190_s8 + $0xc8] sm:$0xf0] }
 0x1ed   :  { %v6009_v30 = vor.u32 %v6728_v15, %v6006_v41  ;;  %v6062_v15 = vld [vmem:[%s10190_s8 + $0x55c] sm:$0xf0] }
 0x1ee   :  { %v6065_v41 = vor.u32 %v6742_v40, %v6062_v15  ;;  %v6012_v40 = vld [vmem:[%s10190_s8 + $0x4d8] sm:$0xf]  ;;  %v6209_v15 = vor.u32 %v6781_v33, %v6208_v32  ;;  %v6634_v32 = vld [vmem:[%s10190_s8 + $0x1e0] sm:$0xf0]  ;;  %v6068_v33 = vld [vmem:[%s10190_s8 + $0x548] sm:$0xf] }
 0x1ef   :  { %v2107_v53 = vpop.f32.mrf.mxu0 }
 0x1f0   :  { %v6658_v53 = vld [vmem:[%s10190_s8 + $0x2a4] sm:$0xf] }
 0x1f1   :  { %v5729_v3 = vor.u32 %v6658_v53, %v5726_v54 }
 0x1f2   :  { %v6799_v4 = vpop.eup %6798 }
 0x1f3   :  { %v2112_v63 = vmul.f32 %v6799_v4, %v2111_v56  ;;  %4201 = vst [vmem:[%s10192_s12] sm:$0xff] %v6799_v4  ;;  %v6174_v56 = vld [vmem:[%s10190_s8 + $0x63c] sm:$0xf0] }
 0x1f4   :  { %v6177_v4 = vor.u32 %v6770_v31, %v6174_v56 }
 0x1f5   :  { %v2113_v7 = vadd.f32 %v2112_v63, %v8745_v42  ;;  %v6689_v42 = vld [vmem:[%s10190_s8 + $0x398] sm:$0xf0]  ;;  %v6763_v63 = vld [vmem:[%s10190_s8 + $0x5ec] sm:$0xf] }
 0x1f6   :  { %v5837_v36 = vor.u32 %v6689_v42, %v5836_v19  ;;  %v6149_v12 = vor.u32 %v6763_v63, %v6146_v9  ;;  %v5474_v19 = vld [vmem:[%s10190_s8 + $0xc4] sm:$0xf0]  ;;  %v6707_v42 = vld [vmem:[%s10190_s8 + $0x42c] sm:$0xf]  ;;  %v6265_v9 = vor.u32 %v6795_v37, %v6264_v0 }
 0x1f7   :  { %v2114_v21 = vpack.c.bf16 %v2113_v7, %v2113_v7  ;;  %v6118_v7 = vld [vmem:[%s10190_s8 + $0x5cc] sm:$0xf0]  ;;  %v5477_v20 = vor.u32 %v6595_v5, %v5474_v19  ;;  %v5956_v37 = vld [vmem:[%s10190_s8 + $0x468] sm:$0xf] }
 0x1f8   :  { %3834 = vmatpush.bf16.msra.mxu2 %v5837_v36  ;;  %v6121_v18 = vor.u32 %v6756_v16, %v6118_v7  ;;  %v5897_v36 = vor.u32 %v6700_v61, %v5894_v34  ;;  %v5564_v34 = vld [vmem:[%s10190_s8 + $0x158] sm:$0xf] }
 0x1f9   :  { %2325 = vmatmul.bf16.vlgmr.msrb.gmra.mxu3 %v2114_v21  ;;  %2338 = vmatmul.bf16.vlgmr.msrb.gmra.mxu1 %v2114_v21 }
 0x1fa   :  { %2351 = vmatmul.bf16.vlgmr.msrb.gmra.mxu2 %v2114_v21  ;;  %2364 = vmatmul.bf16.vlgmr.msrb.gmra.mxu0 %v2114_v21  ;;  %v5922_v21 = vld [vmem:[%s10190_s8 + $0x444] sm:$0xf0] }
 0x1fb   :  { %3866 = vmatpush.bf16.msrb.mxu1 %v5813_v28  ;;  %3892 = vmatpush.bf16.msrb.mxu0 %v6261_v29  ;;  %v5925_v22 = vor.u32 %v6707_v42, %v5922_v21  ;;  %v6090_v28 = vld [vmem:[%s10190_s8 + $0x594] sm:$0xf0]  ;;  %v6739_v21 = vld [vmem:[%s10190_s8 + $0x528] sm:$0xf0] }
 0x1fc   :  { %3853 = vmatpush.bf16.msrb.mxu3 %v5589_v2  ;;  %3879 = vmatpush.bf16.msrb.mxu2 %v6037_v39  ;;  %v6093_v29 = vor.u32 %v6749_v27, %v6090_v28  ;;  %v6630_v2 = vld [vmem:[%s10190_s8 + $0x1c4] sm:$0xf]  ;;  %v5614_v39 = vld [vmem:[%s10190_s8 + $0x1dc] sm:$0xf0]  ;;  %v6669_v27 = vld [vmem:[%s10190_s8 + $0x2f8] sm:$0xf0] }
 0x1fd   :  { %v5617_v51 = vor.u32 %v6630_v2, %v5614_v39 }
 0x1ff   :  { %3867 = vmatpush.bf16.msrb.mxu1 %v5785_v57  ;;  %3893 = vmatpush.bf16.msrb.mxu0 %v6233_v38  ;;  %v6581_v57 = vld [vmem:[%s10190_s8 + $0x3c] sm:$0xf]  ;;  %v5418_v38 = vld [vmem:[%s10190_s8 + $0x54] sm:$0xf0] }
 0x200   :  { %3854 = vmatpush.bf16.msrb.mxu3 %v5561_v25  ;;  %3880 = vmatpush.bf16.msrb.mxu2 %v6009_v30  ;;  %v5421_v43 = vor.u32 %v6581_v57, %v5418_v38  ;;  %v6574_v25 = vld [vmem:[%s10190_s8 + $0x4] sm:$0xf]  ;;  %v5390_v30 = vld [vmem:[%s10190_s8 + $0x1c] sm:$0xf0] }
 0x201   :  { %v5393_v35 = vor.u32 %v6574_v25, %v5390_v30  ;;  %v6662_v57 = vld [vmem:[%s10190_s8 + $0x2c0] sm:$0xf0]  ;;  %v5536_v30 = vld [vmem:[%s10190_s8 + $0x120] sm:$0xf] }
 0x203   :  { %3868 = vmatpush.bf16.msrb.mxu1 %v5757_v50  ;;  %3894 = vmatpush.bf16.msrb.mxu0 %v6205_v52  ;;  %v2147_v50 = vld [vmem:[%s10193_s7] sm:$0xf] }
 0x204   :  { %3855 = vmatpush.bf16.msrb.mxu3 %v5533_v58  ;;  %3881 = vmatpush.bf16.msrb.mxu2 %v5981_v59  ;;  %v2150_v52 = vperm.slane %v2147_v50, 1  ;;  %v2152_v53 = vperm.slane %v2147_v50, 3  ;;  %v5816_v58 = vld [vmem:[%s10190_s8 + $0x350] sm:$0xf]  ;;  %v6683_v59 = vld [vmem:[%s10190_s8 + $0x368] sm:$0xf0] }
 0x205   :  { %v2151_v6 = vperm.slane %v2147_v50, 2  ;;  %v5817_v8 = vor.u32 %v6683_v59, %v5816_v58  ;;  %v5508_v59 = vld [vmem:[%s10190_s8 + $0xe8] sm:$0xf] }
 0x207   :  { %3869 = vmatpush.bf16.msrb.mxu1 %v5729_v3  ;;  %3895 = vmatpush.bf16.msrb.mxu0 %v6177_v4  ;;  %v2149_v3 = vperm.slane %v2147_v50, 0 }
 0x208   :  { %3856 = vmatpush.bf16.msrb.mxu3 %v5505_v55  ;;  %3882 = vmatpush.bf16.msrb.mxu2 %v5953_v45  ;;  %v5788_v55 = vld [vmem:[%s10190_s8 + $0x318] sm:$0xf]  ;;  %v6676_v45 = vld [vmem:[%s10190_s8 + $0x330] sm:$0xf0] }
 0x209   :  { %v5789_v42 = vor.u32 %v6676_v45, %v5788_v55  ;;  %v6760_v55 = vld [vmem:[%s10190_s8 + $0x5d0] sm:$0xf0] }
 0x20b   :  { %3870 = vmatpush.bf16.msrb.mxu1 %v5701_v10  ;;  %3896 = vmatpush.bf16.msrb.mxu0 %v6149_v12 }
 0x20c   :  { %3857 = vmatpush.bf16.msrb.mxu3 %v5477_v20  ;;  %3883 = vmatpush.bf16.msrb.mxu2 %v5925_v22  ;;  %v6040_v20 = vld [vmem:[%s10190_s8 + $0x510] sm:$0xf] }
 0x20f   :  { %3871 = vmatpush.bf16.msrb.mxu1 %v5673_v17  ;;  %3897 = vmatpush.bf16.msrb.mxu0 %v6121_v18  ;;  %v5592_v17 = vld [vmem:[%s10190_s8 + $0x190] sm:$0xf]  ;;  %v6627_v18 = vld [vmem:[%s10190_s8 + $0x1a8] sm:$0xf0] }
 0x210   :  { %3858 = vmatpush.bf16.msrb.mxu3 %v5449_v62  ;;  %3884 = vmatpush.bf16.msrb.mxu2 %v5897_v36  ;;  %v6041_v62 = vor.u32 %v6739_v21, %v6040_v20  ;;  %v6620_v36 = vld [vmem:[%s10190_s8 + $0x170] sm:$0xf0]  ;;  %v6753_v20 = vld [vmem:[%s10190_s8 + $0x598] sm:$0xf0] }
 0x211   :  { %v5565_v11 = vor.u32 %v6620_v36, %v5564_v34  ;;  %v6680_v36 = vld [vmem:[%s10190_s8 + $0x354] sm:$0xf] }
 0x213   :  { %3872 = vmatpush.bf16.msrb.mxu1 %v5645_v26  ;;  %3898 = vmatpush.bf16.msrb.mxu0 %v6093_v29  ;;  %v5760_v26 = vld [vmem:[%s10190_s8 + $0x2e0] sm:$0xf]  ;;  %v5593_v29 = vor.u32 %v6627_v18, %v5592_v17 }
 0x214   :  { %3859 = vmatpush.bf16.msrb.mxu3 %v5421_v43  ;;  %3885 = vmatpush.bf16.msrb.mxu2 %v5869_v46  ;;  %v5761_v39 = vor.u32 %v6669_v27, %v5760_v26  ;;  %v6180_v43 = vld [vmem:[%s10190_s8 + $0x628] sm:$0xf]  ;;  %v5648_v18 = vld [vmem:[%s10190_s8 + $0x200] sm:$0xf]  ;;  %v5900_v26 = vld [vmem:[%s10190_s8 + $0x3f8] sm:$0xf] }
 0x215   :  { %v6181_v50 = vor.u32 %v6774_v44, %v6180_v43  ;;  %v6704_v27 = vld [vmem:[%s10190_s8 + $0x410] sm:$0xf0]  ;;  %v6697_v43 = vld [vmem:[%s10190_s8 + $0x3d8] sm:$0xf0] }
 0x217   :  { %3873 = vmatpush.bf16.msrb.mxu1 %v5617_v51  ;;  %3899 = vmatpush.bf16.msrb.mxu0 %v6065_v41  ;;  %v6732_v51 = vld [vmem:[%s10190_s8 + $0x4f0] sm:$0xf0]  ;;  %v5732_v41 = vld [vmem:[%s10190_s8 + $0x2a8] sm:$0xf] }
 0x218   :  { %3860 = vmatpush.bf16.msrb.mxu3 %v5393_v35  ;;  %3886 = vmatpush.bf16.msrb.mxu2 %v5841_v49  ;;  %v6013_v25 = vor.u32 %v6732_v51, %v6012_v40  ;;  %v6613_v35 = vld [vmem:[%s10190_s8 + $0x138] sm:$0xf0]  ;;  %v5733_v47 = vor.u32 %v6662_v57, %v5732_v41  ;;  %v6792_v40 = vld [vmem:[%s10190_s8 + $0x6d4] sm:$0xf]  ;;  %v5901_v51 = vor.u32 %v6704_v27, %v5900_v26  ;;  %v5424_v41 = vld [vmem:[%s10190_s8 + $0x40] sm:$0xf] }
 0x219   :  { %v6725_v49 = vld [vmem:[%s10190_s8 + $0x4b8] sm:$0xf0]  ;;  %v6722_v26 = vld [vmem:[%s10190_s8 + $0x4a4] sm:$0xf]  ;;  %v5986_v27 = vld [vmem:[%s10190_s8 + $0x4bc] sm:$0xf0] }
 0x21a   :  { %v5985_v58 = vor.u32 %v6725_v49, %v5984_v48  ;;  %v6585_v57 = vld [vmem:[%s10190_s8 + $0x58] sm:$0xf0]  ;;  %v6238_v49 = vld [vmem:[%s10190_s8 + $0x6b4] sm:$0xf0] }
 0x21b   :  { %v6785_v48 = vld [vmem:[%s10190_s8 + $0x69c] sm:$0xf] }
 0x276   :  { %v2339_v54 = vpop.f32.mrf.mxu1 }
 0x277   :  { %v2340_v31 = vadd.f32 %v2339_v54, %v2150_v52  ;;  %v2365_v56 = vpop.f32.mrf.mxu0  ;;  %v5704_v52 = vld [vmem:[%s10190_s8 + $0x270] sm:$0xf]  ;;  %v5537_v54 = vor.u32 %v6613_v35, %v5536_v30  ;;  %v5425_v35 = vor.u32 %v6585_v57, %v5424_v41  ;;  %v5958_v41 = vld [vmem:[%s10190_s8 + $0x484] sm:$0xf0] }
 0x278   :  { %v2366_v60 = vadd.f32 %v2365_v56, %v2152_v53  ;;  %v6655_v53 = vld [vmem:[%s10190_s8 + $0x288] sm:$0xf0] }
 0x279   :  { %v2370_v1 = vmax.f32 %v2340_v31, 0.0  ;;  %v6152_v31 = vld [vmem:[%s10190_s8 + $0x5f0] sm:$0xf]  ;;  %v6767_v56 = vld [vmem:[%s10190_s8 + $0x608] sm:$0xf0]  ;;  %v5705_v0 = vor.u32 %v6655_v53, %v5704_v52 }
 0x27a   :  { %v2372_v4 = vmax.f32 %v2366_v60, 0.0  ;;  %v6606_v60 = vld [vmem:[%s10190_s8 + $0x100] sm:$0xf0]  ;;  %v5396_v52 = vld [vmem:[%s10190_s8 + $0x8] sm:$0xf] }
 0x27b   :  { %v9159_v63 = vpack.c.bf16 %v2370_v1, %v2370_v1  ;;  %v6718_v1 = vld [vmem:[%s10190_s8 + $0x480] sm:$0xf0] }
 0x27c   :  { %v9167_v10 = vpack.c.bf16 %v2372_v4, %v2372_v4  ;;  %v2326_v12 = vpop.f32.mrf.mxu3  ;;  %v5676_v4 = vld [vmem:[%s10190_s8 + $0x238] sm:$0xf]  ;;  %v5957_v45 = vor.u32 %v6718_v1, %v5956_v37  ;;  %v6578_v53 = vld [vmem:[%s10190_s8 + $0x20] sm:$0xf0]  ;;  %v6241_v37 = vor.u32 %v6785_v48, %v6238_v49  ;;  %v6708_v48 = vld [vmem:[%s10190_s8 + $0x434] sm:$0xf] }
 0x27d   :  { %v2327_v16 = vadd.f32 %v2326_v12, %v2149_v3  ;;  %v2352_v7 = vpop.f32.mrf.mxu2  ;;  %3822 = vmatmul.bf16.vlgmr.msra.gmra.mxu1 %v9159_v63  ;;  %v6153_v3 = vor.u32 %v6767_v56, %v6152_v31  ;;  %v5480_v12 = vld [vmem:[%s10190_s8 + $0xb0] sm:$0xf]  ;;  %v6690_v31 = vld [vmem:[%s10190_s8 + $0x3a0] sm:$0xf0]  ;;  %v6624_v56 = vld [vmem:[%s10190_s8 + $0x194] sm:$0xf]  ;;  %v5397_v1 = vor.u32 %v6578_v53, %v5396_v52 }
 0x27e   :  { %v2353_v5 = vadd.f32 %v2352_v7, %v2151_v6  ;;  %3848 = vmatmul.bf16.vlgmr.msra.gmra.mxu0 %v9167_v10  ;;  %3918 = vmatpush.bf16.msra.mxu1 %v5817_v8  ;;  %v2341_v19 = vpop.f32.mrf.mxu1  ;;  %v6648_v6 = vld [vmem:[%s10190_s8 + $0x250] sm:$0xf0]  ;;  %v5509_v8 = vor.u32 %v6606_v60, %v5508_v59  ;;  %v6711_v7 = vld [vmem:[%s10190_s8 + $0x448] sm:$0xf0]  ;;  %v5930_v49 = vld [vmem:[%s10190_s8 + $0x44c] sm:$0xf0] }
 0x27f   :  { %v2369_v22 = vmax.f32 %v2327_v16, 0.0  ;;  %3944 = vmatpush.bf16.msra.mxu0 %v6265_v9  ;;  %v2367_v23 = vpop.f32.mrf.mxu0  ;;  %v6124_v9 = vld [vmem:[%s10190_s8 + $0x5b8] sm:$0xf]  ;;  %v5677_v14 = vor.u32 %v6648_v6, %v5676_v4  ;;  %v5928_v16 = vld [vmem:[%s10190_s8 + $0x430] sm:$0xf]  ;;  %v5481_v19 = vor.u32 %v6599_v13, %v5480_v12 }
 0x280   :  { %v2371_v28 = vmax.f32 %v2353_v5, 0.0  ;;  %v6125_v17 = vor.u32 %v6760_v55, %v6124_v9  ;;  %v6641_v5 = vld [vmem:[%s10190_s8 + $0x218] sm:$0xf0]  ;;  %v5929_v21 = vor.u32 %v6711_v7, %v5928_v16  ;;  %v6592_v23 = vld [vmem:[%s10190_s8 + $0x90] sm:$0xf0] }
 0x281   :  { %v9201_v61 = vpack.c.bf16 %v2369_v22, %v2369_v22  ;;  %v5452_v22 = vld [vmem:[%s10190_s8 + $0x78] sm:$0xf]  ;;  %v6736_v60 = vld [vmem:[%s10190_s8 + $0x514] sm:$0xf]  ;;  %v5762_v4 = vld [vmem:[%s10190_s8 + $0x2fc] sm:$0xf0] }
 0x282   :  { %v9209_v2 = vpack.c.bf16 %v2371_v28, %v2371_v28  ;;  %3919 = vmatpush.bf16.msra.mxu1 %v5789_v42  ;;  %v6096_v42 = vld [vmem:[%s10190_s8 + $0x580] sm:$0xf]  ;;  %v5620_v28 = vld [vmem:[%s10190_s8 + $0x1c8] sm:$0xf]  ;;  %v5453_v34 = vor.u32 %v6592_v23, %v5452_v22  ;;  %v6778_v9 = vld [vmem:[%s10190_s8 + $0x664] sm:$0xf] }
 0x283   :  { %3945 = vmatpush.bf16.msra.mxu0 %v6237_v24  ;;  %3809 = vmatmul.bf16.vlgmr.msra.gmra.mxu3 %v9201_v61  ;;  %v5649_v24 = vor.u32 %v6641_v5, %v5648_v18  ;;  %v6210_v55 = vld [vmem:[%s10190_s8 + $0x67c] sm:$0xf0]  ;;  %v6617_v12 = vld [vmem:[%s10190_s8 + $0x15c] sm:$0xf]  ;;  %v5566_v13 = vld [vmem:[%s10190_s8 + $0x174] sm:$0xf0] }
 0x284   :  { %3835 = vmatmul.bf16.vlgmr.msra.gmra.mxu2 %v9209_v2  ;;  %3905 = vmatpush.bf16.msra.mxu3 %v5593_v29  ;;  %v2328_v38 = vpop.f32.mrf.mxu3  ;;  %v6097_v29 = vor.u32 %v6753_v20, %v6096_v42  ;;  %v6729_v16 = vld [vmem:[%s10190_s8 + $0x4dc] sm:$0xf]  ;;  %v6014_v7 = vld [vmem:[%s10190_s8 + $0x4f4] sm:$0xf0]  ;;  %v6659_v18 = vld [vmem:[%s10190_s8 + $0x2ac] sm:$0xf] }
 0x285   :  { %3931 = vmatpush.bf16.msra.mxu2 %v6041_v62  ;;  %v2354_v46 = vpop.f32.mrf.mxu2  ;;  %v6746_v62 = vld [vmem:[%s10190_s8 + $0x560] sm:$0xf0]  ;;  %v5621_v38 = vor.u32 %v6634_v32, %v5620_v28  ;;  %v5734_v5 = vld [vmem:[%s10190_s8 + $0x2c4] sm:$0xf0]  ;;  %v6771_v42 = vld [vmem:[%s10190_s8 + $0x62c] sm:$0xf] }
 0x286   :  { %3920 = vmatpush.bf16.msra.mxu1 %v5761_v39  ;;  %v5818_v39 = vld [vmem:[%s10190_s8 + $0x36c] sm:$0xf0]  ;;  %v6069_v44 = vor.u32 %v6746_v62, %v6068_v33  ;;  %v6182_v20 = vld [vmem:[%s10190_s8 + $0x644] sm:$0xf0]  ;;  %v6610_v22 = vld [vmem:[%s10190_s8 + $0x124] sm:$0xf] }
 0x287   :  { %3946 = vmatpush.bf16.msra.mxu0 %v6209_v15  ;;  %v6266_v15 = vld [vmem:[%s10190_s8 + $0x6ec] sm:$0xf0]  ;;  %v5821_v46 = vor.u32 %v6680_v36, %v5818_v39  ;;  %v5538_v23 = vld [vmem:[%s10190_s8 + $0x13c] sm:$0xf0]  ;;  %v6185_v28 = vor.u32 %v6771_v42, %v6182_v20  ;;  %v6764_v62 = vld [vmem:[%s10190_s8 + $0x5f4] sm:$0xf]  ;;  %v5989_v36 = vor.u32 %v6722_v26, %v5986_v27 }
 0x288   :  { %3906 = vmatpush.bf16.msra.mxu3 %v5565_v11  ;;  %v5872_v11 = vld [vmem:[%s10190_s8 + $0x3c0] sm:$0xf]  ;;  %v6269_v30 = vor.u32 %v6792_v40, %v6266_v15  ;;  %v5706_v32 = vld [vmem:[%s10190_s8 + $0x28c] sm:$0xf0]  ;;  %v5541_v33 = vor.u32 %v6610_v22, %v5538_v23  ;;  %v6603_v39 = vld [vmem:[%s10190_s8 + $0xec] sm:$0xf] }
 0x289   :  { %3932 = vmatpush.bf16.msra.mxu2 %v6013_v25  ;;  %v6673_v25 = vld [vmem:[%s10190_s8 + $0x31c] sm:$0xf]  ;;  %v5510_v40 = vld [vmem:[%s10190_s8 + $0x104] sm:$0xf0]  ;;  %v6715_v15 = vld [vmem:[%s10190_s8 + $0x46c] sm:$0xf] }
 0x28a   :  { %3921 = vmatpush.bf16.msra.mxu1 %v5733_v47  ;;  %v5790_v47 = vld [vmem:[%s10190_s8 + $0x334] sm:$0xf0]  ;;  %v6638_v52 = vld [vmem:[%s10190_s8 + $0x204] sm:$0xf]  ;;  %v5650_v53 = vld [vmem:[%s10190_s8 + $0x21c] sm:$0xf0] }
 0x28b   :  { %3947 = vmatpush.bf16.msra.mxu0 %v6181_v50  ;;  %v5873_v50 = vor.u32 %v6697_v43, %v5872_v11  ;;  %v5793_v59 = vor.u32 %v6673_v25, %v5790_v47  ;;  %v5678_v11 = vld [vmem:[%s10190_s8 + $0x254] sm:$0xf0]  ;;  %v5513_v43 = vor.u32 %v6603_v39, %v5510_v40  ;;  %v5961_v25 = vor.u32 %v6715_v15, %v5958_v41  ;;  %v6244_v26 = vld [vmem:[%s10190_s8 + $0x6a0] sm:$0xf]  ;;  %v6789_v27 = vld [vmem:[%s10190_s8 + $0x6b8] sm:$0xf0] }
 0x28c   :  { %3907 = vmatpush.bf16.msra.mxu3 %v5537_v54  ;;  %v5844_v54 = vld [vmem:[%s10190_s8 + $0x388] sm:$0xf]  ;;  %v6048_v40 = vld [vmem:[%s10190_s8 + $0x518] sm:$0xf]  ;;  %v6245_v15 = vor.u32 %v6789_v27, %v6244_v26  ;;  %v6712_v27 = vld [vmem:[%s10190_s8 + $0x450] sm:$0xf0] }
 0x28d   :  { %3933 = vmatpush.bf16.msra.mxu2 %v5985_v58  ;;  %3874 = vmatmul.bf16.vlgmr.msrb.gmra.mxu1 %v9159_v63  ;;  %v5594_v58 = vld [vmem:[%s10190_s8 + $0x1ac] sm:$0xf0]  ;;  %v5845_v6 = vor.u32 %v6690_v31, %v5844_v54  ;;  %v6750_v31 = vld [vmem:[%s10190_s8 + $0x584] sm:$0xf]  ;;  %v5936_v26 = vld [vmem:[%s10190_s8 + $0x438] sm:$0xf] }
 0x28e   :  { %3900 = vmatmul.bf16.vlgmr.msrb.gmra.mxu0 %v9167_v10  ;;  %3922 = vmatpush.bf16.msra.mxu1 %v5705_v0  ;;  %v6042_v0 = vld [vmem:[%s10190_s8 + $0x52c] sm:$0xf0] }
 0x28f   :  { %3948 = vmatpush.bf16.msra.mxu0 %v6153_v3  ;;  %v6666_v3 = vld [vmem:[%s10190_s8 + $0x2e4] sm:$0xf] }
 0x290   :  { %3908 = vmatpush.bf16.msra.mxu3 %v5509_v8  ;;  %v5597_v8 = vor.u32 %v6624_v56, %v5594_v58  ;;  %v6098_v56 = vld [vmem:[%s10190_s8 + $0x59c] sm:$0xf0]  ;;  %v5933_v58 = vor.u32 %v6708_v48, %v5930_v49  ;;  %v6733_v49 = vld [vmem:[%s10190_s8 + $0x4f8] sm:$0xf0] }
 0x291   :  { %3934 = vmatpush.bf16.msra.mxu2 %v5957_v45  ;;  %v6045_v45 = vor.u32 %v6736_v60, %v6042_v0  ;;  %v5454_v60 = vld [vmem:[%s10190_s8 + $0x94] sm:$0xf0]  ;;  %v5653_v0 = vor.u32 %v6638_v52, %v5650_v53  ;;  %v6020_v48 = vld [vmem:[%s10190_s8 + $0x4e0] sm:$0xf]  ;;  %v5740_v52 = vld [vmem:[%s10190_s8 + $0x2b0] sm:$0xf] }
 0x292   :  { %3923 = vmatpush.bf16.msra.mxu1 %v5677_v14  ;;  %v5765_v14 = vor.u32 %v6666_v3, %v5762_v4  ;;  %v6631_v3 = vld [vmem:[%s10190_s8 + $0x1cc] sm:$0xf]  ;;  %v6101_v4 = vor.u32 %v6750_v31, %v6098_v56  ;;  %v6188_v31 = vld [vmem:[%s10190_s8 + $0x630] sm:$0xf] }
 0x293   :  { %3949 = vmatpush.bf16.msra.mxu0 %v6125_v17  ;;  %3861 = vmatmul.bf16.vlgmr.msrb.gmra.mxu3 %v9201_v61  ;;  %v6213_v17 = vor.u32 %v6778_v9, %v6210_v55  ;;  %v6070_v9 = vld [vmem:[%s10190_s8 + $0x564] sm:$0xf0]  ;;  %v6663_v53 = vld [vmem:[%s10190_s8 + $0x2c8] sm:$0xf0] }
 0x294   :  { %3887 = vmatmul.bf16.vlgmr.msrb.gmra.mxu2 %v9209_v2  ;;  %3909 = vmatpush.bf16.msra.mxu3 %v5481_v19  ;;  %v5569_v19 = vor.u32 %v6617_v12, %v5566_v13  ;;  %v6684_v12 = vld [vmem:[%s10190_s8 + $0x370] sm:$0xf0]  ;;  %v6272_v13 = vld [vmem:[%s10190_s8 + $0x6d8] sm:$0xf]  ;;  %v6775_v56 = vld [vmem:[%s10190_s8 + $0x648] sm:$0xf0] }
 0x295   :  { %3935 = vmatpush.bf16.msra.mxu2 %v5929_v21  ;;  %v6017_v21 = vor.u32 %v6729_v16, %v6014_v7  ;;  %v6796_v16 = vld [vmem:[%s10190_s8 + $0x6f0] sm:$0xf0]  ;;  %v6582_v7 = vld [vmem:[%s10190_s8 + $0x44] sm:$0xf] }
 0x296   :  { %3924 = vmatpush.bf16.msra.mxu1 %v5649_v24  ;;  %v5737_v24 = vor.u32 %v6659_v18, %v5734_v5  ;;  %v6694_v5 = vld [vmem:[%s10190_s8 + $0x3c4] sm:$0xf]  ;;  %v6273_v22 = vor.u32 %v6796_v16, %v6272_v13  ;;  %v6607_v13 = vld [vmem:[%s10190_s8 + $0x108] sm:$0xf0]  ;;  %v5964_v16 = vld [vmem:[%s10190_s8 + $0x470] sm:$0xf] }
 0x297   :  { %3950 = vmatpush.bf16.msra.mxu0 %v6097_v29  ;;  %v6652_v29 = vld [vmem:[%s10190_s8 + $0x274] sm:$0xf] }
 0x298   :  { %3910 = vmatpush.bf16.msra.mxu3 %v5453_v34  ;;  %v6154_v34 = vld [vmem:[%s10190_s8 + $0x60c] sm:$0xf0] }
 0x299   :  { %3936 = vmatpush.bf16.msra.mxu2 %v5901_v51  ;;  %v5709_v51 = vor.u32 %v6652_v29, %v5706_v32  ;;  %v6157_v57 = vor.u32 %v6764_v62, %v6154_v34  ;;  %v6575_v29 = vld [vmem:[%s10190_s8 + $0xc] sm:$0xf]  ;;  %v5398_v32 = vld [vmem:[%s10190_s8 + $0x24] sm:$0xf0]  ;;  %v5600_v34 = vld [vmem:[%s10190_s8 + $0x198] sm:$0xf] }
 0x29a   :  { %3925 = vmatpush.bf16.msra.mxu1 %v5621_v38  ;;  %v6645_v38 = vld [vmem:[%s10190_s8 + $0x23c] sm:$0xf]  ;;  %v5846_v62 = vld [vmem:[%s10190_s8 + $0x3a4] sm:$0xf0]  ;;  %v5401_v41 = vor.u32 %v6575_v29, %v5398_v32  ;;  %v6642_v32 = vld [vmem:[%s10190_s8 + $0x220] sm:$0xf0] }
 0x29b   :  { %3951 = vmatpush.bf16.msra.mxu0 %v6069_v44  ;;  %v6757_v44 = vld [vmem:[%s10190_s8 + $0x5bc] sm:$0xf]  ;;  %v5681_v47 = vor.u32 %v6645_v38, %v5678_v11  ;;  %v6670_v38 = vld [vmem:[%s10190_s8 + $0x300] sm:$0xf0]  ;;  %v5656_v29 = vld [vmem:[%s10190_s8 + $0x208] sm:$0xf] }
 0x29c   :  { %3911 = vmatpush.bf16.msra.mxu3 %v5425_v35  ;;  %v5482_v35 = vld [vmem:[%s10190_s8 + $0xcc] sm:$0xf0] }
 0x29d   :  { %3937 = vmatpush.bf16.msra.mxu2 %v5873_v50  ;;  %3926 = vmatmul.bf16.vlgmr.msra.gmra.mxu1 %v9159_v63 }
 0x29e   :  { %3970 = vmatpush.bf16.msrb.mxu1 %v5821_v46  ;;  %3952 = vmatmul.bf16.vlgmr.msra.gmra.mxu0 %v9167_v10  ;;  %v6126_v46 = vld [vmem:[%s10190_s8 + $0x5d4] sm:$0xf0] }
 0x29f   :  { %3996 = vmatpush.bf16.msrb.mxu0 %v6269_v30  ;;  %v6596_v30 = vld [vmem:[%s10190_s8 + $0xb4] sm:$0xf]  ;;  %v6129_v50 = vor.u32 %v6757_v44, %v6126_v46  ;;  %v6216_v44 = vld [vmem:[%s10190_s8 + $0x668] sm:$0xf]  ;;  %v6782_v46 = vld [vmem:[%s10190_s8 + $0x680] sm:$0xf0] }
 0x2a0   :  { %3912 = vmatpush.bf16.msra.mxu3 %v5397_v1  ;;  %v5485_v54 = vor.u32 %v6596_v30, %v5482_v35  ;;  %v5902_v1 = vld [vmem:[%s10190_s8 + $0x414] sm:$0xf0]  ;;  %v5572_v30 = vld [vmem:[%s10190_s8 + $0x160] sm:$0xf]  ;;  %v6621_v35 = vld [vmem:[%s10190_s8 + $0x178] sm:$0xf0] }
 0x2a1   :  { %3938 = vmatpush.bf16.msra.mxu2 %v5845_v6  ;;  %v5622_v6 = vld [vmem:[%s10190_s8 + $0x1e4] sm:$0xf0] }
 0x2a2   :  { %3971 = vmatpush.bf16.msrb.mxu1 %v5793_v59  ;;  %v6589_v59 = vld [vmem:[%s10190_s8 + $0x7c] sm:$0xf]  ;;  %v5625_v18 = vor.u32 %v6631_v3, %v5622_v6  ;;  %v6189_v3 = vor.u32 %v6775_v56, %v6188_v31  ;;  %v6656_v6 = vld [vmem:[%s10190_s8 + $0x290] sm:$0xf0] }
 0x2a3   :  { %3997 = vmatpush.bf16.msrb.mxu0 %v6241_v37  ;;  %3913 = vmatmul.bf16.vlgmr.msra.gmra.mxu3 %v9201_v61  ;;  %v6701_v37 = vld [vmem:[%s10190_s8 + $0x3fc] sm:$0xf]  ;;  %v5457_v55 = vor.u32 %v6589_v59, %v5454_v60  ;;  %v5544_v59 = vld [vmem:[%s10190_s8 + $0x128] sm:$0xf]  ;;  %v6614_v60 = vld [vmem:[%s10190_s8 + $0x140] sm:$0xf0] }
 0x2a4   :  { %3957 = vmatpush.bf16.msrb.mxu3 %v5597_v8  ;;  %3939 = vmatmul.bf16.vlgmr.msra.gmra.mxu2 %v9209_v2  ;;  %v6743_v8 = vld [vmem:[%s10190_s8 + $0x54c] sm:$0xf] }
 0x2a5   :  { %3983 = vmatpush.bf16.msrb.mxu2 %v6045_v45  ;;  %v5824_v45 = vld [vmem:[%s10190_s8 + $0x358] sm:$0xf]  ;;  %v6073_v42 = vor.u32 %v6743_v8, %v6070_v9  ;;  %v5545_v8 = vor.u32 %v6614_v60, %v5544_v59 }
 0x2a6   :  { %3972 = vmatpush.bf16.msrb.mxu1 %v5765_v14  ;;  %v5905_v14 = vor.u32 %v6701_v37, %v5902_v1  ;;  %v5825_v20 = vor.u32 %v6684_v12, %v5824_v45  ;;  %v5992_v37 = vld [vmem:[%s10190_s8 + $0x4a8] sm:$0xf]  ;;  %v6726_v1 = vld [vmem:[%s10190_s8 + $0x4c0] sm:$0xf0]  ;;  %v6160_v9 = vld [vmem:[%s10190_s8 + $0x5f8] sm:$0xf] }
 0x2a7   :  { %3998 = vmatpush.bf16.msrb.mxu0 %v6213_v17  ;;  %v5426_v17 = vld [vmem:[%s10190_s8 + $0x5c] sm:$0xf0]  ;;  %v5993_v45 = vor.u32 %v6726_v1, %v5992_v37  ;;  %v5516_v12 = vld [vmem:[%s10190_s8 + $0xf0] sm:$0xf]  ;;  %v6786_v37 = vld [vmem:[%s10190_s8 + $0x6a4] sm:$0xf] }
 0x2a8   :  { %3958 = vmatpush.bf16.msrb.mxu3 %v5569_v19  ;;  %v5874_v19 = vld [vmem:[%s10190_s8 + $0x3dc] sm:$0xf0]  ;;  %v5429_v23 = vor.u32 %v6582_v7, %v5426_v17  ;;  %v6719_v7 = vld [vmem:[%s10190_s8 + $0x488] sm:$0xf0] }
 0x2a9   :  { %3984 = vmatpush.bf16.msrb.mxu2 %v6017_v21  ;;  %v5796_v21 = vld [vmem:[%s10190_s8 + $0x320] sm:$0xf] }
 0x2aa   :  { %3973 = vmatpush.bf16.msrb.mxu1 %v5737_v24  ;;  %v6677_v24 = vld [vmem:[%s10190_s8 + $0x338] sm:$0xf0]  ;;  %v6246_v1 = vld [vmem:[%s10190_s8 + $0x6bc] sm:$0xf0] }
 0x2ab   :  { %3999 = vmatpush.bf16.msrb.mxu0 %v6185_v28  ;;  %v5877_v28 = vor.u32 %v6694_v5, %v5874_v19  ;;  %v5797_v39 = vor.u32 %v6677_v24, %v5796_v21  ;;  %v6649_v5 = vld [vmem:[%s10190_s8 + $0x258] sm:$0xf0]  ;;  %v5517_v19 = vor.u32 %v6607_v13, %v5516_v12  ;;  %v5965_v21 = vor.u32 %v6719_v7, %v5964_v16 }
 0x2ac   :  { %3959 = vmatpush.bf16.msrb.mxu3 %v5541_v33  ;;  %v6687_v33 = vld [vmem:[%s10190_s8 + $0x38c] sm:$0xf]  ;;  %v6737_v13 = vld [vmem:[%s10190_s8 + $0x51c] sm:$0xf]  ;;  %v6249_v16 = vor.u32 %v6786_v37, %v6246_v1  ;;  %v5938_v1 = vld [vmem:[%s10190_s8 + $0x454] sm:$0xf0] }
 0x2ad   :  { %3985 = vmatpush.bf16.msrb.mxu2 %v5989_v36  ;;  %v6628_v36 = vld [vmem:[%s10190_s8 + $0x1b0] sm:$0xf0]  ;;  %v5849_v11 = vor.u32 %v6687_v33, %v5846_v62  ;;  %v6104_v62 = vld [vmem:[%s10190_s8 + $0x588] sm:$0xf]  ;;  %v6709_v37 = vld [vmem:[%s10190_s8 + $0x43c] sm:$0xf] }
 0x2ae   :  { %3974 = vmatpush.bf16.msrb.mxu1 %v5709_v51  ;;  %v6740_v51 = vld [vmem:[%s10190_s8 + $0x530] sm:$0xf0] }
 0x2af   :  { %4000 = vmatpush.bf16.msrb.mxu0 %v6157_v57  ;;  %v5768_v57 = vld [vmem:[%s10190_s8 + $0x2e8] sm:$0xf] }
 0x2b0   :  { %3960 = vmatpush.bf16.msrb.mxu3 %v5513_v43  ;;  %v5601_v43 = vor.u32 %v6628_v36, %v5600_v34  ;;  %v6754_v34 = vld [vmem:[%s10190_s8 + $0x5a0] sm:$0xf0]  ;;  %v5937_v36 = vor.u32 %v6712_v27, %v5936_v26  ;;  %v6022_v27 = vld [vmem:[%s10190_s8 + $0x4fc] sm:$0xf0] }
 0x2b1   :  { %3986 = vmatpush.bf16.msrb.mxu2 %v5961_v25  ;;  %v6049_v25 = vor.u32 %v6740_v51, %v6048_v40  ;;  %v6593_v40 = vld [vmem:[%s10190_s8 + $0x98] sm:$0xf0]  ;;  %v5657_v51 = vor.u32 %v6642_v32, %v5656_v29  ;;  %v6730_v26 = vld [vmem:[%s10190_s8 + $0x4e4] sm:$0xf]  ;;  %v6660_v29 = vld [vmem:[%s10190_s8 + $0x2b4] sm:$0xf] }
 0x2b2   :  { %3975 = vmatpush.bf16.msrb.mxu1 %v5681_v47  ;;  %v5769_v47 = vor.u32 %v6670_v38, %v5768_v57  ;;  %v5628_v57 = vld [vmem:[%s10190_s8 + $0x1d0] sm:$0xf]  ;;  %v6105_v38 = vor.u32 %v6754_v34, %v6104_v62  ;;  %v6772_v62 = vld [vmem:[%s10190_s8 + $0x634] sm:$0xf] }
 0x2b3   :  { %4001 = vmatpush.bf16.msrb.mxu0 %v6129_v50  ;;  %v6217_v50 = vor.u32 %v6782_v46, %v6216_v44  ;;  %v6747_v44 = vld [vmem:[%s10190_s8 + $0x568] sm:$0xf0]  ;;  %v5742_v32 = vld [vmem:[%s10190_s8 + $0x2cc] sm:$0xf0] }
 0x2b4   :  { %3961 = vmatpush.bf16.msrb.mxu3 %v5485_v54  ;;  %v5573_v54 = vor.u32 %v6621_v35, %v5572_v30  ;;  %v5826_v30 = vld [vmem:[%s10190_s8 + $0x374] sm:$0xf0]  ;;  %v6793_v35 = vld [vmem:[%s10190_s8 + $0x6dc] sm:$0xf]  ;;  %v6190_v34 = vld [vmem:[%s10190_s8 + $0x64c] sm:$0xf0] }
 0x2b5   :  { %3987 = vmatpush.bf16.msrb.mxu2 %v5933_v58  ;;  %v6021_v58 = vor.u32 %v6733_v49, %v6020_v48  ;;  %v6274_v48 = vld [vmem:[%s10190_s8 + $0x6f4] sm:$0xf0]  ;;  %v5432_v49 = vld [vmem:[%s10190_s8 + $0x48] sm:$0xf] }
 0x2b6   :  { %3976 = vmatpush.bf16.msrb.mxu1 %v5653_v0  ;;  %v5741_v0 = vor.u32 %v6663_v53, %v5740_v52  ;;  %v5880_v53 = vld [vmem:[%s10190_s8 + $0x3c8] sm:$0xf]  ;;  %v6277_v59 = vor.u32 %v6793_v35, %v6274_v48  ;;  %v5518_v35 = vld [vmem:[%s10190_s8 + $0x10c] sm:$0xf0]  ;;  %v6716_v48 = vld [vmem:[%s10190_s8 + $0x474] sm:$0xf] }
 0x2b7   :  { %4002 = vmatpush.bf16.msrb.mxu0 %v6101_v4  ;;  %v5712_v4 = vld [vmem:[%s10190_s8 + $0x278] sm:$0xf] }
 0x2b8   :  { %3962 = vmatpush.bf16.msrb.mxu3 %v5457_v55  ;;  %v6768_v55 = vld [vmem:[%s10190_s8 + $0x610] sm:$0xf0] }
 0x2b9   :  { %3988 = vmatpush.bf16.msrb.mxu2 %v5905_v14  ;;  %v5713_v14 = vor.u32 %v6656_v6, %v5712_v4  ;;  %v6161_v17 = vor.u32 %v6768_v55, %v6160_v9  ;;  %v5404_v4 = vld [vmem:[%s10190_s8 + $0x10] sm:$0xf]  ;;  %v6579_v6 = vld [vmem:[%s10190_s8 + $0x28] sm:$0xf0]  ;;  %v6625_v55 = vld [vmem:[%s10190_s8 + $0x19c] sm:$0xf] }
 0x2ba   :  { %3977 = vmatpush.bf16.msrb.mxu1 %v5625_v18  ;;  %v5684_v18 = vld [vmem:[%s10190_s8 + $0x240] sm:$0xf]  ;;  %v6691_v9 = vld [vmem:[%s10190_s8 + $0x3a8] sm:$0xf0]  ;;  %v5405_v7 = vor.u32 %v6579_v6, %v5404_v4  ;;  %v5658_v6 = vld [vmem:[%s10190_s8 + $0x224] sm:$0xf0] }
 0x2bb   :  { %4003 = vmatpush.bf16.msrb.mxu0 %v6073_v42  ;;  %v6132_v42 = vld [vmem:[%s10190_s8 + $0x5c0] sm:$0xf]  ;;  %v5685_v24 = vor.u32 %v6649_v5, %v5684_v18  ;;  %v5770_v18 = vld [vmem:[%s10190_s8 + $0x304] sm:$0xf0]  ;;  %v6639_v4 = vld [vmem:[%s10190_s8 + $0x20c] sm:$0xf] }
 0x2bc   :  { %3963 = vmatpush.bf16.msrb.mxu3 %v5429_v23  ;;  %v6600_v23 = vld [vmem:[%s10190_s8 + $0xd0] sm:$0xf0] }
 0x2bd   :  { %3989 = vmatpush.bf16.msrb.mxu2 %v5877_v28  ;;  %3978 = vmatmul.bf16.vlgmr.msrb.gmra.mxu1 %v9159_v63 }
 0x2be   :  { %4022 = vmatpush.bf16.msra.mxu1 %v5825_v20  ;;  %4004 = vmatmul.bf16.vlgmr.msrb.gmra.mxu0 %v9167_v10  ;;  %v6761_v20 = vld [vmem:[%s10190_s8 + $0x5d8] sm:$0xf0] }
 0x2bf   :  { %4048 = vmatpush.bf16.msra.mxu0 %v6273_v22  ;;  %v5488_v22 = vld [vmem:[%s10190_s8 + $0xb8] sm:$0xf]  ;;  %v6133_v28 = vor.u32 %v6761_v20, %v6132_v42  ;;  %v6779_v42 = vld [vmem:[%s10190_s8 + $0x66c] sm:$0xf]  ;;  %v6218_v20 = vld [vmem:[%s10190_s8 + $0x684] sm:$0xf0] }
 0x2c0   :  { %3964 = vmatpush.bf16.msrb.mxu3 %v5401_v41  ;;  %v5489_v33 = vor.u32 %v6600_v23, %v5488_v22  ;;  %v6705_v41 = vld [vmem:[%s10190_s8 + $0x418] sm:$0xf0]  ;;  %v6618_v22 = vld [vmem:[%s10190_s8 + $0x164] sm:$0xf]  ;;  %v5574_v23 = vld [vmem:[%s10190_s8 + $0x17c] sm:$0xf0] }
 0x2c1   :  { %3990 = vmatpush.bf16.msrb.mxu2 %v5849_v11  ;;  %v6635_v11 = vld [vmem:[%s10190_s8 + $0x1e8] sm:$0xf0] }
 0x2c2   :  { %4023 = vmatpush.bf16.msra.mxu1 %v5797_v39  ;;  %v5460_v39 = vld [vmem:[%s10190_s8 + $0x80] sm:$0xf]  ;;  %v5629_v52 = vor.u32 %v6635_v11, %v5628_v57  ;;  %v6193_v57 = vor.u32 %v6772_v62, %v6190_v34  ;;  %v5714_v11 = vld [vmem:[%s10190_s8 + $0x294] sm:$0xf0] }
 0x2c3   :  { %4049 = vmatpush.bf16.msra.mxu0 %v6245_v15  ;;  %3965 = vmatmul.bf16.vlgmr.msrb.gmra.mxu3 %v9201_v61  ;;  %v5908_v15 = vld [vmem:[%s10190_s8 + $0x400] sm:$0xf]  ;;  %v5461_v46 = vor.u32 %v6593_v40, %v5460_v39  ;;  %v6611_v39 = vld [vmem:[%s10190_s8 + $0x12c] sm:$0xf]  ;;  %v5546_v40 = vld [vmem:[%s10190_s8 + $0x144] sm:$0xf0] }
 0x2c4   :  { %4009 = vmatpush.bf16.msra.mxu3 %v5601_v43  ;;  %3991 = vmatmul.bf16.vlgmr.msrb.gmra.mxu2 %v9209_v2  ;;  %v6076_v43 = vld [vmem:[%s10190_s8 + $0x550] sm:$0xf] }
 0x2c5   :  { %4035 = vmatpush.bf16.msra.mxu2 %v6049_v25  ;;  %v6681_v25 = vld [vmem:[%s10190_s8 + $0x35c] sm:$0xf]  ;;  %v6077_v31 = vor.u32 %v6747_v44, %v6076_v43  ;;  %v5549_v43 = vor.u32 %v6611_v39, %v5546_v40 }
 0x2c6   :  { %4024 = vmatpush.bf16.msra.mxu1 %v5769_v47  ;;  %v5909_v47 = vor.u32 %v6705_v41, %v5908_v15  ;;  %v5829_v56 = vor.u32 %v6681_v25, %v5826_v30  ;;  %v6723_v15 = vld [vmem:[%s10190_s8 + $0x4ac] sm:$0xf]  ;;  %v5994_v41 = vld [vmem:[%s10190_s8 + $0x4c4] sm:$0xf0]  ;;  %v6765_v44 = vld [vmem:[%s10190_s8 + $0x5fc] sm:$0xf] }
 0x2c7   :  { %4050 = vmatpush.bf16.msra.mxu0 %v6217_v50  ;;  %v6586_v50 = vld [vmem:[%s10190_s8 + $0x60] sm:$0xf0]  ;;  %v5997_v25 = vor.u32 %v6723_v15, %v5994_v41  ;;  %v6604_v30 = vld [vmem:[%s10190_s8 + $0xf4] sm:$0xf]  ;;  %v6252_v15 = vld [vmem:[%s10190_s8 + $0x6a8] sm:$0xf] }
 0x2c8   :  { %4010 = vmatpush.bf16.msra.mxu3 %v5573_v54  ;;  %v6698_v54 = vld [vmem:[%s10190_s8 + $0x3e0] sm:$0xf0]  ;;  %v5433_v60 = vor.u32 %v6586_v50, %v5432_v49  ;;  %v5966_v49 = vld [vmem:[%s10190_s8 + $0x48c] sm:$0xf0] }
 0x2c9   :  { %4036 = vmatpush.bf16.msra.mxu2 %v6021_v58  ;;  %v6674_v58 = vld [vmem:[%s10190_s8 + $0x324] sm:$0xf] }
 0x2ca   :  { %4025 = vmatpush.bf16.msra.mxu1 %v5741_v0  ;;  %v5798_v0 = vld [vmem:[%s10190_s8 + $0x33c] sm:$0xf0]  ;;  %v6790_v41 = vld [vmem:[%s10190_s8 + $0x6c0] sm:$0xf0] }
 0x2cb   :  { %4051 = vmatpush.bf16.msra.mxu0 %v6189_v3  ;;  %v5881_v3 = vor.u32 %v6698_v54, %v5880_v53  ;;  %v5801_v12 = vor.u32 %v6674_v58, %v5798_v0  ;;  %v5686_v53 = vld [vmem:[%s10190_s8 + $0x25c] sm:$0xf0]  ;;  %v5521_v54 = vor.u32 %v6604_v30, %v5518_v35  ;;  %v5969_v58 = vor.u32 %v6716_v48, %v5966_v49 }
 0x2cc   :  { %4011 = vmatpush.bf16.msra.mxu3 %v5545_v8  ;;  %v5852_v8 = vld [vmem:[%s10190_s8 + $0x390] sm:$0xf]  ;;  %v6056_v35 = vld [vmem:[%s10190_s8 + $0x520] sm:$0xf]  ;;  %v6253_v48 = vor.u32 %v6790_v41, %v6252_v15  ;;  %v6601_v41 = vld [vmem:[%s10190_s8 + $0xd8] sm:$0xf0] }
 0x2cd   :  { %4037 = vmatpush.bf16.msra.mxu2 %v5993_v45  ;;  %v5602_v45 = vld [vmem:[%s10190_s8 + $0x1b4] sm:$0xf0]  ;;  %v5853_v5 = vor.u32 %v6691_v9, %v5852_v8  ;;  %v6751_v9 = vld [vmem:[%s10190_s8 + $0x58c] sm:$0xf]  ;;  %v5496_v15 = vld [vmem:[%s10190_s8 + $0xc0] sm:$0xf] }
 0x2ce   :  { %4026 = vmatpush.bf16.msra.mxu1 %v5713_v14  ;;  %v6050_v14 = vld [vmem:[%s10190_s8 + $0x534] sm:$0xf0] }
 0x2cf   :  { %4052 = vmatpush.bf16.msra.mxu0 %v6161_v17  ;;  %v6667_v17 = vld [vmem:[%s10190_s8 + $0x2ec] sm:$0xf] }
 0x2d0   :  { %4012 = vmatpush.bf16.msra.mxu3 %v5517_v19  ;;  %v5605_v19 = vor.u32 %v6625_v55, %v5602_v45  ;;  %v6106_v55 = vld [vmem:[%s10190_s8 + $0x5a4] sm:$0xf0]  ;;  %v5941_v45 = vor.u32 %v6709_v37, %v5938_v1  ;;  %v6734_v1 = vld [vmem:[%s10190_s8 + $0x500] sm:$0xf0] }
 0x2d1   :  { %4038 = vmatpush.bf16.msra.mxu2 %v5965_v21  ;;  %v6053_v21 = vor.u32 %v6737_v13, %v6050_v14  ;;  %v5462_v13 = vld [vmem:[%s10190_s8 + $0x9c] sm:$0xf0]  ;;  %v5661_v14 = vor.u32 %v6639_v4, %v5658_v6  ;;  %v6028_v37 = vld [vmem:[%s10190_s8 + $0x4e8] sm:$0xf]  ;;  %v5748_v4 = vld [vmem:[%s10190_s8 + $0x2b8] sm:$0xf] }
 0x2d2   :  { %4027 = vmatpush.bf16.msra.mxu1 %v5685_v24  ;;  %v5773_v24 = vor.u32 %v6667_v17, %v5770_v18  ;;  %v6632_v17 = vld [vmem:[%s10190_s8 + $0x1d4] sm:$0xf]  ;;  %v6109_v18 = vor.u32 %v6751_v9, %v6106_v55  ;;  %v6196_v9 = vld [vmem:[%s10190_s8 + $0x638] sm:$0xf] }
 0x2d3   :  { %4053 = vmatpush.bf16.msra.mxu0 %v6133_v28  ;;  %v6221_v28 = vor.u32 %v6779_v42, %v6218_v20  ;;  %v6078_v42 = vld [vmem:[%s10190_s8 + $0x56c] sm:$0xf0]  ;;  %v6664_v6 = vld [vmem:[%s10190_s8 + $0x2d0] sm:$0xf0] }
 0x2d4   :  { %4013 = vmatpush.bf16.msra.mxu3 %v5489_v33  ;;  %v5577_v33 = vor.u32 %v6618_v22, %v5574_v23  ;;  %v6685_v22 = vld [vmem:[%s10190_s8 + $0x378] sm:$0xf0]  ;;  %v6280_v23 = vld [vmem:[%s10190_s8 + $0x6e0] sm:$0xf]  ;;  %v6776_v55 = vld [vmem:[%s10190_s8 + $0x650] sm:$0xf0] }
 0x2d5   :  { %4039 = vmatpush.bf16.msra.mxu2 %v5937_v36  ;;  %v6025_v36 = vor.u32 %v6730_v26, %v6022_v27  ;;  %v6797_v26 = vld [vmem:[%s10190_s8 + $0x6f8] sm:$0xf0]  ;;  %v6583_v27 = vld [vmem:[%s10190_s8 + $0x4c] sm:$0xf] }
 0x2d6   :  { %4028 = vmatpush.bf16.msra.mxu1 %v5657_v51  ;;  %v5745_v51 = vor.u32 %v6660_v29, %v5742_v32  ;;  %v6695_v32 = vld [vmem:[%s10190_s8 + $0x3cc] sm:$0xf]  ;;  %v6281_v39 = vor.u32 %v6797_v26, %v6280_v23  ;;  %v6608_v26 = vld [vmem:[%s10190_s8 + $0x110] sm:$0xf0] }
 0x2d7   :  { %4054 = vmatpush.bf16.msra.mxu0 %v6105_v38  ;;  %v6653_v38 = vld [vmem:[%s10190_s8 + $0x27c] sm:$0xf] }
 0x2d8   :  { %4014 = vmatpush.bf16.msra.mxu3 %v5461_v46  ;;  %v6162_v46 = vld [vmem:[%s10190_s8 + $0x614] sm:$0xf0] }
 0x2d9   :  { %4040 = vmatpush.bf16.msra.mxu2 %v5909_v47  ;;  %v5717_v47 = vor.u32 %v6653_v38, %v5714_v11  ;;  %v6165_v50 = vor.u32 %v6765_v44, %v6162_v46  ;;  %v6576_v38 = vld [vmem:[%s10190_s8 + $0x14] sm:$0xf]  ;;  %v5406_v11 = vld [vmem:[%s10190_s8 + $0x2c] sm:$0xf0]  ;;  %v5608_v46 = vld [vmem:[%s10190_s8 + $0x1a0] sm:$0xf] }
 0x2da   :  { %4029 = vmatpush.bf16.msra.mxu1 %v5629_v52  ;;  %v6646_v52 = vld [vmem:[%s10190_s8 + $0x244] sm:$0xf]  ;;  %v5854_v44 = vld [vmem:[%s10190_s8 + $0x3ac] sm:$0xf0]  ;;  %v5409_v49 = vor.u32 %v6576_v38, %v5406_v11  ;;  %v5944_v11 = vld [vmem:[%s10190_s8 + $0x440] sm:$0xf] }
 0x2db   :  { %4055 = vmatpush.bf16.msra.mxu0 %v6077_v31  ;;  %v6758_v31 = vld [vmem:[%s10190_s8 + $0x5c4] sm:$0xf]  ;;  %v5689_v0 = vor.u32 %v6646_v52, %v5686_v53  ;;  %v6671_v52 = vld [vmem:[%s10190_s8 + $0x308] sm:$0xf0] }
 0x2dc   :  { %4015 = vmatpush.bf16.msra.mxu3 %v5433_v60  ;;  %v5490_v60 = vld [vmem:[%s10190_s8 + $0xd4] sm:$0xf0] }
 0x2dd   :  { %4041 = vmatpush.bf16.msra.mxu2 %v5881_v3  ;;  %4030 = vmatmul.bf16.vlgmr.msra.gmra.mxu1 %v9159_v63 }
 0x2de   :  { %4074 = vmatpush.bf16.msrb.mxu1 %v5829_v56  ;;  %4056 = vmatmul.bf16.vlgmr.msra.gmra.mxu0 %v9167_v10  ;;  %v6134_v56 = vld [vmem:[%s10190_s8 + $0x5dc] sm:$0xf0] }
 0x2df   :  { %4100 = vmatpush.bf16.msrb.mxu0 %v6277_v59  ;;  %v6597_v59 = vld [vmem:[%s10190_s8 + $0xbc] sm:$0xf]  ;;  %v6137_v3 = vor.u32 %v6758_v31, %v6134_v56  ;;  %v6224_v31 = vld [vmem:[%s10190_s8 + $0x670] sm:$0xf]  ;;  %v6783_v56 = vld [vmem:[%s10190_s8 + $0x688] sm:$0xf0] }
 0x2e0   :  { %4016 = vmatpush.bf16.msra.mxu3 %v5405_v7  ;;  %v5493_v8 = vor.u32 %v6597_v59, %v5490_v60  ;;  %v5910_v7 = vld [vmem:[%s10190_s8 + $0x41c] sm:$0xf0]  ;;  %v5580_v59 = vld [vmem:[%s10190_s8 + $0x168] sm:$0xf]  ;;  %v6622_v60 = vld [vmem:[%s10190_s8 + $0x180] sm:$0xf0] }
 0x2e1   :  { %4042 = vmatpush.bf16.msra.mxu2 %v5853_v5  ;;  %v5630_v5 = vld [vmem:[%s10190_s8 + $0x1ec] sm:$0xf0] }
 0x2e2   :  { %4075 = vmatpush.bf16.msrb.mxu1 %v5801_v12  ;;  %v6590_v12 = vld [vmem:[%s10190_s8 + $0x84] sm:$0xf]  ;;  %v5633_v29 = vor.u32 %v6632_v17, %v5630_v5  ;;  %v6727_v17 = vld [vmem:[%s10190_s8 + $0x4c8] sm:$0xf0]  ;;  %v6197_v5 = vor.u32 %v6776_v55, %v6196_v9  ;;  %v5440_v55 = vld [vmem:[%s10190_s8 + $0x50] sm:$0xf] }
 0x2e3   :  { %4101 = vmatpush.bf16.msrb.mxu0 %v6249_v16  ;;  %4017 = vmatmul.bf16.vlgmr.msra.gmra.mxu3 %v9201_v61  ;;  %v6702_v16 = vld [vmem:[%s10190_s8 + $0x404] sm:$0xf]  ;;  %v5465_v20 = vor.u32 %v6590_v12, %v5462_v13  ;;  %v5552_v12 = vld [vmem:[%s10190_s8 + $0x130] sm:$0xf]  ;;  %v6615_v13 = vld [vmem:[%s10190_s8 + $0x148] sm:$0xf0] }
 0x2e4   :  { %4061 = vmatpush.bf16.msrb.mxu3 %v5605_v19  ;;  %4043 = vmatmul.bf16.vlgmr.msra.gmra.mxu2 %v9209_v2  ;;  %v6744_v19 = vld [vmem:[%s10190_s8 + $0x554] sm:$0xf] }
 0x2e5   :  { %4087 = vmatpush.bf16.msrb.mxu2 %v6053_v21  ;;  %v5832_v21 = vld [vmem:[%s10190_s8 + $0x360] sm:$0xf]  ;;  %v6081_v62 = vor.u32 %v6744_v19, %v6078_v42  ;;  %v6657_v42 = vld [vmem:[%s10190_s8 + $0x298] sm:$0xf0] }
 0x2e6   :  { %4076 = vmatpush.bf16.msrb.mxu1 %v5773_v24  ;;  %v5913_v24 = vor.u32 %v6702_v16, %v5910_v7  ;;  %v5833_v34 = vor.u32 %v6685_v22, %v5832_v21  ;;  %v5749_v16 = vor.u32 %v6664_v6, %v5748_v4  ;;  %v6000_v7 = vld [vmem:[%s10190_s8 + $0x4b0] sm:$0xf]  ;;  %v5720_v19 = vld [vmem:[%s10190_s8 + $0x280] sm:$0xf]  ;;  %v6769_v22 = vld [vmem:[%s10190_s8 + $0x618] sm:$0xf0] }
 0x2e7   :  { %4102 = vmatpush.bf16.msrb.mxu0 %v6221_v28  ;;  %v5434_v28 = vld [vmem:[%s10190_s8 + $0x64] sm:$0xf0]  ;;  %v6168_v21 = vld [vmem:[%s10190_s8 + $0x600] sm:$0xf]  ;;  %v6001_v23 = vor.u32 %v6727_v17, %v6000_v7  ;;  %v6084_v4 = vld [vmem:[%s10190_s8 + $0x558] sm:$0xf] }
 0x2e8   :  { %4062 = vmatpush.bf16.msrb.mxu3 %v5577_v33  ;;  %v5882_v33 = vld [vmem:[%s10190_s8 + $0x3e4] sm:$0xf0]  ;;  %v5437_v40 = vor.u32 %v6583_v27, %v5434_v28  ;;  %v5721_v27 = vor.u32 %v6657_v42, %v5720_v19  ;;  %v5972_v28 = vld [vmem:[%s10190_s8 + $0x478] sm:$0xf]  ;;  %v6748_v6 = vld [vmem:[%s10190_s8 + $0x570] sm:$0xf0] }
 0x2e9   :  { %4088 = vmatpush.bf16.msrb.mxu2 %v6025_v36  ;;  %v5804_v36 = vld [vmem:[%s10190_s8 + $0x328] sm:$0xf] }
 0x2ea   :  { %4077 = vmatpush.bf16.msrb.mxu1 %v5745_v51  ;;  %v6678_v51 = vld [vmem:[%s10190_s8 + $0x340] sm:$0xf0] }
 0x2eb   :  { %4103 = vmatpush.bf16.msrb.mxu0 %v6193_v57  ;;  %v5885_v57 = vor.u32 %v6695_v32, %v5882_v33  ;;  %v5805_v30 = vor.u32 %v6678_v51, %v5804_v36  ;;  %v6169_v32 = vor.u32 %v6769_v22, %v6168_v21  ;;  %v5692_v33 = vld [vmem:[%s10190_s8 + $0x248] sm:$0xf]  ;;  %v5412_v21 = vld [vmem:[%s10190_s8 + $0x18] sm:$0xf]  ;;  %v6580_v22 = vld [vmem:[%s10190_s8 + $0x30] sm:$0xf0] }
 0x2ec   :  { %4063 = vmatpush.bf16.msrb.mxu3 %v5549_v43  ;;  %v6688_v43 = vld [vmem:[%s10190_s8 + $0x394] sm:$0xf]  ;;  %v6140_v36 = vld [vmem:[%s10190_s8 + $0x5c8] sm:$0xf] }
 0x2ed   :  { %4089 = vmatpush.bf16.msrb.mxu2 %v5997_v25  ;;  %v6629_v25 = vld [vmem:[%s10190_s8 + $0x1b8] sm:$0xf0]  ;;  %v5857_v53 = vor.u32 %v6688_v43, %v5854_v44 }
 0x2ee   :  { %4078 = vmatpush.bf16.msrb.mxu1 %v5717_v47  ;;  %v6741_v47 = vld [vmem:[%s10190_s8 + $0x538] sm:$0xf0] }
 0x2ef   :  { %4104 = vmatpush.bf16.msrb.mxu0 %v6165_v50  ;;  %v5776_v50 = vld [vmem:[%s10190_s8 + $0x2f0] sm:$0xf]  ;;  %v6713_v43 = vld [vmem:[%s10190_s8 + $0x458] sm:$0xf0] }
 0x2f0   :  { %4064 = vmatpush.bf16.msrb.mxu3 %v5521_v54  ;;  %v5609_v54 = vor.u32 %v6629_v25, %v5608_v46 }
 0x2f1   :  { %4090 = vmatpush.bf16.msrb.mxu2 %v5969_v58  ;;  %v6057_v58 = vor.u32 %v6741_v47, %v6056_v35  ;;  %v6643_v35 = vld [vmem:[%s10190_s8 + $0x228] sm:$0xf0]  ;;  %v5497_v47 = vor.u32 %v6601_v41, %v5496_v15 }
 0x2f2   :  { %4079 = vmatpush.bf16.msrb.mxu1 %v5689_v0  ;;  %v5777_v0 = vor.u32 %v6671_v52, %v5776_v50  ;;  %v5945_v50 = vor.u32 %v6713_v43, %v5944_v11  ;;  %v5468_v52 = vld [vmem:[%s10190_s8 + $0x88] sm:$0xf] }
 0x2f3   :  { %4105 = vmatpush.bf16.msrb.mxu0 %v6137_v3  ;;  %v6225_v3 = vor.u32 %v6783_v56, %v6224_v31  ;;  %v5916_v56 = vld [vmem:[%s10190_s8 + $0x408] sm:$0xf] }
 0x2f4   :  { %4065 = vmatpush.bf16.msrb.mxu3 %v5493_v8  ;;  %v5581_v8 = vor.u32 %v6622_v60, %v5580_v59 }
 0x2f5   :  { %4091 = vmatpush.bf16.msrb.mxu2 %v5941_v45  ;;  %v6029_v45 = vor.u32 %v6734_v1, %v6028_v37  ;;  %v5636_v37 = vld [vmem:[%s10190_s8 + $0x1d8] sm:$0xf]  ;;  %v6636_v1 = vld [vmem:[%s10190_s8 + $0x1f0] sm:$0xf0] }
 0x2f6   :  { %4080 = vmatpush.bf16.msrb.mxu1 %v5661_v14 }
 0x2f7   :  { %4106 = vmatpush.bf16.msrb.mxu0 %v6109_v18 }
 0x2f8   :  { %4066 = vmatpush.bf16.msrb.mxu3 %v5465_v20  ;;  %v5553_v20 = vor.u32 %v6615_v13, %v5552_v12  ;;  %v5637_v13 = vor.u32 %v6636_v1, %v5636_v37 }
 0x2f9   :  { %4092 = vmatpush.bf16.msrb.mxu2 %v5913_v24  ;;  %v5524_v24 = vld [vmem:[%s10190_s8 + $0xf8] sm:$0xf] }
 0x2fa   :  { %4081 = vmatpush.bf16.msrb.mxu1 %v5633_v29  ;;  %v10024_v14 = vpop.f32.mrf.mxu1  ;;  %v6720_v29 = vld [vmem:[%s10190_s8 + $0x490] sm:$0xf0] }
 0x2fb   :  { %4107 = vmatpush.bf16.msrb.mxu0 %v6081_v62  ;;  %v10033_v18 = vpop.f32.mrf.mxu0  ;;  %v6650_v62 = vld [vmem:[%s10190_s8 + $0x260] sm:$0xf0]  ;;  %v5973_v51 = vor.u32 %v6720_v29, %v5972_v28  ;;  %v5413_v28 = vor.u32 %v6580_v22, %v5412_v21 }
 0x2fc   :  { %4067 = vmatpush.bf16.msrb.mxu3 %v5437_v40  ;;  %v10074_v40 = vld [vmem:[%s10194_s9] sm:$0x7f]  ;;  %v5693_v38 = vor.u32 %v6650_v62, %v5692_v33 }
 0x2fd   :  { %4093 = vmatpush.bf16.msrb.mxu2 %v5885_v57  ;;  %4082 = vmatmul.bf16.vlgmr.msrb.gmra.mxu1 %v9159_v63  ;;  %v2635_v25 = vperm.slane %v10074_v40, 0  ;;  %v2636_v62 = vperm.slane %v10074_v40, 1 }
 0x2fe   :  { %4126 = vmatpush.bf16.msra.mxu1 %v5833_v34  ;;  %4108 = vmatmul.bf16.vlgmr.msrb.gmra.mxu0 %v9167_v10  ;;  %v5525_v34 = vor.u32 %v6608_v26, %v5524_v24  ;;  %v5860_v24 = vld [vmem:[%s10190_s8 + $0x398] sm:$0xf] }
 0x2ff   :  { %4152 = vmatpush.bf16.msra.mxu0 %v6281_v39  ;;  %v6762_v39 = vld [vmem:[%s10190_s8 + $0x5e0] sm:$0xf0] }
 0x300   :  { %4068 = vmatpush.bf16.msrb.mxu3 %v5409_v49  ;;  %v6141_v46 = vor.u32 %v6762_v39, %v6140_v36  ;;  %v6755_v49 = vld [vmem:[%s10190_s8 + $0x5a8] sm:$0xf0] }
 0x301   :  { %4094 = vmatpush.bf16.msrb.mxu2 %v5857_v53  ;;  %v6594_v53 = vld [vmem:[%s10190_s8 + $0xa0] sm:$0xf0] }
 0x302   :  { %4127 = vmatpush.bf16.msra.mxu1 %v5805_v30  ;;  %v3825_v57 = vpop.f32.mrf.mxu1  ;;  %v5664_v30 = vld [vmem:[%s10190_s8 + $0x210] sm:$0xf] }
 0x303   :  { %4153 = vmatpush.bf16.msra.mxu0 %v6253_v48  ;;  %4069 = vmatmul.bf16.vlgmr.msrb.gmra.mxu3 %v9201_v61  ;;  %v3851_v44 = vpop.f32.mrf.mxu0  ;;  %v6112_v48 = vld [vmem:[%s10190_s8 + $0x590] sm:$0xf]  ;;  %v5665_v31 = vor.u32 %v6643_v35, %v5664_v30 }
 0x304   :  { %4113 = vmatpush.bf16.msra.mxu3 %v5609_v54  ;;  %4095 = vmatmul.bf16.vlgmr.msrb.gmra.mxu2 %v9209_v2 }
 0x305   :  { %4139 = vmatpush.bf16.msra.mxu2 %v6057_v58  ;;  %v6706_v58 = vld [vmem:[%s10190_s8 + $0x420] sm:$0xf0] }
 0x306   :  { %4128 = vmatpush.bf16.msra.mxu1 %v5777_v0  ;;  %v3810_v54 = vpop.f32.mrf.mxu3  ;;  %v6113_v0 = vor.u32 %v6755_v49, %v6112_v48  ;;  %v5917_v9 = vor.u32 %v6706_v58, %v5916_v56 }
 0x307   :  { %4154 = vmatpush.bf16.msra.mxu0 %v6225_v3  ;;  %v3811_v59 = vadd.f32 %v3810_v54, %v2635_v25  ;;  %v3836_v60 = vpop.f32.mrf.mxu2  ;;  %v5469_v3 = vor.u32 %v6594_v53, %v5468_v52 }
 0x308   :  { %4114 = vmatpush.bf16.msra.mxu3 %v5581_v8 }
 0x309   :  { %4140 = vmatpush.bf16.msra.mxu2 %v6029_v45  ;;  %v3824_v8 = vadd.f32 %v10024_v14, %v3811_v59  ;;  %v6587_v45 = vld [vmem:[%s10190_s8 + $0x68] sm:$0xf0] }
 0x30a   :  { %4129 = vmatpush.bf16.msra.mxu1 %v5749_v16  ;;  %v3875_v12 = vpop.f32.mrf.mxu1  ;;  %v5888_v16 = vld [vmem:[%s10190_s8 + $0x3d0] sm:$0xf]  ;;  %v6699_v14 = vld [vmem:[%s10190_s8 + $0x3e8] sm:$0xf0]  ;;  %v5441_v19 = vor.u32 %v6587_v45, %v5440_v55 }
 0x30b   :  { %4155 = vmatpush.bf16.msra.mxu0 %v6197_v5  ;;  %v3837_v7 = vadd.f32 %v3836_v60, %v3824_v8  ;;  %v3901_v17 = vpop.f32.mrf.mxu0  ;;  %v6085_v5 = vor.u32 %v6748_v6, %v6084_v4  ;;  %v2638_v6 = vperm.slane %v10074_v40, 3 }
 0x30c   :  { %4115 = vmatpush.bf16.msra.mxu3 %v5553_v20  ;;  %v5889_v20 = vor.u32 %v6699_v14, %v5888_v16 }
 0x30d   :  { %4141 = vmatpush.bf16.msra.mxu2 %v6001_v23  ;;  %v3850_v42 = vadd.f32 %v10033_v18, %v3837_v7  ;;  %v6692_v18 = vld [vmem:[%s10190_s8 + $0x3b0] sm:$0xf0] }
 0x30e   :  { %4130 = vmatpush.bf16.msra.mxu1 %v5721_v27  ;;  %v3812_v23 = vpop.f32.mrf.mxu3  ;;  %v5861_v29 = vor.u32 %v6692_v18, %v5860_v24 }
 0x30f   :  { %4156 = vmatpush.bf16.msra.mxu0 %v6169_v32  ;;  %v4165_v26 = vmul.f32 0.5, %v3850_v42  ;;  %v3838_v27 = vpop.f32.mrf.mxu2  ;;  %v2639_v23 = vperm.slane %v10074_v40, 4 }
 0x310   :  { %4116 = vmatpush.bf16.msra.mxu3 %v5525_v34 }
 0x311   :  { %4142 = vmatpush.bf16.msra.mxu2 %v5973_v51  ;;  %6800 = vtanh.f32 %v4165_v26 }
 0x312   :  { %4131 = vmatpush.bf16.msra.mxu1 %v5693_v38  ;;  %v3877_v32 = vpop.f32.mrf.mxu1 }
 0x313   :  { %4157 = vmatpush.bf16.msra.mxu0 %v6141_v46  ;;  %v3903_v33 = vpop.f32.mrf.mxu0 }
 0x314   :  { %4117 = vmatpush.bf16.msra.mxu3 %v5497_v47 }
 0x315   :  { %4143 = vmatpush.bf16.msra.mxu2 %v5945_v50 }
 0x316   :  { %4132 = vmatpush.bf16.msra.mxu1 %v5665_v31  ;;  %v3862_v34 = vpop.f32.mrf.mxu3 }
 0x317   :  { %4158 = vmatpush.bf16.msra.mxu0 %v6113_v0  ;;  %v6801_v36 = vpop.eup %6800  ;;  %v3863_v39 = vadd.f32 %v3862_v34, %v2636_v62  ;;  %v3888_v51 = vpop.f32.mrf.mxu2 }
 0x318   :  { %4118 = vmatpush.bf16.msra.mxu3 %v5469_v3  ;;  %v4179_v15 = vadd.f32 1.0, %v6801_v36 }
 0x319   :  { %4144 = vmatpush.bf16.msra.mxu2 %v5917_v9  ;;  %v3876_v41 = vadd.f32 %v3875_v12, %v3863_v39 }
 0x31a   :  { %4133 = vmatpush.bf16.msra.mxu1 %v5637_v13  ;;  %v3927_v57 = vpop.f32.mrf.mxu1 }
 0x31b   :  { %4159 = vmatpush.bf16.msra.mxu0 %v6085_v5  ;;  %v3889_v38 = vadd.f32 %v3888_v51, %v3876_v41 }
 0x31c   :  { %4119 = vmatpush.bf16.msra.mxu3 %v5441_v19 }
 0x31d   :  { %4145 = vmatpush.bf16.msra.mxu2 %v5889_v20  ;;  %4134 = vmatmul.bf16.vlgmr.msra.gmra.mxu1 %v9159_v63  ;;  %v4186_v63 = vmul.f32 0.5, %v4179_v15  ;;  %v3902_v11 = vadd.f32 %v3901_v17, %v3889_v38 }
 0x31e   :  { %4160 = vmatmul.bf16.vlgmr.msra.gmra.mxu0 %v9167_v10  ;;  %v3953_v10 = vpop.f32.mrf.mxu0  ;;  %v3864_v43 = vpop.f32.mrf.mxu3 }
 0x31f   :  { %4193 = vst [vmem:[%s10195_s10] sm:$0xff] %v4186_v63  ;;  %v4166_v44 = vmul.f32 0.5, %v3902_v11  ;;  %v3890_v46 = vpop.f32.mrf.mxu2 }
 0x320   :  { %4120 = vmatpush.bf16.msra.mxu3 %v5413_v28 }
 0x321   :  { %4146 = vmatpush.bf16.msra.mxu2 %v5861_v29  ;;  %6802 = vtanh.f32 %v4166_v44 }
 0x322   :  { %v3929_v25 = vpop.f32.mrf.mxu1 }
 0x323   :  { %4121 = vmatmul.bf16.vlgmr.msra.gmra.mxu3 %v9201_v61  ;;  %v2637_v61 = vperm.slane %v10074_v40, 2 }
 0x324   :  { %4147 = vmatmul.bf16.vlgmr.msra.gmra.mxu2 %v9209_v2 }
 0x326   :  { %v3955_v30 = vpop.f32.mrf.mxu0  ;;  %v3914_v35 = vpop.f32.mrf.mxu3 }
 0x327   :  { %v6803_v2 = vpop.eup %6802  ;;  %v3915_v47 = vadd.f32 %v3914_v35, %v2637_v61  ;;  %v3940_v48 = vpop.f32.mrf.mxu2 }
 0x328   :  { %v4180_v49 = vadd.f32 1.0, %v6803_v2 }
 0x329   :  { %v3928_v50 = vadd.f32 %v3927_v57, %v3915_v47  ;;  %v2640_v57 = vperm.slane %v10074_v40, 5 }
 0x32a   :  { %v4187_v52 = vmul.f32 0.5, %v4180_v49 }
 0x32b   :  { %v3941_v53 = vadd.f32 %v3940_v48, %v3928_v50 }
 0x32c   :  { %4194 = vst [vmem:[%s10195_s10 + $0x8] sm:$0xff] %v4187_v52 }
 0x32d   :  { %v3954_v54 = vadd.f32 %v3953_v10, %v3941_v53  ;;  %v2641_v53 = vperm.slane %v10074_v40, 6 }
 0x32e   :  { %v3916_v31 = vpop.f32.mrf.mxu3 }
 0x32f   :  { %v4167_v56 = vmul.f32 0.5, %v3954_v54  ;;  %v3942_v58 = vpop.f32.mrf.mxu2 }
 0x331   :  { %6804 = vtanh.f32 %v4167_v56 }
 0x337   :  { %v6805_v59 = vpop.eup %6804 }
 0x338   :  { %v4181_v0 = vadd.f32 1.0, %v6805_v59 }
 0x33a   :  { %v3979_v60 = vpop.f32.mrf.mxu1  ;;  %v4188_v1 = vmul.f32 0.5, %v4181_v0 }
 0x33b   :  { %v4005_v37 = vpop.f32.mrf.mxu0 }
 0x33c   :  { %4195 = vst [vmem:[%s10195_s10 + $0x10] sm:$0xff] %v4188_v1 }
 0x342   :  { %v3981_v3 = vpop.f32.mrf.mxu1 }
 0x343   :  { %v4007_v4 = vpop.f32.mrf.mxu0 }
 0x346   :  { %v3966_v8 = vpop.f32.mrf.mxu3 }
 0x347   :  { %v3967_v9 = vadd.f32 %v3966_v8, %v2638_v6  ;;  %v3992_v55 = vpop.f32.mrf.mxu2 }
 0x349   :  { %v3980_v45 = vadd.f32 %v3979_v60, %v3967_v9 }
 0x34b   :  { %v3993_v12 = vadd.f32 %v3992_v55, %v3980_v45 }
 0x34d   :  { %v4006_v13 = vadd.f32 %v4005_v37, %v3993_v12 }
 0x34e   :  { %v3968_v16 = vpop.f32.mrf.mxu3 }
 0x34f   :  { %v4168_v14 = vmul.f32 0.5, %v4006_v13  ;;  %v3994_v7 = vpop.f32.mrf.mxu2 }
 0x351   :  { %6806 = vtanh.f32 %v4168_v14 }
 0x357   :  { %v6807_v17 = vpop.eup %6806 }
 0x358   :  { %v4182_v19 = vadd.f32 1.0, %v6807_v17 }
 0x35a   :  { %v4031_v5 = vpop.f32.mrf.mxu1  ;;  %v4189_v20 = vmul.f32 0.5, %v4182_v19 }
 0x35b   :  { %v4057_v42 = vpop.f32.mrf.mxu0 }
 0x35c   :  { %4196 = vst [vmem:[%s10195_s10 + $0x18] sm:$0xff] %v4189_v20 }
 0x362   :  { %v4033_v21 = vpop.f32.mrf.mxu1 }
 0x363   :  { %v4059_v22 = vpop.f32.mrf.mxu0 }
 0x366   :  { %v4018_v24 = vpop.f32.mrf.mxu3 }
 0x367   :  { %v4019_v18 = vadd.f32 %v4018_v24, %v2639_v23  ;;  %v4044_v26 = vpop.f32.mrf.mxu2 }
 0x369   :  { %v4032_v27 = vadd.f32 %v4031_v5, %v4019_v18 }
 0x36b   :  { %v4045_v28 = vadd.f32 %v4044_v26, %v4032_v27 }
 0x36d   :  { %v4058_v29 = vadd.f32 %v4057_v42, %v4045_v28 }
 0x36e   :  { %v4020_v32 = vpop.f32.mrf.mxu3 }
 0x36f   :  { %v4169_v33 = vmul.f32 0.5, %v4058_v29  ;;  %v4046_v62 = vpop.f32.mrf.mxu2 }
 0x371   :  { %6808 = vtanh.f32 %v4169_v33 }
 0x377   :  { %v6809_v34 = vpop.eup %6808 }
 0x378   :  { %v4183_v39 = vadd.f32 1.0, %v6809_v34 }
 0x37a   :  { %v4083_v36 = vpop.f32.mrf.mxu1  ;;  %v4190_v15 = vmul.f32 0.5, %v4183_v39 }
 0x37b   :  { %v4109_v51 = vpop.f32.mrf.mxu0 }
 0x37c   :  { %4197 = vst [vmem:[%s10195_s10 + $0x20] sm:$0xff] %v4190_v15 }
 0x382   :  { %v4085_v41 = vpop.f32.mrf.mxu1 }
 0x383   :  { %v4111_v63 = vpop.f32.mrf.mxu0 }
 0x386   :  { %v4070_v38 = vpop.f32.mrf.mxu3 }
 0x387   :  { %v4071_v10 = vadd.f32 %v4070_v38, %v2640_v57  ;;  %v4096_v11 = vpop.f32.mrf.mxu2 }
 0x389   :  { %v4084_v43 = vadd.f32 %v4083_v36, %v4071_v10 }
 0x38b   :  { %v4097_v44 = vadd.f32 %v4096_v11, %v4084_v43 }
 0x38d   :  { %v4110_v46 = vadd.f32 %v4109_v51, %v4097_v44 }
 0x38e   :  { %v4072_v25 = vpop.f32.mrf.mxu3 }
 0x38f   :  { %v4170_v30 = vmul.f32 0.5, %v4110_v46  ;;  %v4098_v61 = vpop.f32.mrf.mxu2 }
 0x391   :  { %6810 = vtanh.f32 %v4170_v30 }
 0x397   :  { %v6811_v35 = vpop.eup %6810 }
 0x398   :  { %v4184_v47 = vadd.f32 1.0, %v6811_v35 }
 0x39a   :  { %v4135_v2 = vpop.f32.mrf.mxu1  ;;  %v4191_v49 = vmul.f32 0.5, %v4184_v47 }
 0x39b   :  { %v4161_v48 = vpop.f32.mrf.mxu0 }
 0x39c   :  { %4198 = vst [vmem:[%s10195_s10 + $0x28] sm:$0xff] %v4191_v49 }
 0x3a2   :  { %v4137_v50 = vpop.f32.mrf.mxu1 }
 0x3a3   :  { %v4163_v52 = vpop.f32.mrf.mxu0 }
 0x3a6   :  { %v4122_v54 = vpop.f32.mrf.mxu3 }
 0x3a7   :  { %v4123_v31 = vadd.f32 %v4122_v54, %v2641_v53  ;;  %v4148_v56 = vpop.f32.mrf.mxu2 }
 0x3a9   :  { %v4136_v58 = vadd.f32 %v4135_v2, %v4123_v31 }
 0x3ab   :  { %v4149_v59 = vadd.f32 %v4148_v56, %v4136_v58 }
 0x3ad   :  { %v4162_v60 = vadd.f32 %v4161_v48, %v4149_v59 }
 0x3ae   :  { %v4124_v0 = vpop.f32.mrf.mxu3 }
 0x3af   :  { %v4171_v37 = vmul.f32 0.5, %v4162_v60  ;;  %v4150_v1 = vpop.f32.mrf.mxu2 }
 0x3b1   :  { %6812 = vtanh.f32 %v4171_v37 }
 0x3b7   :  { %v6813_v3 = vpop.eup %6812 }
 0x3b8   :  { %v4185_v4 = vadd.f32 1.0, %v6813_v3 }
 0x3ba   :  { %v4192_v6 = vmul.f32 0.5, %v4185_v4 }
 0x3bc   :  { %4199 = vst.msk [vmem:[%s10195_s10 + $0x30] sm:$0xff] %vm1239_vm0, %v4192_v6 }

</bundles_post_ra>
